<compile_context>
chip_gen: v6e
topology: v6e:2x2x1
jax: 0.10.0
libtpu: 0.0.40
codegen_flags: <defaults>
</compile_context>

<pallas_src>
import functools

import numpy as np
import jax
import jax.numpy as jnp
from jax import lax
from jax.experimental import pallas as pl
from jax.experimental.pallas import tpu as pltpu


_LRELU_SLOPE = 0.2
_ROW_BYTES_TARGET = 2 * 1024 * 1024     # per-step activation-block budget
_VMEM_LIMIT = 56 * 1024 * 1024          # <= v7x physical VMEM with headroom


def _round_up(v, m):
    return -(-v // m) * m


def conv_out_hw(h, w, stride):
    return (h + 4 - 4) // stride + 1, (w + 4 - 4) // stride + 1


def pool_out_hw(h, w):
    return (h + 2 - 3) // 2 + 1, (w + 2 - 3) // 2 + 1


# --------------------------- fused conv kernels ----------------------------- #
def _conv_kernel(x_ref, w_ref, b_ref, o_ref, *, offsets, TL, neg_slope):
    # x_ref: (P,1,1,(TR+ndh)*Wb,Cin) bf16   w_ref: (P,T,Cin,Cout) bf16
    # b_ref: (1,Cout) f32                   o_ref: (1,1,TL,Cout)
    cout = o_ref.shape[-1]
    acc = jnp.zeros((TL, cout), jnp.float32)
    for p, t, o in offsets:                       # static tap loop (<=16 dots)
        xs = x_ref[p, 0, 0, pl.ds(o, TL), :]
        acc = acc + jnp.dot(xs, w_ref[p, t], preferred_element_type=jnp.float32)
    z = acc + b_ref[...]
    if neg_slope is not None:
        z = jnp.where(z >= 0, z, neg_slope * z)
    o_ref[0, 0] = z.astype(o_ref.dtype)


def _conv_bn_kernel(x_ref, w_ref, b_ref, m_ref, o_ref, s1_ref, s2_ref, *,
                    offsets, TL):
    # Same as _conv_kernel, plus fused per-tile channel sum / sum-of-squares
    # (seam columns / padded rows masked) for the following BatchNorm.
    cout = o_ref.shape[-1]
    acc = jnp.zeros((TL, cout), jnp.float32)
    for p, t, o in offsets:
        xs = x_ref[p, 0, 0, pl.ds(o, TL), :]
        acc = acc + jnp.dot(xs, w_ref[p, t], preferred_element_type=jnp.float32)
    z = acc + b_ref[...]
    zm = z * m_ref[0]                            # (TL,1) validity mask broadcast
    s1_ref[0, 0] = jnp.sum(zm, axis=0, keepdims=True)
    s2_ref[0, 0] = jnp.sum(z * zm, axis=0, keepdims=True)
    o_ref[0, 0] = z.astype(o_ref.dtype)


@functools.partial(jax.jit, static_argnames=("stride", "lrelu", "want_stats",
                                              "out_dtype", "crop_h", "crop_w"))
def conv2d_fused(x, w, b, in_scale=None, in_shift=None, *, stride, lrelu,
                 want_stats, out_dtype=jnp.bfloat16, crop_h=None, crop_w=None):
    """Conv2d(kernel=4, padding=2).  x: (N,>=H,>=W,Cin) (cropped to crop_h/crop_w);
    optional fused BN-affine + LeakyReLU on the input (applied before padding).
    Returns the output in padded layout (N, n_tiles*TR, Wb, Cout)."""
    if crop_h is not None:
        x = x[:, :crop_h, :crop_w, :]
    N, H, W, Cin = x.shape
    KH, KW, _, Cout = w.shape
    s, pad = stride, 2
    Ho = (H + 2 * pad - KH) // s + 1
    Wo = (W + 2 * pad - KW) // s + 1
    ndh, ndw = KH // s, KW // s                     # taps per phase along h / w
    P, T = s * s, ndh * ndw
    # sublane-aligned phase width (so dh*Wb tap offsets stay aligned)
    Wb = _round_up(max(-(-(W + 2 * pad) // s), Wo + ndw - 1), 16)
    # row tiling: ~2 MiB activation blocks per grid step
    tl_target = max(1, _ROW_BYTES_TARGET // (max(Cin, Cout) * 4))
    TR = max(1, min(Ho, tl_target // Wb))
    n_tiles = -(-Ho // TR)
    TL = TR * Wb
    Hb = max(-(-(H + 2 * pad) // s), n_tiles * TR + ndh)
    pad_b, pad_r = s * Hb - H - pad, s * Wb - W - pad

    # fused (previous layer's) BatchNorm affine + LeakyReLU, then pad + phase split
    xf = x.astype(jnp.float32)
    if in_scale is not None:
        xf = xf * in_scale + in_shift
        xf = jnp.where(xf >= 0, xf, _LRELU_SLOPE * xf)
    xp = jnp.pad(xf.astype(jnp.bfloat16),
                 ((0, 0), (pad, pad_b), (pad, pad_r), (0, 0)))
    xph = jnp.stack([xp[:, a::s, bb::s, :] for a in range(s) for bb in range(s)],
                    axis=0)                                       # (P,N,Hb,Wb,Cin)
    row_idx = np.asarray(np.arange(n_tiles)[:, None] * TR
                         + np.arange(TR + ndh)[None, :], np.int32)
    xt = xph[:, :, row_idx].reshape(P, N, n_tiles, (TR + ndh) * Wb, Cin)

    # weights grouped by phase: wg[a*s+b, dh*ndw+dw] == w[s*dh+a, s*dw+b]
    wg = (w.astype(jnp.bfloat16)
          .reshape(ndh, s, ndw, s, Cin, Cout)
          .transpose(1, 3, 0, 2, 4, 5)
          .reshape(P, T, Cin, Cout))
    b2 = b.reshape(1, Cout).astype(jnp.float32)
    offsets = tuple((a * s + bb, dh * ndw + dw, dh * Wb + dw)
                    for a in range(s) for bb in range(s)
                    for dh in range(ndh) for dw in range(ndw))

    grid = (N, n_tiles)
    x_spec = pl.BlockSpec((P, 1, 1, (TR + ndh) * Wb, Cin),
                          lambda n, t: (0, n, t, 0, 0))
    w_spec = pl.BlockSpec((P, T, Cin, Cout), lambda n, t: (0, 0, 0, 0))
    b_spec = pl.BlockSpec((1, Cout), lambda n, t: (0, 0))
    cparams = pltpu.CompilerParams(
        dimension_semantics=("parallel", "parallel"),
        vmem_limit_bytes=_VMEM_LIMIT)

    if want_stats:
        valid = np.zeros((n_tiles * TR, Wb), np.float32)
        valid[:Ho, :Wo] = 1.0                       # seam cols / pad rows masked
        mask = jnp.asarray(valid.reshape(n_tiles, TL, 1))
        y, s1, s2 = pl.pallas_call(
            functools.partial(_conv_bn_kernel, offsets=offsets, TL=TL),
            grid=grid,
            in_specs=[x_spec, w_spec, b_spec,
                      pl.BlockSpec((1, TL, 1), lambda n, t: (t, 0, 0))],
            out_specs=(pl.BlockSpec((1, 1, TL, Cout), lambda n, t: (n, t, 0, 0)),
                       pl.BlockSpec((1, 1, 1, Cout), lambda n, t: (n, t, 0, 0)),
                       pl.BlockSpec((1, 1, 1, Cout), lambda n, t: (n, t, 0, 0))),
            out_shape=(jax.ShapeDtypeStruct((N, n_tiles, TL, Cout), out_dtype),
                       jax.ShapeDtypeStruct((N, n_tiles, 1, Cout), jnp.float32),
                       jax.ShapeDtypeStruct((N, n_tiles, 1, Cout), jnp.float32)),
            compiler_params=cparams,
        )(xt, wg, b2, mask)
        y = y.reshape(N, n_tiles * TR, Wb, Cout)
        return y, s1.sum(axis=(0, 1, 2)), s2.sum(axis=(0, 1, 2))

    y = pl.pallas_call(
        functools.partial(_conv_kernel, offsets=offsets, TL=TL,
                          neg_slope=_LRELU_SLOPE if lrelu else None),
        grid=grid,
        in_specs=[x_spec, w_spec, b_spec],
        out_specs=pl.BlockSpec((1, 1, TL, Cout), lambda n, t: (n, t, 0, 0)),
        out_shape=jax.ShapeDtypeStruct((N, n_tiles, TL, Cout), out_dtype),
        compiler_params=cparams,
    )(xt, wg, b2)
    return y.reshape(N, n_tiles * TR, Wb, Cout)


# ------------- BatchNorm (batch stats) scale/shift from fused sums ---------- #
@functools.partial(jax.jit, static_argnames=("count",))
def _bn_scale_shift(s1, s2, gamma, beta, count):
    """Training-mode BatchNorm2d (biased batch stats over valid N,H,W)."""
    eps = 1e-5
    mean = s1 / count
    var = jnp.maximum(s2 / count - mean * mean, 0.0)
    scale = gamma * lax.rsqrt(var + eps)
    shift = beta - mean * scale
    return scale, shift


# ---------- AvgPool2d(3, stride=2, padding=1, count_include_pad=False) ------ #
def _avgpool_kernel(x_ref, inv_ref, o_ref, *, offsets, TL):
    c = o_ref.shape[-1]
    acc = jnp.zeros((TL, c), jnp.float32)
    for p, o in offsets:                            # 9 static shifted adds
        acc = acc + x_ref[p, 0, 0, pl.ds(o, TL), :].astype(jnp.float32)
    o_ref[0, 0] = (acc * inv_ref[0]).astype(o_ref.dtype)


@functools.partial(jax.jit, static_argnames=("crop_h", "crop_w"))
def avgpool3x3_s2_p1(x, *, crop_h, crop_w):
    """AvgPool2d(3, stride=2, padding=1, count_include_pad=False) on NHWC.
    Returns the output in padded layout (N, n_tiles*TR, Wb, C), bf16."""
    x = x[:, :crop_h, :crop_w, :]
    N, H, W, C = x.shape
    s, k, pad = 2, 3, 1
    Ho = (H + 2 * pad - k) // s + 1
    Wo = (W + 2 * pad - k) // s + 1
    ndh = ndw = 2
    P = s * s
    Wb = _round_up(max(-(-(W + 2 * pad) // s), Wo + ndw - 1), 16)
    tl_target = max(1, _ROW_BYTES_TARGET // (max(C, 1) * 4))
    TR = max(1, min(Ho, tl_target // Wb))
    n_tiles = -(-Ho // TR)
    TL = TR * Wb
    Hb = max(-(-(H + 2 * pad) // s), n_tiles * TR + ndh)
    pad_b, pad_r = s * Hb - H - pad, s * Wb - W - pad

    xp = jnp.pad(x.astype(jnp.bfloat16),
                 ((0, 0), (pad, pad_b), (pad, pad_r), (0, 0)))
    xph = jnp.stack([xp[:, a::s, bb::s, :] for a in range(s) for bb in range(s)],
                    axis=0)
    row_idx = np.asarray(np.arange(n_tiles)[:, None] * TR
                         + np.arange(TR + ndh)[None, :], np.int32)
    xt = xph[:, :, row_idx].reshape(P, N, n_tiles, (TR + ndh) * Wb, C)

    offsets = tuple(((kh % s) * s + (kw % s), (kh // s) * Wb + (kw // s))
                    for kh in range(k) for kw in range(k))

    # count_include_pad=False divisor (static data, built with numpy)
    ones = np.pad(np.ones((H, W), np.float32), ((pad, pad), (pad, pad)))
    cnt = np.zeros((Ho, Wo), np.float32)
    for kh in range(k):
        for kw in range(k):
            cnt += ones[kh:kh + s * (Ho - 1) + 1:s, kw:kw + s * (Wo - 1) + 1:s]
    inv_full = np.ones((n_tiles * TR, Wb), np.float32)
    inv_full[:Ho, :Wo] = 1.0 / cnt
    inv = jnp.asarray(inv_full.reshape(n_tiles, TL, 1))

    out = pl.pallas_call(
        functools.partial(_avgpool_kernel, offsets=offsets, TL=TL),
        grid=(N, n_tiles),
        in_specs=[pl.BlockSpec((P, 1, 1, (TR + ndh) * Wb, C),
                               lambda n, t: (0, n, t, 0, 0)),
                  pl.BlockSpec((1, TL, 1), lambda n, t: (t, 0, 0))],
        out_specs=pl.BlockSpec((1, 1, TL, C), lambda n, t: (n, t, 0, 0)),
        out_shape=jax.ShapeDtypeStruct((N, n_tiles, TL, C), jnp.bfloat16),
        compiler_params=pltpu.CompilerParams(
            dimension_semantics=("parallel", "parallel"),
            vmem_limit_bytes=_VMEM_LIMIT),
    )(xt, inv)
    return out.reshape(N, n_tiles * TR, Wb, C)


# ------------------------- parameters & model glue -------------------------- #
def init_nlayer_params(key, input_nc, ndf, n_layers):
    """NLayerDiscriminator(getIntermFeat=False, use_sigmoid=False, Ddropout=False)."""
    def conv_p(k, cin, cout):
        k1, k2 = jax.random.split(k)
        w = 0.05 * jax.random.normal(k1, (4, 4, cin, cout), jnp.float32)
        b = 0.05 * jax.random.normal(k2, (cout,), jnp.float32)
        return w, b

    def bn_p(k, c):
        kg, kb = jax.random.split(k)
        return (1.0 + 0.1 * jax.random.normal(kg, (c,), jnp.float32),
                0.1 * jax.random.normal(kb, (c,), jnp.float32))

    keys = jax.random.split(key, n_layers + 2)
    layers, nf = [], ndf
    w, b = conv_p(keys[0], input_nc, ndf)
    layers.append(dict(w=w, b=b, stride=2, bn=None, lrelu=True))
    for n in range(1, n_layers):
        nf_prev, nf = nf, min(nf * 2, 512)
        w, b = conv_p(keys[n], nf_prev, nf)
        layers.append(dict(w=w, b=b, stride=2,
                           bn=bn_p(jax.random.fold_in(keys[n], 7), nf), lrelu=True))
    nf_prev, nf = nf, min(nf * 2, 512)
    w, b = conv_p(keys[n_layers], nf_prev, nf)
    layers.append(dict(w=w, b=b, stride=1,
                       bn=bn_p(jax.random.fold_in(keys[n_layers], 7), nf), lrelu=True))
    w, b = conv_p(keys[n_layers + 1], nf, 1)
    layers.append(dict(w=w, b=b, stride=1, bn=None, lrelu=False))
    return layers


def nlayer_forward(layers, act):
    """act = (array in padded layout, valid_h, valid_w)."""
    y, h, w = act
    n = y.shape[0]
    pend = None                     # pending (scale, shift) of a BatchNorm+LReLU
    for i, L in enumerate(layers):
        last = i == len(layers) - 1
        in_scale, in_shift = pend if pend is not None else (None, None)
        ho, wo = conv_out_hw(h, w, L["stride"])
        if L["bn"] is None:
            y = conv2d_fused(y, L["w"], L["b"], in_scale, in_shift,
                             stride=L["stride"], lrelu=L["lrelu"],
                             want_stats=False,
                             out_dtype=jnp.float32 if last else jnp.bfloat16,
                             crop_h=h, crop_w=w)
            pend = None
        else:
            y, s1, s2 = conv2d_fused(y, L["w"], L["b"], in_scale, in_shift,
                                     stride=L["stride"], lrelu=False,
                                     want_stats=True, out_dtype=jnp.bfloat16,
                                     crop_h=h, crop_w=w)
            gamma, beta = L["bn"]
            pend = _bn_scale_shift(s1, s2, gamma, beta, n * ho * wo)
        h, w = ho, wo
    return y, h, w


def multiscale_forward(params_per_D, x_nchw, *, ddownx2=False):
    """MultiscaleDiscriminator.forward (getIntermFeat=False, use_sigmoid=False)."""
    x = jnp.transpose(x_nchw, (0, 2, 3, 1)).astype(jnp.float32)  # NCHW -> NHWC
    N, H, W, _ = x.shape
    num_D = len(params_per_D)
    act = (x, H, W)
    if ddownx2:
        y, h, w = act
        act = (avgpool3x3_s2_p1(y, crop_h=h, crop_w=w),) + pool_out_hw(h, w)
    result = []
    for i in range(num_D):
        layers = params_per_D[num_D - 1 - i]
        out, oh, ow = nlayer_forward(layers, act)
        out = out[:, :oh, :ow, :]
        result.append([jnp.transpose(out, (0, 3, 1, 2))])         # back to NCHW
        if i != num_D - 1:
            y, h, w = act
            act = (avgpool3x3_s2_p1(y, crop_h=h, crop_w=w),) + pool_out_hw(h, w)
    return result


if __name__ == "__main__":
    key = jax.random.PRNGKey(0)
    kx, kp = jax.random.split(key)
    input_nc, ndf, n_layers, num_D = 4, 16, 3, 3
    x = jax.random.normal(kx, (2, input_nc, 16, 16), jnp.float32)
    pkeys = jax.random.split(kp, num_D)
    params = [init_nlayer_params(pkeys[i], input_nc, ndf, n_layers)
              for i in range(num_D)]
    result = multiscale_forward(params, x)
    for scale_out in result:
        for t in scale_out:
            jax.block_until_ready(t)
    print("KERNEL_OK")
</pallas_src>

<mosaic_0001>
module attributes {stable_mosaic.version = 11 : i64} {
  func.func @_conv_kernel(%arg0: i32, %arg1: i32, %arg2: memref<4x1x1x176x4xbf16, #tpu.memory_space<vmem>>, %arg3: memref<4x4x4x16xbf16, #tpu.memory_space<vmem>>, %arg4: memref<1x16xf32, #tpu.memory_space<vmem>>, %arg5: memref<1x1x144x16xbf16, #tpu.memory_space<vmem>>) attributes {dimension_semantics = [#tpu.dimension_semantics<parallel>, #tpu.dimension_semantics<parallel>], iteration_bounds = array<i64: 2, 1>, scalar_prefetch = 0 : i64, scratch_operands = 0 : i64, tpu.core_type = #tpu.core_type<tc>, window_params = [{transform_indices = @transform_0, window_bounds = array<i64: 4, 1, 1, 176, 4>}, {pipeline_mode = #tpu.pipeline_mode<synchronous>, transform_indices = @transform_1, window_bounds = array<i64: 4, 4, 4, 16>}, {pipeline_mode = #tpu.pipeline_mode<synchronous>, transform_indices = @transform_2, window_bounds = array<i64: 1, 16>}, {transform_indices = @transform_3, window_bounds = array<i64: 1, 1, 144, 16>}]} {
    %cst = arith.constant 0.000000e+00 : f32
    %0 = vector.broadcast %cst : f32 to vector<144x16xf32>
    %c0 = arith.constant 0 : index
    %c0_0 = arith.constant 0 : index
    %c0_1 = arith.constant 0 : index
    %c0_2 = arith.constant 0 : index
    %c0_3 = arith.constant 0 : index
    %1 = vector.load %arg2[%c0, %c0_0, %c0_1, %c0_2, %c0_3] : memref<4x1x1x176x4xbf16, #tpu.memory_space<vmem>>, vector<1x1x1x144x4xbf16>
    %2 = vector.shape_cast %1 : vector<1x1x1x144x4xbf16> to vector<144x4xbf16>
    %c0_4 = arith.constant 0 : index
    %c0_5 = arith.constant 0 : index
    %c0_6 = arith.constant 0 : index
    %c0_7 = arith.constant 0 : index
    %3 = vector.load %arg3[%c0_4, %c0_5, %c0_6, %c0_7] : memref<4x4x4x16xbf16, #tpu.memory_space<vmem>>, vector<1x1x4x16xbf16>
    %4 = vector.shape_cast %3 : vector<1x1x4x16xbf16> to vector<4x16xbf16>
    %cst_8 = arith.constant dense<0.000000e+00> : vector<144x16xf32>
    %5 = tpu.matmul %2, %4, %cst_8 {dimension_numbers = #tpu.dot_dimension_numbers<[1], [0], [0], [1], [0, 0, 1, 1], [], []>} : vector<144x4xbf16>, vector<4x16xbf16>, vector<144x16xf32> -> vector<144x16xf32>
    %6 = arith.addf %0, %5 : vector<144x16xf32>
    %c0_9 = arith.constant 0 : index
    %c0_10 = arith.constant 0 : index
    %c0_11 = arith.constant 0 : index
    %c1 = arith.constant 1 : index
    %c0_12 = arith.constant 0 : index
    %7 = vector.load %arg2[%c0_9, %c0_10, %c0_11, %c1, %c0_12] : memref<4x1x1x176x4xbf16, #tpu.memory_space<vmem>>, vector<1x1x1x144x4xbf16>
    %8 = vector.shape_cast %7 : vector<1x1x1x144x4xbf16> to vector<144x4xbf16>
    %c0_13 = arith.constant 0 : index
    %c1_14 = arith.constant 1 : index
    %c0_15 = arith.constant 0 : index
    %c0_16 = arith.constant 0 : index
    %9 = vector.load %arg3[%c0_13, %c1_14, %c0_15, %c0_16] : memref<4x4x4x16xbf16, #tpu.memory_space<vmem>>, vector<1x1x4x16xbf16>
    %10 = vector.shape_cast %9 : vector<1x1x4x16xbf16> to vector<4x16xbf16>
    %cst_17 = arith.constant dense<0.000000e+00> : vector<144x16xf32>
    %11 = tpu.matmul %8, %10, %cst_17 {dimension_numbers = #tpu.dot_dimension_numbers<[1], [0], [0], [1], [0, 0, 1, 1], [], []>} : vector<144x4xbf16>, vector<4x16xbf16>, vector<144x16xf32> -> vector<144x16xf32>
    %12 = arith.addf %6, %11 : vector<144x16xf32>
    %c0_18 = arith.constant 0 : index
    %c0_19 = arith.constant 0 : index
    %c0_20 = arith.constant 0 : index
    %c16 = arith.constant 16 : index
    %c0_21 = arith.constant 0 : index
    %13 = vector.load %arg2[%c0_18, %c0_19, %c0_20, %c16, %c0_21] : memref<4x1x1x176x4xbf16, #tpu.memory_space<vmem>>, vector<1x1x1x144x4xbf16>
    %14 = vector.shape_cast %13 : vector<1x1x1x144x4xbf16> to vector<144x4xbf16>
    %c0_22 = arith.constant 0 : index
    %c2 = arith.constant 2 : index
    %c0_23 = arith.constant 0 : index
    %c0_24 = arith.constant 0 : index
    %15 = vector.load %arg3[%c0_22, %c2, %c0_23, %c0_24] : memref<4x4x4x16xbf16, #tpu.memory_space<vmem>>, vector<1x1x4x16xbf16>
    %16 = vector.shape_cast %15 : vector<1x1x4x16xbf16> to vector<4x16xbf16>
    %cst_25 = arith.constant dense<0.000000e+00> : vector<144x16xf32>
    %17 = tpu.matmul %14, %16, %cst_25 {dimension_numbers = #tpu.dot_dimension_numbers<[1], [0], [0], [1], [0, 0, 1, 1], [], []>} : vector<144x4xbf16>, vector<4x16xbf16>, vector<144x16xf32> -> vector<144x16xf32>
    %18 = arith.addf %12, %17 : vector<144x16xf32>
    %c0_26 = arith.constant 0 : index
    %c0_27 = arith.constant 0 : index
    %c0_28 = arith.constant 0 : index
    %c17 = arith.constant 17 : index
    %c0_29 = arith.constant 0 : index
    %19 = vector.load %arg2[%c0_26, %c0_27, %c0_28, %c17, %c0_29] : memref<4x1x1x176x4xbf16, #tpu.memory_space<vmem>>, vector<1x1x1x144x4xbf16>
    %20 = vector.shape_cast %19 : vector<1x1x1x144x4xbf16> to vector<144x4xbf16>
    %c0_30 = arith.constant 0 : index
    %c3 = arith.constant 3 : index
    %c0_31 = arith.constant 0 : index
    %c0_32 = arith.constant 0 : index
    %21 = vector.load %arg3[%c0_30, %c3, %c0_31, %c0_32] : memref<4x4x4x16xbf16, #tpu.memory_space<vmem>>, vector<1x1x4x16xbf16>
    %22 = vector.shape_cast %21 : vector<1x1x4x16xbf16> to vector<4x16xbf16>
    %cst_33 = arith.constant dense<0.000000e+00> : vector<144x16xf32>
    %23 = tpu.matmul %20, %22, %cst_33 {dimension_numbers = #tpu.dot_dimension_numbers<[1], [0], [0], [1], [0, 0, 1, 1], [], []>} : vector<144x4xbf16>, vector<4x16xbf16>, vector<144x16xf32> -> vector<144x16xf32>
    %24 = arith.addf %18, %23 : vector<144x16xf32>
    %c1_34 = arith.constant 1 : index
    %c0_35 = arith.constant 0 : index
    %c0_36 = arith.constant 0 : index
    %c0_37 = arith.constant 0 : index
    %c0_38 = arith.constant 0 : index
    %25 = vector.load %arg2[%c1_34, %c0_35, %c0_36, %c0_37, %c0_38] : memref<4x1x1x176x4xbf16, #tpu.memory_space<vmem>>, vector<1x1x1x144x4xbf16>
    %26 = vector.shape_cast %25 : vector<1x1x1x144x4xbf16> to vector<144x4xbf16>
    %c1_39 = arith.constant 1 : index
    %c0_40 = arith.constant 0 : index
    %c0_41 = arith.constant 0 : index
    %c0_42 = arith.constant 0 : index
    %27 = vector.load %arg3[%c1_39, %c0_40, %c0_41, %c0_42] : memref<4x4x4x16xbf16, #tpu.memory_space<vmem>>, vector<1x1x4x16xbf16>
    %28 = vector.shape_cast %27 : vector<1x1x4x16xbf16> to vector<4x16xbf16>
    %cst_43 = arith.constant dense<0.000000e+00> : vector<144x16xf32>
    %29 = tpu.matmul %26, %28, %cst_43 {dimension_numbers = #tpu.dot_dimension_numbers<[1], [0], [0], [1], [0, 0, 1, 1], [], []>} : vector<144x4xbf16>, vector<4x16xbf16>, vector<144x16xf32> -> vector<144x16xf32>
    %30 = arith.addf %24, %29 : vector<144x16xf32>
    %c1_44 = arith.constant 1 : index
    %c0_45 = arith.constant 0 : index
    %c0_46 = arith.constant 0 : index
    %c1_47 = arith.constant 1 : index
    %c0_48 = arith.constant 0 : index
    %31 = vector.load %arg2[%c1_44, %c0_45, %c0_46, %c1_47, %c0_48] : memref<4x1x1x176x4xbf16, #tpu.memory_space<vmem>>, vector<1x1x1x144x4xbf16>
    %32 = vector.shape_cast %31 : vector<1x1x1x144x4xbf16> to vector<144x4xbf16>
    %c1_49 = arith.constant 1 : index
    %c1_50 = arith.constant 1 : index
    %c0_51 = arith.constant 0 : index
    %c0_52 = arith.constant 0 : index
    %33 = vector.load %arg3[%c1_49, %c1_50, %c0_51, %c0_52] : memref<4x4x4x16xbf16, #tpu.memory_space<vmem>>, vector<1x1x4x16xbf16>
    %34 = vector.shape_cast %33 : vector<1x1x4x16xbf16> to vector<4x16xbf16>
    %cst_53 = arith.constant dense<0.000000e+00> : vector<144x16xf32>
    %35 = tpu.matmul %32, %34, %cst_53 {dimension_numbers = #tpu.dot_dimension_numbers<[1], [0], [0], [1], [0, 0, 1, 1], [], []>} : vector<144x4xbf16>, vector<4x16xbf16>, vector<144x16xf32> -> vector<144x16xf32>
    %36 = arith.addf %30, %35 : vector<144x16xf32>
    %c1_54 = arith.constant 1 : index
    %c0_55 = arith.constant 0 : index
    %c0_56 = arith.constant 0 : index
    %c16_57 = arith.constant 16 : index
    %c0_58 = arith.constant 0 : index
    %37 = vector.load %arg2[%c1_54, %c0_55, %c0_56, %c16_57, %c0_58] : memref<4x1x1x176x4xbf16, #tpu.memory_space<vmem>>, vector<1x1x1x144x4xbf16>
    %38 = vector.shape_cast %37 : vector<1x1x1x144x4xbf16> to vector<144x4xbf16>
    %c1_59 = arith.constant 1 : index
    %c2_60 = arith.constant 2 : index
    %c0_61 = arith.constant 0 : index
    %c0_62 = arith.constant 0 : index
    %39 = vector.load %arg3[%c1_59, %c2_60, %c0_61, %c0_62] : memref<4x4x4x16xbf16, #tpu.memory_space<vmem>>, vector<1x1x4x16xbf16>
    %40 = vector.shape_cast %39 : vector<1x1x4x16xbf16> to vector<4x16xbf16>
    %cst_63 = arith.constant dense<0.000000e+00> : vector<144x16xf32>
    %41 = tpu.matmul %38, %40, %cst_63 {dimension_numbers = #tpu.dot_dimension_numbers<[1], [0], [0], [1], [0, 0, 1, 1], [], []>} : vector<144x4xbf16>, vector<4x16xbf16>, vector<144x16xf32> -> vector<144x16xf32>
    %42 = arith.addf %36, %41 : vector<144x16xf32>
    %c1_64 = arith.constant 1 : index
    %c0_65 = arith.constant 0 : index
    %c0_66 = arith.constant 0 : index
    %c17_67 = arith.constant 17 : index
    %c0_68 = arith.constant 0 : index
    %43 = vector.load %arg2[%c1_64, %c0_65, %c0_66, %c17_67, %c0_68] : memref<4x1x1x176x4xbf16, #tpu.memory_space<vmem>>, vector<1x1x1x144x4xbf16>
    %44 = vector.shape_cast %43 : vector<1x1x1x144x4xbf16> to vector<144x4xbf16>
    %c1_69 = arith.constant 1 : index
    %c3_70 = arith.constant 3 : index
    %c0_71 = arith.constant 0 : index
    %c0_72 = arith.constant 0 : index
    %45 = vector.load %arg3[%c1_69, %c3_70, %c0_71, %c0_72] : memref<4x4x4x16xbf16, #tpu.memory_space<vmem>>, vector<1x1x4x16xbf16>
    %46 = vector.shape_cast %45 : vector<1x1x4x16xbf16> to vector<4x16xbf16>
    %cst_73 = arith.constant dense<0.000000e+00> : vector<144x16xf32>
    %47 = tpu.matmul %44, %46, %cst_73 {dimension_numbers = #tpu.dot_dimension_numbers<[1], [0], [0], [1], [0, 0, 1, 1], [], []>} : vector<144x4xbf16>, vector<4x16xbf16>, vector<144x16xf32> -> vector<144x16xf32>
    %48 = arith.addf %42, %47 : vector<144x16xf32>
    %c2_74 = arith.constant 2 : index
    %c0_75 = arith.constant 0 : index
    %c0_76 = arith.constant 0 : index
    %c0_77 = arith.constant 0 : index
    %c0_78 = arith.constant 0 : index
    %49 = vector.load %arg2[%c2_74, %c0_75, %c0_76, %c0_77, %c0_78] : memref<4x1x1x176x4xbf16, #tpu.memory_space<vmem>>, vector<1x1x1x144x4xbf16>
    %50 = vector.shape_cast %49 : vector<1x1x1x144x4xbf16> to vector<144x4xbf16>
    %c2_79 = arith.constant 2 : index
    %c0_80 = arith.constant 0 : index
    %c0_81 = arith.constant 0 : index
    %c0_82 = arith.constant 0 : index
    %51 = vector.load %arg3[%c2_79, %c0_80, %c0_81, %c0_82] : memref<4x4x4x16xbf16, #tpu.memory_space<vmem>>, vector<1x1x4x16xbf16>
    %52 = vector.shape_cast %51 : vector<1x1x4x16xbf16> to vector<4x16xbf16>
    %cst_83 = arith.constant dense<0.000000e+00> : vector<144x16xf32>
    %53 = tpu.matmul %50, %52, %cst_83 {dimension_numbers = #tpu.dot_dimension_numbers<[1], [0], [0], [1], [0, 0, 1, 1], [], []>} : vector<144x4xbf16>, vector<4x16xbf16>, vector<144x16xf32> -> vector<144x16xf32>
    %54 = arith.addf %48, %53 : vector<144x16xf32>
    %c2_84 = arith.constant 2 : index
    %c0_85 = arith.constant 0 : index
    %c0_86 = arith.constant 0 : index
    %c1_87 = arith.constant 1 : index
    %c0_88 = arith.constant 0 : index
    %55 = vector.load %arg2[%c2_84, %c0_85, %c0_86, %c1_87, %c0_88] : memref<4x1x1x176x4xbf16, #tpu.memory_space<vmem>>, vector<1x1x1x144x4xbf16>
    %56 = vector.shape_cast %55 : vector<1x1x1x144x4xbf16> to vector<144x4xbf16>
    %c2_89 = arith.constant 2 : index
    %c1_90 = arith.constant 1 : index
    %c0_91 = arith.constant 0 : index
    %c0_92 = arith.constant 0 : index
    %57 = vector.load %arg3[%c2_89, %c1_90, %c0_91, %c0_92] : memref<4x4x4x16xbf16, #tpu.memory_space<vmem>>, vector<1x1x4x16xbf16>
    %58 = vector.shape_cast %57 : vector<1x1x4x16xbf16> to vector<4x16xbf16>
    %cst_93 = arith.constant dense<0.000000e+00> : vector<144x16xf32>
    %59 = tpu.matmul %56, %58, %cst_93 {dimension_numbers = #tpu.dot_dimension_numbers<[1], [0], [0], [1], [0, 0, 1, 1], [], []>} : vector<144x4xbf16>, vector<4x16xbf16>, vector<144x16xf32> -> vector<144x16xf32>
    %60 = arith.addf %54, %59 : vector<144x16xf32>
    %c2_94 = arith.constant 2 : index
    %c0_95 = arith.constant 0 : index
    %c0_96 = arith.constant 0 : index
    %c16_97 = arith.constant 16 : index
    %c0_98 = arith.constant 0 : index
    %61 = vector.load %arg2[%c2_94, %c0_95, %c0_96, %c16_97, %c0_98] : memref<4x1x1x176x4xbf16, #tpu.memory_space<vmem>>, vector<1x1x1x144x4xbf16>
    %62 = vector.shape_cast %61 : vector<1x1x1x144x4xbf16> to vector<144x4xbf16>
    %c2_99 = arith.constant 2 : index
    %c2_100 = arith.constant 2 : index
    %c0_101 = arith.constant 0 : index
    %c0_102 = arith.constant 0 : index
    %63 = vector.load %arg3[%c2_99, %c2_100, %c0_101, %c0_102] : memref<4x4x4x16xbf16, #tpu.memory_space<vmem>>, vector<1x1x4x16xbf16>
    %64 = vector.shape_cast %63 : vector<1x1x4x16xbf16> to vector<4x16xbf16>
    %cst_103 = arith.constant dense<0.000000e+00> : vector<144x16xf32>
    %65 = tpu.matmul %62, %64, %cst_103 {dimension_numbers = #tpu.dot_dimension_numbers<[1], [0], [0], [1], [0, 0, 1, 1], [], []>} : vector<144x4xbf16>, vector<4x16xbf16>, vector<144x16xf32> -> vector<144x16xf32>
    %66 = arith.addf %60, %65 : vector<144x16xf32>
    %c2_104 = arith.constant 2 : index
    %c0_105 = arith.constant 0 : index
    %c0_106 = arith.constant 0 : index
    %c17_107 = arith.constant 17 : index
    %c0_108 = arith.constant 0 : index
    %67 = vector.load %arg2[%c2_104, %c0_105, %c0_106, %c17_107, %c0_108] : memref<4x1x1x176x4xbf16, #tpu.memory_space<vmem>>, vector<1x1x1x144x4xbf16>
    %68 = vector.shape_cast %67 : vector<1x1x1x144x4xbf16> to vector<144x4xbf16>
    %c2_109 = arith.constant 2 : index
    %c3_110 = arith.constant 3 : index
    %c0_111 = arith.constant 0 : index
    %c0_112 = arith.constant 0 : index
    %69 = vector.load %arg3[%c2_109, %c3_110, %c0_111, %c0_112] : memref<4x4x4x16xbf16, #tpu.memory_space<vmem>>, vector<1x1x4x16xbf16>
    %70 = vector.shape_cast %69 : vector<1x1x4x16xbf16> to vector<4x16xbf16>
    %cst_113 = arith.constant dense<0.000000e+00> : vector<144x16xf32>
    %71 = tpu.matmul %68, %70, %cst_113 {dimension_numbers = #tpu.dot_dimension_numbers<[1], [0], [0], [1], [0, 0, 1, 1], [], []>} : vector<144x4xbf16>, vector<4x16xbf16>, vector<144x16xf32> -> vector<144x16xf32>
    %72 = arith.addf %66, %71 : vector<144x16xf32>
    %c3_114 = arith.constant 3 : index
    %c0_115 = arith.constant 0 : index
    %c0_116 = arith.constant 0 : index
    %c0_117 = arith.constant 0 : index
    %c0_118 = arith.constant 0 : index
    %73 = vector.load %arg2[%c3_114, %c0_115, %c0_116, %c0_117, %c0_118] : memref<4x1x1x176x4xbf16, #tpu.memory_space<vmem>>, vector<1x1x1x144x4xbf16>
    %74 = vector.shape_cast %73 : vector<1x1x1x144x4xbf16> to vector<144x4xbf16>
    %c3_119 = arith.constant 3 : index
    %c0_120 = arith.constant 0 : index
    %c0_121 = arith.constant 0 : index
    %c0_122 = arith.constant 0 : index
    %75 = vector.load %arg3[%c3_119, %c0_120, %c0_121, %c0_122] : memref<4x4x4x16xbf16, #tpu.memory_space<vmem>>, vector<1x1x4x16xbf16>
    %76 = vector.shape_cast %75 : vector<1x1x4x16xbf16> to vector<4x16xbf16>
    %cst_123 = arith.constant dense<0.000000e+00> : vector<144x16xf32>
    %77 = tpu.matmul %74, %76, %cst_123 {dimension_numbers = #tpu.dot_dimension_numbers<[1], [0], [0], [1], [0, 0, 1, 1], [], []>} : vector<144x4xbf16>, vector<4x16xbf16>, vector<144x16xf32> -> vector<144x16xf32>
    %78 = arith.addf %72, %77 : vector<144x16xf32>
    %c3_124 = arith.constant 3 : index
    %c0_125 = arith.constant 0 : index
    %c0_126 = arith.constant 0 : index
    %c1_127 = arith.constant 1 : index
    %c0_128 = arith.constant 0 : index
    %79 = vector.load %arg2[%c3_124, %c0_125, %c0_126, %c1_127, %c0_128] : memref<4x1x1x176x4xbf16, #tpu.memory_space<vmem>>, vector<1x1x1x144x4xbf16>
    %80 = vector.shape_cast %79 : vector<1x1x1x144x4xbf16> to vector<144x4xbf16>
    %c3_129 = arith.constant 3 : index
    %c1_130 = arith.constant 1 : index
    %c0_131 = arith.constant 0 : index
    %c0_132 = arith.constant 0 : index
    %81 = vector.load %arg3[%c3_129, %c1_130, %c0_131, %c0_132] : memref<4x4x4x16xbf16, #tpu.memory_space<vmem>>, vector<1x1x4x16xbf16>
    %82 = vector.shape_cast %81 : vector<1x1x4x16xbf16> to vector<4x16xbf16>
    %cst_133 = arith.constant dense<0.000000e+00> : vector<144x16xf32>
    %83 = tpu.matmul %80, %82, %cst_133 {dimension_numbers = #tpu.dot_dimension_numbers<[1], [0], [0], [1], [0, 0, 1, 1], [], []>} : vector<144x4xbf16>, vector<4x16xbf16>, vector<144x16xf32> -> vector<144x16xf32>
    %84 = arith.addf %78, %83 : vector<144x16xf32>
    %c3_134 = arith.constant 3 : index
    %c0_135 = arith.constant 0 : index
    %c0_136 = arith.constant 0 : index
    %c16_137 = arith.constant 16 : index
    %c0_138 = arith.constant 0 : index
    %85 = vector.load %arg2[%c3_134, %c0_135, %c0_136, %c16_137, %c0_138] : memref<4x1x1x176x4xbf16, #tpu.memory_space<vmem>>, vector<1x1x1x144x4xbf16>
    %86 = vector.shape_cast %85 : vector<1x1x1x144x4xbf16> to vector<144x4xbf16>
    %c3_139 = arith.constant 3 : index
    %c2_140 = arith.constant 2 : index
    %c0_141 = arith.constant 0 : index
    %c0_142 = arith.constant 0 : index
    %87 = vector.load %arg3[%c3_139, %c2_140, %c0_141, %c0_142] : memref<4x4x4x16xbf16, #tpu.memory_space<vmem>>, vector<1x1x4x16xbf16>
    %88 = vector.shape_cast %87 : vector<1x1x4x16xbf16> to vector<4x16xbf16>
    %cst_143 = arith.constant dense<0.000000e+00> : vector<144x16xf32>
    %89 = tpu.matmul %86, %88, %cst_143 {dimension_numbers = #tpu.dot_dimension_numbers<[1], [0], [0], [1], [0, 0, 1, 1], [], []>} : vector<144x4xbf16>, vector<4x16xbf16>, vector<144x16xf32> -> vector<144x16xf32>
    %90 = arith.addf %84, %89 : vector<144x16xf32>
    %c3_144 = arith.constant 3 : index
    %c0_145 = arith.constant 0 : index
    %c0_146 = arith.constant 0 : index
    %c17_147 = arith.constant 17 : index
    %c0_148 = arith.constant 0 : index
    %91 = vector.load %arg2[%c3_144, %c0_145, %c0_146, %c17_147, %c0_148] : memref<4x1x1x176x4xbf16, #tpu.memory_space<vmem>>, vector<1x1x1x144x4xbf16>
    %92 = vector.shape_cast %91 : vector<1x1x1x144x4xbf16> to vector<144x4xbf16>
    %c3_149 = arith.constant 3 : index
    %c3_150 = arith.constant 3 : index
    %c0_151 = arith.constant 0 : index
    %c0_152 = arith.constant 0 : index
    %93 = vector.load %arg3[%c3_149, %c3_150, %c0_151, %c0_152] : memref<4x4x4x16xbf16, #tpu.memory_space<vmem>>, vector<1x1x4x16xbf16>
    %94 = vector.shape_cast %93 : vector<1x1x4x16xbf16> to vector<4x16xbf16>
    %cst_153 = arith.constant dense<0.000000e+00> : vector<144x16xf32>
    %95 = tpu.matmul %92, %94, %cst_153 {dimension_numbers = #tpu.dot_dimension_numbers<[1], [0], [0], [1], [0, 0, 1, 1], [], []>} : vector<144x4xbf16>, vector<4x16xbf16>, vector<144x16xf32> -> vector<144x16xf32>
    %96 = arith.addf %90, %95 : vector<144x16xf32>
    %c0_154 = arith.constant 0 : index
    %c0_155 = arith.constant 0 : index
    %97 = vector.load %arg4[%c0_154, %c0_155] : memref<1x16xf32, #tpu.memory_space<vmem>>, vector<1x16xf32>
    %98 = vector.broadcast %97 : vector<1x16xf32> to vector<144x16xf32>
    %99 = arith.addf %96, %98 : vector<144x16xf32>
    %cst_156 = arith.constant 0.000000e+00 : f32
    %100 = vector.broadcast %cst_156 : f32 to vector<144x16xf32>
    %101 = arith.cmpf oge, %99, %100 : vector<144x16xf32>
    %cst_157 = arith.constant 2.000000e-01 : f32
    %102 = vector.broadcast %cst_157 : f32 to vector<144x16xf32>
    %103 = arith.mulf %102, %99 : vector<144x16xf32>
    %104 = arith.select %101, %99, %103 : vector<144x16xi1>, vector<144x16xf32>
    %105 = arith.truncf %104 : vector<144x16xf32> to vector<144x16xbf16>
    %c0_158 = arith.constant 0 : index
    %c0_159 = arith.constant 0 : index
    %c0_160 = arith.constant 0 : index
    %c0_161 = arith.constant 0 : index
    %106 = vector.load %arg5[%c0_158, %c0_159, %c0_160, %c0_161] : memref<1x1x144x16xbf16, #tpu.memory_space<vmem>>, vector<1x1x144x16xbf16>
    %107 = vector.shape_cast %106 : vector<1x1x144x16xbf16> to vector<144x16xbf16>
    %108 = vector.shape_cast %105 : vector<144x16xbf16> to vector<1x1x144x16xbf16>
    tpu.vector_store %arg5[%c0_158, %c0_159, %c0_160, %c0_161], %108 {strides = array<i32>} : memref<1x1x144x16xbf16, #tpu.memory_space<vmem>>, vector<1x1x144x16xbf16>,
    return
  }
  func.func @transform_0(%arg0: i32, %arg1: i32) -> (i32, i32, i32, i32, i32) {
    %c0_i32 = arith.constant 0 : i32
    %c0_i32_0 = arith.constant 0 : i32
    %c0_i32_1 = arith.constant 0 : i32
    %c0_i32_2 = arith.constant 0 : i32
    return %c0_i32, %arg0, %arg1, %c0_i32_0, %c0_i32_1 : i32, i32, i32, i32, i32
  }
  func.func @transform_1(%arg0: i32, %arg1: i32) -> (i32, i32, i32, i32) {
    %c0_i32 = arith.constant 0 : i32
    %c0_i32_0 = arith.constant 0 : i32
    %c0_i32_1 = arith.constant 0 : i32
    %c0_i32_2 = arith.constant 0 : i32
    %c0_i32_3 = arith.constant 0 : i32
    return %c0_i32, %c0_i32_0, %c0_i32_1, %c0_i32_2 : i32, i32, i32, i32
  }
  func.func @transform_2(%arg0: i32, %arg1: i32) -> (i32, i32) {
    %c0_i32 = arith.constant 0 : i32
    %c0_i32_0 = arith.constant 0 : i32
    %c0_i32_1 = arith.constant 0 : i32
    return %c0_i32, %c0_i32_0 : i32, i32
  }
  func.func @transform_3(%arg0: i32, %arg1: i32) -> (i32, i32, i32, i32) {
    %c0_i32 = arith.constant 0 : i32
    %c0_i32_0 = arith.constant 0 : i32
    %c0_i32_1 = arith.constant 0 : i32
    return %arg0, %arg1, %c0_i32, %c0_i32_0 : i32, i32, i32, i32
  }
}

</mosaic_0001>

<bundles_post_ra>
// kernel: conv2d_fused.1
= control target key start
LH: loop header
LB: loop body
LE: loop exit
PB: predicated region body
PF: predicated region fallthrough
CT: control target
= control target key end

     0   :  { %8 = vsyncpa [#allocation4], 0  ;;  %s7905_s0 = inlined_call_operand.vmem [shape: bf16[4,2,1,176,4], index: 0, kind: input, shape index: {}]   ;;  %s7906_s1 = inlined_call_operand.vmem [shape: bf16[4,4,4,16], index: 1, kind: input, shape index: {}]   ;;  %s7907_s2 = inlined_call_operand.vmem [shape: f32[1,16], index: 2, kind: input, shape index: {}]   ;;  %s7908_s3 = inlined_call_operand.hbm [shape: bf16[2,1,144,16], index: 3, kind: output, shape index: {}]  }
   0x1   :  { %10 = vsyncpa [#allocation4 + $0x1], 0  ;;  %s6521_s12 = smov 0   ;;  %s6523_s13 = smov 0  }
   0x2   :  { %s6525_s14 = smov 0   ;;  %s6527_s15 = smov 0  }
   0x3   :  { %s6529_s16 = smov 0   ;;  %s6531_s17 = smov 0  }
   0x4 LB: > { %s4873_s18 = sadd.s32 4294967295, %s6494_s17   ;;  %s4874_s19 = sadd.s32 4294967294, %s6494_s17   ;;  %s6494_s17 = sphi %s6531_s17, %s16_s17   ;;  %s6490_s16 = sphi %s6529_s16, %s7915_s16   ;;  %s6486_s15 = sphi %s6527_s15, %s7914_s15   ;;  %s6482_s14 = sphi %s6525_s14, %s7913_s14   ;;  %s6478_s13 = sphi %s6523_s13, %s7912_s13   ;;  %s6474_s12 = sphi %s6521_s12, %s7911_s12  }
   0x5   : > { %s28_s20 = sadd.s32 1, %s6490_s16  ;;  %s37_s21 = sadd.s32 1, %s6482_s14 }
   0x6   : > { %p30_p0 = scmp.ge.s32.totalorder %s28_s20, 2  ;;  %p44_p1 = scmp.ne.s32.totalorder %s6482_s14, %s6478_s13 }
   0x7   : > { %p45_p2 = scmp.eq.s32.totalorder %s6494_s17, 0  ;;  %p118_p3 = scmp.eq.s32.totalorder %s4873_s18, 1 }
   0x8   : > { %s7917_s20 = smov (%p30_p0, %s28_s20), 0  ;;  %p123_p6 = scmp.ne.s32.totalorder %s6478_s13, %s6474_s12 }
   0x9   : > { %p46_p4 = por %p45_p2, %p44_p1  ;;  %p6560_p5 = por %p118_p3, %p44_p1 }
   0xa   : > { %s32_s23 = ssub.s32 %s6490_s16, %s7917_s20  ;;  %p124_p8 = scmp.eq.s32.totalorder %s4874_s19, 1 }
   0xb   : > { %p35_p7 = scmp.eq.s32.totalorder %s32_s23, 0  ;;  %p4876_p10 = scmp.ge.s32.totalorder %s6494_s17, 2 }
   0xc   : > { %p6571_p9 = por %p124_p8, %p123_p6 }
   0xd   : > { %s6569_s24 = scalar_select %p35_p7, %s6482_s14, %s37_s21  }
   0xe   : > { %146 = sbr.rel (%p4876_p10) target bundleno = 46 (0x2e), region = 24 }
  0x13   : > { %149 = sbr.rel (!%p46_p4) target bundleno = 46 (0x2e), region = 28  ;;  %s151_s26 = sand.u32 (%p46_p4), 1, %s6482_s14  }
  0x14   : > { %s6212_s27 = smul.u32 (%p46_p4), 88, %s6490_s16 }
  0x15   : > { %s6211_s28 = smul.u32 (%p46_p4), 352, %s151_s26 }
  0x16   : > { %s6583_s4 = scalar_lea.vmem (%p46_p4), %s7905_s0, %s6212_s27 }
  0x17   : > { %v175_v0 = vld [vmem:[%s6583_s4] sm:$0xff] (%p46_p4)   ;;  %v179_v1 = vld [vmem:[%s6583_s4 + $0x8] sm:$0xff] (%p46_p4)   ;;  %v183_v2 = vld [vmem:[%s6583_s4 + $0x10] sm:$0xff] (%p46_p4)   ;;  %s6588_s5 = scalar_lea.vmem (%p46_p4), [#allocation2], %s6211_s28 }
  0x18   : > { %176 = vst [vmem:[%s6588_s5] sm:$0xff] %v175_v0   ;;  %180 = vst [vmem:[%s6588_s5 + $0x8] sm:$0xff] %v179_v1   ;;  %v187_v3 = vld [vmem:[%s6583_s4 + $0x18] sm:$0xff]   ;;  %v191_v4 = vld [vmem:[%s6583_s4 + $0x20] sm:$0xff]  }
  0x19   : > { %184 = vst [vmem:[%s6588_s5 + $0x10] sm:$0xff] %v183_v2   ;;  %v195_v5 = vld [vmem:[%s6583_s4 + $0x28] sm:$0xff]   ;;  %188 = vst [vmem:[%s6588_s5 + $0x18] sm:$0xff] %v187_v3   ;;  %v199_v6 = vld [vmem:[%s6583_s4 + $0x30] sm:$0xff]  }
  0x1a   : > { %192 = vst [vmem:[%s6588_s5 + $0x20] sm:$0xff] %v191_v4   ;;  %196 = vst [vmem:[%s6588_s5 + $0x28] sm:$0xff] %v195_v5   ;;  %v203_v7 = vld [vmem:[%s6583_s4 + $0x38] sm:$0xff]   ;;  %v207_v8 = vld [vmem:[%s6583_s4 + $0x40] sm:$0xff]  }
  0x1b   : > { %200 = vst [vmem:[%s6588_s5 + $0x30] sm:$0xff] %v199_v6   ;;  %204 = vst [vmem:[%s6588_s5 + $0x38] sm:$0xff] %v203_v7   ;;  %v211_v9 = vld [vmem:[%s6583_s4 + $0x48] sm:$0xff]   ;;  %v215_v10 = vld [vmem:[%s6583_s4 + $0x50] sm:$0xff]  }
  0x1c   : > { %208 = vst [vmem:[%s6588_s5 + $0x40] sm:$0xff] %v207_v8   ;;  %v219_v11 = vld [vmem:[%s6583_s4 + $0xb0] sm:$0xff]   ;;  %212 = vst [vmem:[%s6588_s5 + $0x48] sm:$0xff] %v211_v9   ;;  %v223_v12 = vld [vmem:[%s6583_s4 + $0xb8] sm:$0xff]  }
  0x1d   : > { %216 = vst [vmem:[%s6588_s5 + $0x50] sm:$0xff] %v215_v10   ;;  %220 = vst [vmem:[%s6588_s5 + $0x58] sm:$0xff] %v219_v11   ;;  %v227_v13 = vld [vmem:[%s6583_s4 + $0xc0] sm:$0xff]   ;;  %v231_v14 = vld [vmem:[%s6583_s4 + $0xc8] sm:$0xff]  }
  0x1e   : > { %224 = vst [vmem:[%s6588_s5 + $0x60] sm:$0xff] %v223_v12   ;;  %228 = vst [vmem:[%s6588_s5 + $0x68] sm:$0xff] %v227_v13   ;;  %v235_v15 = vld [vmem:[%s6583_s4 + $0xd0] sm:$0xff]   ;;  %v239_v16 = vld [vmem:[%s6583_s4 + $0xd8] sm:$0xff]  }
  0x1f   : > { %232 = vst [vmem:[%s6588_s5 + $0x70] sm:$0xff] %v231_v14   ;;  %v243_v17 = vld [vmem:[%s6583_s4 + $0xe0] sm:$0xff]   ;;  %236 = vst [vmem:[%s6588_s5 + $0x78] sm:$0xff] %v235_v15   ;;  %v247_v18 = vld [vmem:[%s6583_s4 + $0xe8] sm:$0xff]  }
  0x20   : > { %240 = vst [vmem:[%s6588_s5 + $0x80] sm:$0xff] %v239_v16   ;;  %244 = vst [vmem:[%s6588_s5 + $0x88] sm:$0xff] %v243_v17   ;;  %v251_v19 = vld [vmem:[%s6583_s4 + $0xf0] sm:$0xff]   ;;  %v255_v20 = vld [vmem:[%s6583_s4 + $0xf8] sm:$0xff]  }
  0x21   : > { %248 = vst [vmem:[%s6588_s5 + $0x90] sm:$0xff] %v247_v18   ;;  %252 = vst [vmem:[%s6588_s5 + $0x98] sm:$0xff] %v251_v19   ;;  %v259_v21 = vld [vmem:[%s6583_s4 + $0x100] sm:$0xff]   ;;  %v267_v23 = vld [vmem:[%s6583_s4 + $0x168] sm:$0xff]  }
  0x22   : > { %256 = vst [vmem:[%s6588_s5 + $0xa0] sm:$0xff] %v255_v20   ;;  %v263_v22 = vld [vmem:[%s6583_s4 + $0x160] sm:$0xff]   ;;  %260 = vst [vmem:[%s6588_s5 + $0xa8] sm:$0xff] %v259_v21   ;;  %v271_v24 = vld [vmem:[%s6583_s4 + $0x170] sm:$0xff]  }
  0x23   : > { %264 = vst [vmem:[%s6588_s5 + $0xb0] sm:$0xff] %v263_v22   ;;  %268 = vst [vmem:[%s6588_s5 + $0xb8] sm:$0xff] %v267_v23   ;;  %v275_v25 = vld [vmem:[%s6583_s4 + $0x178] sm:$0xff]   ;;  %v279_v26 = vld [vmem:[%s6583_s4 + $0x180] sm:$0xff]  }
  0x24   : > { %272 = vst [vmem:[%s6588_s5 + $0xc0] sm:$0xff] %v271_v24   ;;  %276 = vst [vmem:[%s6588_s5 + $0xc8] sm:$0xff] %v275_v25   ;;  %v283_v27 = vld [vmem:[%s6583_s4 + $0x188] sm:$0xff]   ;;  %v287_v28 = vld [vmem:[%s6583_s4 + $0x190] sm:$0xff]  }
  0x25   : > { %280 = vst [vmem:[%s6588_s5 + $0xd0] sm:$0xff] %v279_v26   ;;  %v291_v29 = vld [vmem:[%s6583_s4 + $0x198] sm:$0xff]   ;;  %284 = vst [vmem:[%s6588_s5 + $0xd8] sm:$0xff] %v283_v27   ;;  %v295_v30 = vld [vmem:[%s6583_s4 + $0x1a0] sm:$0xff]  }
  0x26   : > { %288 = vst [vmem:[%s6588_s5 + $0xe0] sm:$0xff] %v287_v28   ;;  %292 = vst [vmem:[%s6588_s5 + $0xe8] sm:$0xff] %v291_v29   ;;  %v299_v31 = vld [vmem:[%s6583_s4 + $0x1a8] sm:$0xff]   ;;  %v303_v32 = vld [vmem:[%s6583_s4 + $0x1b0] sm:$0xff]  }
  0x27   : > { %296 = vst [vmem:[%s6588_s5 + $0xf0] sm:$0xff] %v295_v30   ;;  %300 = vst [vmem:[%s6588_s5 + $0xf8] sm:$0xff] %v299_v31   ;;  %v307_v33 = vld [vmem:[%s6583_s4 + $0x210] sm:$0xff]   ;;  %v311_v34 = vld [vmem:[%s6583_s4 + $0x218] sm:$0xff]  }
  0x28   : > { %304 = vst [vmem:[%s6588_s5 + $0x100] sm:$0xff] %v303_v32   ;;  %v315_v35 = vld [vmem:[%s6583_s4 + $0x220] sm:$0xff]   ;;  %308 = vst [vmem:[%s6588_s5 + $0x108] sm:$0xff] %v307_v33   ;;  %v319_v36 = vld [vmem:[%s6583_s4 + $0x228] sm:$0xff]  }
  0x29   : > { %312 = vst [vmem:[%s6588_s5 + $0x110] sm:$0xff] %v311_v34   ;;  %316 = vst [vmem:[%s6588_s5 + $0x118] sm:$0xff] %v315_v35   ;;  %v323_v37 = vld [vmem:[%s6583_s4 + $0x230] sm:$0xff]   ;;  %v327_v38 = vld [vmem:[%s6583_s4 + $0x238] sm:$0xff]  }
  0x2a   : > { %320 = vst [vmem:[%s6588_s5 + $0x120] sm:$0xff] %v319_v36   ;;  %324 = vst [vmem:[%s6588_s5 + $0x128] sm:$0xff] %v323_v37   ;;  %v331_v39 = vld [vmem:[%s6583_s4 + $0x240] sm:$0xff]   ;;  %v335_v40 = vld [vmem:[%s6583_s4 + $0x248] sm:$0xff]  }
  0x2b   : > { %328 = vst [vmem:[%s6588_s5 + $0x130] sm:$0xff] %v327_v38   ;;  %v339_v41 = vld [vmem:[%s6583_s4 + $0x250] sm:$0xff]   ;;  %332 = vst [vmem:[%s6588_s5 + $0x138] sm:$0xff] %v331_v39   ;;  %v343_v42 = vld [vmem:[%s6583_s4 + $0x258] sm:$0xff]  }
  0x2c   : > { %336 = vst [vmem:[%s6588_s5 + $0x140] sm:$0xff] %v335_v40   ;;  %340 = vst [vmem:[%s6588_s5 + $0x148] sm:$0xff] %v339_v41   ;;  %v347_v43 = vld [vmem:[%s6583_s4 + $0x260] sm:$0xff]  }
  0x2d   : > { %344 = vst [vmem:[%s6588_s5 + $0x150] sm:$0xff] %v343_v42   ;;  %348 = vst [vmem:[%s6588_s5 + $0x158] sm:$0xff] %v347_v43  }
  0x2e PF: > { %p4878_p11 = scmp.ge.s32.totalorder %s6494_s17, 1  ;;  %p549_p12 = scmp.lt.s32.totalorder %s6494_s17, 3 }
  0x30   : > { %p550_p13 = pnand %p4878_p11, %p549_p12 }
  0x31   : > { %s6681_s8 = sand.u32 (!%p550_p13), 1, %s6478_s13   ;;  %s6215_s19 = smul.u32 (!%p550_p13), 1152, %s6486_s15 }
  0x32   : > { %553 = sbr.rel (%p550_p13) target bundleno = 855 (0x357), region = 69  ;;  %s4776_s15 = scalar_lea.sflag (!%p550_p13), [#allocation4], %s6681_s8 }
  0x33   : > { %s6213_s11 = smul.u32 (!%p550_p13), 352, %s6681_s8  ;;  %s7853_s28 = scalar_lea.hbm (!%p550_p13), %s7908_s3, %s6215_s19 }
  0x34   : > { %s6498_s30 = smov (!%p550_p13), [#allocation3]  }
  0x35   : > { %s6698_s21 = scalar_lea.vmem (!%p550_p13), [#allocation2], %s6213_s11  ;;  %s6214_s11 = smul.u32 (!%p550_p13), 72, %s6681_s8 }
  0x36   : > { %s6422_s4 = sshll.u32 (!%p550_p13), %s6498_s30, 4  ;;  %s6423_s4 = int_to_ptr.vmem [resolvable:$false] %s6422_s4 }
  0x37   : > { %v598_v44 = vld [vmem:[%s7906_s1] sm:$0x3]  ;;  %vm755_vm0 = vcmask 1041408   ;;  %v6496_v45 = vmov 0.0   ;;  %v4879_v47 = vld [vmem:[%s7906_s1 + $0x2] sm:$0x3] }
  0x38   : > { %5641 = vmatprep.subr.bf16.mxu1 %v6496_v45  ;;  %v883_v46 = vsel %vm755_vm0, %v598_v44, 0  ;;  %5603 = vmatprep.subr.bf16.mxu0 %v6496_v45  ;;  %vm6497_vm1 = vmmov 0   ;;  %v757_v48 = vsel %vm755_vm0, %v4879_v47, 0  ;;  %vm727_vm2 = vcmask 31744   ;;  %v4927_v49 = vld [vmem:[%s7906_s1 + $0x6] sm:$0x3] }
  0x39   : > { %5642 = vmatpush3.bf16.msra.mxu1 %v883_v46  ;;  %5643 = vmatprep.mubr.msk.bf16.mxu1 %vm6497_vm1, %v6496_v45  ;;  %v6275_v50 = vld [vmem:[%s6698_s21] sm:$0xff]   ;;  %v1381_v51 = vsel %vm755_vm0, %v4927_v49, 0  ;;  %v6276_v52 = vld [vmem:[%s6698_s21 + $0x8] sm:$0xff]   ;;  %v6277_v57 = vld [vmem:[%s6698_s21 + $0x10] sm:$0xff]   ;;  %vm650_vm3 = vsmask.f32 7424 }
  0x3a   : > { %5604 = vmatpush3.bf16.msra.mxu0 %v757_v48  ;;  %5605 = vmatprep.mubr.msk.bf16.mxu0 %vm6497_vm1, %v6496_v45  ;;  %v652_v53 = vshrl.u32 %v6275_v50, 16  ;;  %v654_v54 = vshll.u32 %v6275_v50, 16  ;;  %v659_v55 = vshll.u32 %v6276_v52, 16  ;;  %v4908_v56 = vld [vmem:[%s7906_s1 + $0x4] sm:$0x3]  ;;  %v663_v61 = vshrl.u32 %v6276_v52, 16 }
  0x3b   : > { %5679 = vmatprep.subr.bf16.mxu0 %v6496_v45  ;;  %5717 = vmatprep.subr.bf16.mxu1 %v6496_v45  ;;  %v667_v62 = vshll.u32 %v6277_v57, 16  ;;  %v1083_v63 = vsel %vm755_vm0, %v4908_v56, 0  ;;  %v6278_v3 = vld [vmem:[%s6698_s21 + $0x18] sm:$0xff]   ;;  %v671_v5 = vshrl.u32 %v6277_v57, 16  ;;  %v6279_v9 = vld [vmem:[%s6698_s21 + $0x20] sm:$0xff]   ;;  %v6280_v15 = vld [vmem:[%s6698_s21 + $0x28] sm:$0xff]  }
  0x3c   : > { %5644 = vmatmul.mubr.msk.bf16.vlgmr.msra.gmra.mxu1 %vm727_vm2, %v6275_v50  ;;  %v656_v58 = vrot.slane %v654_v54, 1  ;;  %v661_v59 = vrot.slane %v659_v55, 1  ;;  %v675_v6 = vshll.u32 %v6278_v3, 16  ;;  %v679_v11 = vshrl.u32 %v6278_v3, 16  ;;  %v6281_v21 = vld [vmem:[%s6698_s21 + $0x30] sm:$0xff]   ;;  %v6282_v27 = vld [vmem:[%s6698_s21 + $0x38] sm:$0xff]  }
  0x3d   : > { %5718 = vmatpush3.bf16.msra.mxu1 %v1381_v51  ;;  %5647 = vmatprep.mubr.msk.bf16.mxu1 %vm6497_vm1, %v6496_v45  ;;  %v669_v2 = vrot.slane %v667_v62, 1  ;;  %v683_v12 = vshll.u32 %v6279_v9, 16  ;;  %v687_v17 = vshrl.u32 %v6279_v9, 16  ;;  %v691_v18 = vshll.u32 %v6280_v15, 16  ;;  %v6283_v31 = vld [vmem:[%s6698_s21 + $0x40] sm:$0xff]   ;;  %v6285_v40 = vld [vmem:[%s6698_s21 + $0x8] sm:$0xff]  }
  0x3e   : > { %5793 = vmatprep.subr.bf16.mxu1 %v6496_v45  ;;  %v657_v60 = vor.u32 %v656_v58, %v652_v53  ;;  %v665_v1 = vor.u32 %v663_v61, %v661_v59  ;;  %v677_v8 = vrot.slane %v675_v6, 1  ;;  %v695_v23 = vshrl.u32 %v6280_v15, 16  ;;  %v6284_v35 = vld [vmem:[%s6698_s21 + $0x48] ss:$0 sps:$4 sm:$0x11]   ;;  %v6286_v42 = vld [vmem:[%s6698_s21 + $0x10] sm:$0xff]  }
  0x3f   : > { %v673_v7 = vor.u32 %v671_v5, %v669_v2  ;;  %v685_v14 = vrot.slane %v683_v12, 1  ;;  %v693_v20 = vrot.slane %v691_v18, 1  ;;  %v699_v24 = vshll.u32 %v6281_v21, 16  ;;  %v6288_v53 = vld [vmem:[%s6698_s21 + $0x18] sm:$0xff]   ;;  %v5003_v55 = vld [vmem:[%s7906_s1 + $0xa] sm:$0x3] }
  0x40   : > { %v662_v0 = vsel %vm650_vm3, %v657_v60, %v661_v59  ;;  %v670_v4 = vsel %vm650_vm3, %v665_v1, %v669_v2  ;;  %v681_v13 = vor.u32 %v679_v11, %v677_v8  ;;  %v703_v28 = vshrl.u32 %v6281_v21, 16  ;;  %v4965_v61 = vld [vmem:[%s7906_s1 + $0x8] sm:$0x3]  ;;  %s7781_s18 = scalar_lea.vmem [#allocation3], %s6214_s11  ;;  %s6424_s5 = scalar_lea.vmem %s6423_s4, 2304 }
  0x41   : > { %5606 = vmatmul.mubr.msk.bf16.vlgmr.msra.gmra.mxu0 %vm727_vm2, %v662_v0  ;;  %v678_v10 = vsel %vm650_vm3, %v673_v7, %v677_v8  ;;  %v689_v19 = vor.u32 %v687_v17, %v685_v14  ;;  %v697_v25 = vor.u32 %v695_v23, %v693_v20  ;;  %v701_v26 = vrot.slane %v699_v24, 1  ;;  %v6287_v0 = vld [vmem:[%s6698_s21 + $0x8] sm:$0xff]   ;;  %v6293_v23 = vld [vmem:[%s6698_s21 + $0x20] sm:$0xff]   ;;  %s4791_s23 = sshll.u32 %s7781_s18, 4  ;;  %s7855_s23 = int_to_ptr.vmem [resolvable:$true] %s4791_s23 }
  0x42   : > { %5680 = vmatpush3.bf16.msra.mxu0 %v1083_v63  ;;  %5609 = vmatprep.mubr.msk.bf16.mxu0 %vm6497_vm1, %v6496_v45  ;;  %v686_v16 = vsel %vm650_vm3, %v681_v13, %v685_v14  ;;  %v707_v30 = vshll.u32 %v6282_v27, 16  ;;  %v715_v34 = vshll.u32 %v6283_v31, 16  ;;  %v711_v36 = vshrl.u32 %v6282_v27, 16  ;;  %v6290_v63 = vld [vmem:[%s6698_s21 + $0x20] sm:$0xff]   ;;  %v6292_v7 = vld [vmem:[%s6698_s21 + $0x28] sm:$0xff]   ;;  %v6294_v14 = vld [vmem:[%s6698_s21 + $0x30] sm:$0xff]   ;;  %p6425_p3 = scmp.lt.s32.totalorder %s7855_s23, %s6423_s4 }
  0x43   : > { %5755 = vmatprep.subr.bf16.mxu0 %v6496_v45  ;;  %v694_v22 = vsel %vm650_vm3, %v689_v19, %v693_v20  ;;  %v702_v29 = vsel %vm650_vm3, %v697_v25, %v701_v26  ;;  %v705_v32 = vor.u32 %v703_v28, %v701_v26  ;;  %v719_v37 = vshrl.u32 %v6283_v31, 16  ;;  %v6296_v20 = vld [vmem:[%s6698_s21 + $0x38] sm:$0xff]   ;;  %v6298_v28 = vld [vmem:[%s6698_s21 + $0x40] sm:$0xff]   ;;  %s6418_s29 = scalar_lea.vmem %s7855_s23, 1152 }
  0x44   : > { %5648 = vmatmul.mubr.msk.bf16.gmra.mxu1 %vm727_vm2, %v6276_v52  ;;  %v709_v33 = vrot.slane %v707_v30, 1  ;;  %v717_v39 = vrot.slane %v715_v34, 1  ;;  %v723_v41 = vshll.u32 %v6284_v35, 16  ;;  %v1278_v44 = vshrl.u32 %v6285_v40, 16  ;;  %v6300_v35 = vld [vmem:[%s6698_s21 + $0x48] sm:$0xff]   ;;  %p6419_p0 = scmp.ne.s32.totalorder %s7855_s23, %s6418_s29  ;;  %p6426_p4 = scmp.lt.s32.totalorder %s6424_s5, %s6418_s29 }
  0x45   : > { %5651 = vmatprep.mubr.msk.bf16.mxu1 %vm6497_vm1, %v6496_v45  ;;  %v1280_v46 = vshll.u32 %v6285_v40, 16  ;;  %v1285_v49 = vshll.u32 %v6286_v42, 16  ;;  %v1289_v59 = vshrl.u32 %v6286_v42, 16  ;;  %v1898_v60 = vsel %vm755_vm0, %v5003_v55, 0 }
  0x46   : > { %v710_v38 = vsel %vm650_vm3, %v705_v32, %v709_v33  ;;  %v713_v43 = vor.u32 %v711_v36, %v709_v33  ;;  %v725_v50 = vrot.slane %v723_v41, 1  ;;  %v721_v51 = vor.u32 %v719_v37, %v717_v39  ;;  %v6297_v36 = vld [vmem:[%s6698_s21 + $0x30] sm:$0xff]   ;;  %p6420_p1 = pnand %p6419_p0, %p6560_p5  ;;  %p6427_p6 = por %p6426_p4, %p6425_p3 }
  0x47   : > { %v1282_v48 = vrot.slane %v1280_v46, 1  ;;  %v1287_v52 = vrot.slane %v1285_v49, 1  ;;  %v1301_v2 = vshll.u32 %v6290_v63, 16  ;;  %v1297_v5 = vshrl.u32 %v6288_v53, 16  ;;  %v6304_v49 = vld [vmem:[%s6698_s21 + $0x58] sm:$0xff]  }
  0x48   : > { %v718_v47 = vsel %vm650_vm3, %v713_v43, %v717_v39  ;;  %v726_v56 = vsel %vm650_vm3, %v721_v51, %v725_v50  ;;  %v1305_v12 = vshrl.u32 %v6290_v63, 16  ;;  %v1313_v18 = vshrl.u32 %v6292_v7, 16  ;;  %v6302_v41 = vld [vmem:[%s6698_s21 + $0x50] ss:$0 sps:$4 sm:$0x11]   ;;  %v6299_v43 = vld [vmem:[%s6698_s21 + $0x38] sm:$0xff]   ;;  %p6421_p2 = pneg %p6420_p1 }
  0x49   : > { %5610 = vmatmul.mubr.msk.bf16.gmra.mxu0 %vm727_vm2, %v670_v4  ;;  %v1283_v54 = vor.u32 %v1282_v48, %v1278_v44  ;;  %v1291_v1 = vor.u32 %v1289_v59, %v1287_v52  ;;  %v1303_v6 = vrot.slane %v1301_v2, 1  ;;  %v1317_v19 = vshll.u32 %v6294_v14, 16  ;;  %v5079_v63 = vld [vmem:[%s7906_s1 + $0xe] sm:$0x3] }
  0x4a   : > { %5613 = vmatprep.mubr.msk.bf16.mxu0 %vm6497_vm1, %v6496_v45  ;;  %v1325_v24 = vshll.u32 %v6296_v20, 16  ;;  %v1321_v26 = vshrl.u32 %v6294_v14, 16  ;;  %v1329_v33 = vshrl.u32 %v6296_v20, 16  ;;  %v1337_v40 = vshrl.u32 %v6298_v28, 16  ;;  %p6428_p7 = pnand %p6427_p6, %p6421_p2 }
  0x4b   : > { %v1288_v58 = vsel %vm650_vm3, %v1283_v54, %v1287_v52  ;;  %v1345_v46 = vshrl.u32 %v6300_v35, 16  ;;  %v1349_v48 = vshll.u32 %v6302_v41, 16  ;;  %v6305_v52 = vld [vmem:[%s6698_s21 + $0x60] sm:$0xff]   ;;  %vm4756_vm5 = vcmask 125952  }
  0x4c   : > { %5652 = vmatmul.mubr.msk.bf16.gmra.mxu1 %vm727_vm2, %v6277_v57  ;;  %v1293_v57 = vshll.u32 %v6288_v53, 16  ;;  %v1797_v53 = vshll.u32 %v6304_v49, 16  ;;  %v6301_v54 = vld [vmem:[%s6698_s21 + $0x40] sm:$0xff]  }
  0x4d   : > { %5655 = vmatprep.mubr.msk.bf16.mxu1 %vm6497_vm1, %v6496_v45  ;;  %v1351_v51 = vrot.slane %v1349_v48, 1 }
  0x4e   : > { %v1295_v62 = vrot.slane %v1293_v57, 1  ;;  %v1799_v57 = vrot.slane %v1797_v53, 1 }
  0x50   : > { %v1296_v4 = vsel %vm650_vm3, %v1291_v1, %v1295_v62  ;;  %v1299_v8 = vor.u32 %v1297_v5, %v1295_v62  ;;  %v6303_v62 = vld [vmem:[%s6698_s21 + $0x48] sm:$0xff]   ;;  %v1806_v1 = vshrl.u32 %v6305_v52, 16 }
  0x51   : > { %5614 = vmatmul.mubr.msk.bf16.gmra.mxu0 %vm727_vm2, %v678_v10  ;;  %v1309_v10 = vshll.u32 %v6292_v7, 16  ;;  %v5041_v7 = vld [vmem:[%s7906_s1 + $0xc] sm:$0x3] }
  0x52   : > { %5617 = vmatprep.mubr.msk.bf16.mxu0 %vm6497_vm1, %v6496_v45  ;;  %v1304_v11 = vsel %vm650_vm3, %v1299_v8, %v1303_v6  ;;  %v6306_v8 = vld [vmem:[%s6698_s21 + $0x58] sm:$0xff]  }
  0x53   : > { %v1311_v13 = vrot.slane %v1309_v10, 1 }
  0x54   : > { %5656 = vmatmul.mubr.msk.bf16.gmra.mxu1 %vm727_vm2, %v6278_v3  ;;  %v1600_v3 = vsel %vm755_vm0, %v4965_v61, 0  ;;  %v6307_v61 = vld [vmem:[%s6698_s21 + $0x68] sm:$0xff]  }
  0x55   : > { %5659 = vmatprep.mubr.msk.bf16.mxu1 %vm6497_vm1, %v6496_v45  ;;  %v1810_v2 = vshll.u32 %v6307_v61, 16 }
  0x57   : > { %v1812_v5 = vrot.slane %v1810_v2, 1 }
  0x59   : > { %5618 = vmatmul.mubr.msk.bf16.gmra.mxu0 %vm727_vm2, %v686_v16  ;;  %v1307_v16 = vor.u32 %v1305_v12, %v1303_v6  ;;  %v6309_v6 = vld [vmem:[%s6698_s21 + $0x70] sm:$0xff]  }
  0x5a   : > { %5621 = vmatprep.mubr.msk.bf16.mxu0 %vm6497_vm1, %v6496_v45  ;;  %v1818_v12 = vshll.u32 %v6309_v6, 16 }
  0x5b   : > { %v1312_v17 = vsel %vm650_vm3, %v1307_v16, %v1311_v13  ;;  %v6308_v16 = vld [vmem:[%s6698_s21 + $0x60] sm:$0xff]  }
  0x5c   : > { %5660 = vmatmul.mubr.msk.bf16.gmra.mxu1 %vm727_vm2, %v6279_v9  ;;  %v6289_v9 = vld [vmem:[%s6698_s21 + $0x10] sm:$0xff]   ;;  %v1820_v14 = vrot.slane %v1818_v12, 1 }
  0x5d   : > { %5663 = vmatprep.mubr.msk.bf16.mxu1 %vm6497_vm1, %v6496_v45 }
  0x61   : > { %5622 = vmatmul.mubr.msk.bf16.gmra.mxu0 %vm727_vm2, %v694_v22  ;;  %v1319_v22 = vrot.slane %v1317_v19, 1 }
  0x62   : > { %5625 = vmatprep.mubr.msk.bf16.mxu0 %vm6497_vm1, %v6496_v45 }
  0x63   : > { %v1323_v30 = vor.u32 %v1321_v26, %v1319_v22 }
  0x64   : > { %5664 = vmatmul.mubr.msk.bf16.gmra.mxu1 %vm727_vm2, %v6280_v15  ;;  %v6291_v15 = vld [vmem:[%s6698_s21 + $0x18] sm:$0xff]  }
  0x65   : > { %5667 = vmatprep.mubr.msk.bf16.mxu1 %vm6497_vm1, %v6496_v45 }
  0x69   : > { %5626 = vmatmul.mubr.msk.bf16.gmra.mxu0 %vm727_vm2, %v702_v29  ;;  %v6295_v29 = vld [vmem:[%s6698_s21 + $0x28] sm:$0xff]  }
  0x6a   : > { %5629 = vmatprep.mubr.msk.bf16.mxu0 %vm6497_vm1, %v6496_v45 }
  0x6c   : > { %5668 = vmatmul.mubr.msk.bf16.gmra.mxu1 %vm727_vm2, %v6281_v21  ;;  %v1315_v21 = vor.u32 %v1313_v18, %v1311_v13  ;;  %v1822_v18 = vshrl.u32 %v6309_v6, 16 }
  0x6d   : > { %5671 = vmatprep.mubr.msk.bf16.mxu1 %vm6497_vm1, %v6496_v45 }
  0x6e   : > { %v1320_v25 = vsel %vm650_vm3, %v1315_v21, %v1319_v22  ;;  %v1824_v20 = vor.u32 %v1822_v18, %v1820_v14  ;;  %v6313_v22 = vld [vmem:[%s6698_s21 + $0x80] sm:$0xff]  }
  0x6f   : > { %v1834_v26 = vshll.u32 %v6313_v22, 16 }
  0x71   : > { %5630 = vmatmul.mubr.msk.bf16.gmra.mxu0 %vm727_vm2, %v710_v38  ;;  %v1341_v38 = vshll.u32 %v6300_v35, 16 }
  0x72   : > { %5633 = vmatprep.mubr.msk.bf16.mxu0 %vm6497_vm1, %v6496_v45 }
  0x73   : > { %v1343_v42 = vrot.slane %v1341_v38, 1 }
  0x74   : > { %5672 = vmatmul.mubr.msk.bf16.gmra.mxu1 %vm727_vm2, %v6282_v27  ;;  %v1327_v27 = vrot.slane %v1325_v24, 1 }
  0x75   : > { %5675 = vmatprep.mubr.msk.bf16.mxu1 %vm6497_vm1, %v6496_v45  ;;  %v1347_v50 = vor.u32 %v1345_v46, %v1343_v42 }
  0x76   : > { %v1328_v32 = vsel %vm650_vm3, %v1323_v30, %v1327_v27  ;;  %v1331_v37 = vor.u32 %v1329_v33, %v1327_v27  ;;  %v6312_v30 = vld [vmem:[%s6698_s21 + $0x70] sm:$0xff]  }
  0x77   : > { %v1352_v55 = vsel %vm650_vm3, %v1347_v50, %v1351_v51 }
  0x79   : > { %5634 = vmatmul.mubr.msk.bf16.gmra.mxu0 %vm727_vm2, %v718_v47 }
  0x7a   : > { %5637 = vmatprep.mubr.msk.bf16.mxu0 %vm6497_vm1, %v6496_v45 }
  0x7c   : > { %5676 = vmatmul.mubr.msk.bf16.gmra.mxu1 %vm727_vm2, %v6283_v31  ;;  %v1333_v31 = vshll.u32 %v6298_v28, 16  ;;  %v1836_v28 = vrot.slane %v1834_v26, 1  ;;  %v5155_v26 = vld [vmem:[%s7906_s1 + $0x12] sm:$0x3] }
  0x7d   : > { %5719 = vmatprep.mubr.msk.bf16.mxu1 %vm6497_vm1, %v6496_v45 }
  0x7e   : > { %v1335_v34 = vrot.slane %v1333_v31, 1 }
  0x80   : > { %v1336_v39 = vsel %vm650_vm3, %v1331_v37, %v1335_v34  ;;  %v1339_v44 = vor.u32 %v1337_v40, %v1335_v34  ;;  %v6314_v37 = vld [vmem:[%s6698_s21 + $0x78] sm:$0xff]  }
  0x81   : > { %5638 = vmatmul.mubr.msk.bf16.gmra.mxu0 %vm727_vm2, %v726_v56  ;;  %v1795_v56 = vshrl.u32 %v6304_v49, 16 }
  0x82   : > { %5681 = vmatprep.mubr.msk.bf16.mxu0 %vm6497_vm1, %v6496_v45  ;;  %v1344_v47 = vsel %vm650_vm3, %v1339_v44, %v1343_v42  ;;  %v6316_v44 = vld [vmem:[%s6698_s21 + $0x80] sm:$0xff]  }
  0x83   : > { %v1800_v59 = vor.u32 %v1799_v57, %v1795_v56 }
  0x84   : > { %5720 = vmatmul.mubr.msk.bf16.vlgmr.msra.gmra.mxu1 %vm727_vm2, %v1288_v58  ;;  %v1802_v58 = vshll.u32 %v6305_v52, 16  ;;  %v6321_v52 = vld [vmem:[%s6698_s21 + $0xa0] ss:$0 sps:$4 sm:$0x11]  }
  0x85   : > { %5794 = vmatpush3.bf16.msra.mxu1 %v1898_v60  ;;  %5723 = vmatprep.mubr.msk.bf16.mxu1 %vm6497_vm1, %v6496_v45 }
  0x86   : > { %5869 = vmatprep.subr.bf16.mxu1 %v6496_v45  ;;  %v1804_v60 = vrot.slane %v1802_v58, 1  ;;  %v1866_v58 = vshll.u32 %v6321_v52, 16 }
  0x88   : > { %v1868_v2 = vrot.slane %v1866_v58, 1 }
  0x89   : > { %5682 = vmatmul.mubr.msk.bf16.vlgmr.msra.gmra.mxu0 %vm727_vm2, %v6287_v0  ;;  %v1805_v0 = vsel %vm650_vm3, %v1800_v59, %v1804_v60  ;;  %v6323_v59 = vld [vmem:[%s6698_s21 + $0x60] sm:$0xff]  }
  0x8a   : > { %5756 = vmatpush3.bf16.msra.mxu0 %v1600_v3  ;;  %5685 = vmatprep.mubr.msk.bf16.mxu0 %vm6497_vm1, %v6496_v45  ;;  %v2414_v3 = vsel %vm755_vm0, %v5079_v63, 0  ;;  %v2311_v12 = vshrl.u32 %v6323_v59, 16 }
  0x8b   : > { %5831 = vmatprep.subr.bf16.mxu0 %v6496_v45 }
  0x8c   : > { %5724 = vmatmul.mubr.msk.bf16.gmra.mxu1 %vm727_vm2, %v1296_v4  ;;  %v1808_v4 = vor.u32 %v1806_v1, %v1804_v60 }
  0x8d   : > { %5727 = vmatprep.mubr.msk.bf16.mxu1 %vm6497_vm1, %v6496_v45 }
  0x8e   : > { %v1813_v10 = vsel %vm650_vm3, %v1808_v4, %v1812_v5  ;;  %v2313_v4 = vshll.u32 %v6323_v59, 16 }
  0x91   : > { %5686 = vmatmul.mubr.msk.bf16.gmra.mxu0 %vm727_vm2, %v6289_v9  ;;  %v2116_v9 = vsel %vm755_vm0, %v5041_v7, 0  ;;  %v6320_v7 = vld [vmem:[%s6698_s21 + $0x90] sm:$0xff]  }
  0x92   : > { %5689 = vmatprep.mubr.msk.bf16.mxu0 %vm6497_vm1, %v6496_v45 }
  0x94   : > { %5728 = vmatmul.mubr.msk.bf16.gmra.mxu1 %vm727_vm2, %v1304_v11  ;;  %v1814_v11 = vshrl.u32 %v6307_v61, 16 }
  0x95   : > { %5731 = vmatprep.mubr.msk.bf16.mxu1 %vm6497_vm1, %v6496_v45 }
  0x96   : > { %v1816_v13 = vor.u32 %v1814_v11, %v1812_v5 }
  0x99   : > { %5690 = vmatmul.mubr.msk.bf16.gmra.mxu0 %vm727_vm2, %v6291_v15  ;;  %v6311_v15 = vld [vmem:[%s6698_s21 + $0x78] sm:$0xff]  }
  0x9a   : > { %5693 = vmatprep.mubr.msk.bf16.mxu0 %vm6497_vm1, %v6496_v45  ;;  %v1826_v19 = vshll.u32 %v6311_v15, 16 }
  0x9c   : > { %5732 = vmatmul.mubr.msk.bf16.gmra.mxu1 %vm727_vm2, %v1312_v17  ;;  %v1821_v17 = vsel %vm650_vm3, %v1816_v13, %v1820_v14  ;;  %v1828_v21 = vrot.slane %v1826_v19, 1  ;;  %v2315_v13 = vrot.slane %v2313_v4, 1 }
  0x9d   : > { %5735 = vmatprep.mubr.msk.bf16.mxu1 %vm6497_vm1, %v6496_v45 }
  0x9e   : > { %v1829_v24 = vsel %vm650_vm3, %v1824_v20, %v1828_v21  ;;  %v2316_v20 = vor.u32 %v2315_v13, %v2311_v12 }
  0xa1   : > { %5694 = vmatmul.mubr.msk.bf16.gmra.mxu0 %vm727_vm2, %v6293_v23  ;;  %v6310_v23 = vld [vmem:[%s6698_s21 + $0x68] sm:$0xff]  }
  0xa2   : > { %5697 = vmatprep.mubr.msk.bf16.mxu0 %vm6497_vm1, %v6496_v45 }
  0xa4   : > { %5736 = vmatmul.mubr.msk.bf16.gmra.mxu1 %vm727_vm2, %v1320_v25  ;;  %v1830_v25 = vshrl.u32 %v6311_v15, 16 }
  0xa5   : > { %5739 = vmatprep.mubr.msk.bf16.mxu1 %vm6497_vm1, %v6496_v45 }
  0xa6   : > { %v1832_v27 = vor.u32 %v1830_v25, %v1828_v21  ;;  %v6322_v25 = vld [vmem:[%s6698_s21 + $0x98] sm:$0xff]  }
  0xa8   : > { %v1837_v31 = vsel %vm650_vm3, %v1832_v27, %v1836_v28 }
  0xa9   : > { %5698 = vmatmul.mubr.msk.bf16.gmra.mxu0 %vm727_vm2, %v6295_v29  ;;  %v6315_v29 = vld [vmem:[%s6698_s21 + $0x88] sm:$0xff]  }
  0xaa   : > { %5701 = vmatprep.mubr.msk.bf16.mxu0 %vm6497_vm1, %v6496_v45  ;;  %v1842_v33 = vshll.u32 %v6315_v29, 16 }
  0xac   : > { %5740 = vmatmul.mubr.msk.bf16.gmra.mxu1 %vm727_vm2, %v1328_v32  ;;  %v1838_v32 = vshrl.u32 %v6313_v22, 16  ;;  %v1844_v35 = vrot.slane %v1842_v33, 1  ;;  %v6326_v22 = vld [vmem:[%s6698_s21 + $0x70] sm:$0xff]  }
  0xad   : > { %5743 = vmatprep.mubr.msk.bf16.mxu1 %vm6497_vm1, %v6496_v45  ;;  %v2330_v52 = vshrl.u32 %v6326_v22, 16 }
  0xae   : > { %v1840_v34 = vor.u32 %v1838_v32, %v1836_v28  ;;  %v2326_v32 = vshll.u32 %v6326_v22, 16 }
  0xb0   : > { %v1845_v38 = vsel %vm650_vm3, %v1840_v34, %v1844_v35  ;;  %v2931_v34 = vsel %vm755_vm0, %v5155_v26, 0 }
  0xb1   : > { %5702 = vmatmul.mubr.msk.bf16.gmra.mxu0 %vm727_vm2, %v6297_v36  ;;  %v6317_v36 = vld [vmem:[%s6698_s21 + $0x90] sm:$0xff]  }
  0xb2   : > { %5705 = vmatprep.mubr.msk.bf16.mxu0 %vm6497_vm1, %v6496_v45  ;;  %v1850_v40 = vshll.u32 %v6317_v36, 16 }
  0xb4   : > { %5744 = vmatmul.mubr.msk.bf16.gmra.mxu1 %vm727_vm2, %v1336_v39  ;;  %v1846_v39 = vshrl.u32 %v6315_v29, 16  ;;  %v1852_v42 = vrot.slane %v1850_v40, 1  ;;  %v2328_v40 = vrot.slane %v2326_v32, 1 }
  0xb5   : > { %5747 = vmatprep.mubr.msk.bf16.mxu1 %vm6497_vm1, %v6496_v45 }
  0xb6   : > { %v1848_v41 = vor.u32 %v1846_v39, %v1844_v35  ;;  %v2332_v59 = vor.u32 %v2330_v52, %v2328_v40 }
  0xb8   : > { %v1853_v46 = vsel %vm650_vm3, %v1848_v41, %v1852_v42  ;;  %v6328_v41 = vld [vmem:[%s6698_s21 + $0x78] sm:$0xff]  }
  0xb9   : > { %5706 = vmatmul.mubr.msk.bf16.gmra.mxu0 %vm727_vm2, %v6299_v43  ;;  %v6319_v43 = vld [vmem:[%s6698_s21 + $0x98] sm:$0xff]  }
  0xba   : > { %5709 = vmatprep.mubr.msk.bf16.mxu0 %vm6497_vm1, %v6496_v45  ;;  %v1858_v48 = vshll.u32 %v6319_v43, 16  ;;  %v1862_v57 = vshrl.u32 %v6319_v43, 16  ;;  %v5117_v43 = vld [vmem:[%s7906_s1 + $0x10] sm:$0x3] }
  0xbc   : > { %5748 = vmatmul.mubr.msk.bf16.gmra.mxu1 %vm727_vm2, %v1344_v47  ;;  %v1854_v47 = vshrl.u32 %v6317_v36, 16  ;;  %v1860_v51 = vrot.slane %v1858_v48, 1 }
  0xbd   : > { %5751 = vmatprep.mubr.msk.bf16.mxu1 %vm6497_vm1, %v6496_v45 }
  0xbe   : > { %v1856_v50 = vor.u32 %v1854_v47, %v1852_v42  ;;  %v1864_v1 = vor.u32 %v1862_v57, %v1860_v51 }
  0xc0   : > { %v1861_v56 = vsel %vm650_vm3, %v1856_v50, %v1860_v51  ;;  %v1869_v11 = vsel %vm650_vm3, %v1864_v1, %v1868_v2  ;;  %v2633_v50 = vsel %vm755_vm0, %v5117_v43, 0  ;;  %v6327_v1 = vld [vmem:[%s6698_s21 + $0x68] sm:$0xff]  }
  0xc1   : > { %5710 = vmatmul.mubr.msk.bf16.gmra.mxu0 %vm727_vm2, %v6301_v54  ;;  %v6318_v54 = vld [vmem:[%s6698_s21 + $0x88] sm:$0xff]  }
  0xc2   : > { %5713 = vmatprep.mubr.msk.bf16.mxu0 %vm6497_vm1, %v6496_v45 }
  0xc4   : > { %5752 = vmatmul.mubr.msk.bf16.gmra.mxu1 %vm727_vm2, %v1352_v55 }
  0xc5   : > { %5795 = vmatprep.mubr.msk.bf16.mxu1 %vm6497_vm1, %v6496_v45 }
  0xc9   : > { %5714 = vmatmul.mubr.msk.bf16.gmra.mxu0 %vm727_vm2, %v6303_v62 }
  0xca   : > { %5757 = vmatprep.mubr.msk.bf16.mxu0 %vm6497_vm1, %v6496_v45 }
  0xcc   : > { %5796 = vmatmul.mubr.msk.bf16.vlgmr.msra.gmra.mxu1 %vm727_vm2, %v1805_v0 }
  0xcd   : > { %5870 = vmatpush3.bf16.msra.mxu1 %v2414_v3  ;;  %5799 = vmatprep.mubr.msk.bf16.mxu1 %vm6497_vm1, %v6496_v45  ;;  %v6324_v3 = vld [vmem:[%s6698_s21 + $0x68] sm:$0xff]  }
  0xce   : > { %5945 = vmatprep.subr.bf16.mxu1 %v6496_v45  ;;  %v2318_v14 = vshll.u32 %v6324_v3, 16 }
  0xd0   : > { %v2320_v21 = vrot.slane %v2318_v14, 1 }
  0xd1   : > { %5758 = vmatmul.mubr.msk.bf16.vlgmr.msra.gmra.mxu0 %vm727_vm2, %v6306_v8 }
  0xd2   : > { %5832 = vmatpush3.bf16.msra.mxu0 %v2116_v9  ;;  %5761 = vmatprep.mubr.msk.bf16.mxu0 %vm6497_vm1, %v6496_v45 }
  0xd3   : > { %5907 = vmatprep.subr.bf16.mxu0 %v6496_v45 }
  0xd4   : > { %5800 = vmatmul.mubr.msk.bf16.gmra.mxu1 %vm727_vm2, %v1813_v10 }
  0xd5   : > { %5803 = vmatprep.mubr.msk.bf16.mxu1 %vm6497_vm1, %v6496_v45 }
  0xd9   : > { %5762 = vmatmul.mubr.msk.bf16.gmra.mxu0 %vm727_vm2, %v6308_v16 }
  0xda   : > { %5765 = vmatprep.mubr.msk.bf16.mxu0 %vm6497_vm1, %v6496_v45 }
  0xdc   : > { %5804 = vmatmul.mubr.msk.bf16.gmra.mxu1 %vm727_vm2, %v1821_v17 }
  0xdd   : > { %5807 = vmatprep.mubr.msk.bf16.mxu1 %vm6497_vm1, %v6496_v45 }
  0xe1   : > { %5766 = vmatmul.mubr.msk.bf16.gmra.mxu0 %vm727_vm2, %v6310_v23 }
  0xe2   : > { %5769 = vmatprep.mubr.msk.bf16.mxu0 %vm6497_vm1, %v6496_v45 }
  0xe4   : > { %5808 = vmatmul.mubr.msk.bf16.gmra.mxu1 %vm727_vm2, %v1829_v24 }
  0xe5   : > { %5811 = vmatprep.mubr.msk.bf16.mxu1 %vm6497_vm1, %v6496_v45 }
  0xe9   : > { %5770 = vmatmul.mubr.msk.bf16.gmra.mxu0 %vm727_vm2, %v6312_v30  ;;  %v2321_v30 = vsel %vm650_vm3, %v2316_v20, %v2320_v21  ;;  %v6329_v20 = vld [vmem:[%s6698_s21 + $0x70] sm:$0xff]  }
  0xea   : > { %5773 = vmatprep.mubr.msk.bf16.mxu0 %vm6497_vm1, %v6496_v45 }
  0xec   : > { %5812 = vmatmul.mubr.msk.bf16.gmra.mxu1 %vm727_vm2, %v1837_v31  ;;  %v2322_v31 = vshrl.u32 %v6324_v3, 16 }
  0xed   : > { %5815 = vmatprep.mubr.msk.bf16.mxu1 %vm6497_vm1, %v6496_v45 }
  0xee   : > { %v2324_v39 = vor.u32 %v2322_v31, %v2320_v21 }
  0xf0   : > { %v2329_v51 = vsel %vm650_vm3, %v2324_v39, %v2328_v40  ;;  %v6331_v39 = vld [vmem:[%s6698_s21 + $0x78] sm:$0xff]  }
  0xf1   : > { %5774 = vmatmul.mubr.msk.bf16.gmra.mxu0 %vm727_vm2, %v6314_v37 }
  0xf2   : > { %5777 = vmatprep.mubr.msk.bf16.mxu0 %vm6497_vm1, %v6496_v45 }
  0xf4   : > { %5816 = vmatmul.mubr.msk.bf16.gmra.mxu1 %vm727_vm2, %v1845_v38 }
  0xf5   : > { %5819 = vmatprep.mubr.msk.bf16.mxu1 %vm6497_vm1, %v6496_v45 }
  0xf9   : > { %5778 = vmatmul.mubr.msk.bf16.gmra.mxu0 %vm727_vm2, %v6316_v44 }
  0xfa   : > { %5781 = vmatprep.mubr.msk.bf16.mxu0 %vm6497_vm1, %v6496_v45 }
  0xfc   : > { %v919_v49 = vpop.f32.mrf.mxu1  ;;  %5820 = vmatmul.mubr.msk.bf16.gmra.mxu1 %vm727_vm2, %v1853_v46  ;;  %v6325_v46 = vld [vmem:[%s6698_s21 + $0x60] sm:$0xff]  }
  0xfd   : > { %5823 = vmatprep.mubr.msk.bf16.mxu1 %vm6497_vm1, %v6496_v45 }
  0xfe   : > { %v5645_v53 = vpop.f32.mrf.mxu1 }
  0xff   : > { %v2334_v53 = vshll.u32 %v6328_v41, 16 }
 0x100   : > { %v922_v55 = vpop.f32.mrf.mxu1 }
 0x101   : > { %v793_v61 = vpop.f32.mrf.mxu0  ;;  %5782 = vmatmul.mubr.msk.bf16.gmra.mxu0 %vm727_vm2, %v6318_v54 }
 0x102   : > { %v5646_v60 = vpop.f32.mrf.mxu1  ;;  %v6950_v62 = vadd.f32 %v919_v49, %v793_v61  ;;  %5785 = vmatprep.mubr.msk.bf16.mxu0 %vm6497_vm1, %v6496_v45  ;;  %v6330_v61 = vld [vmem:[%s6698_s21 + $0x80] sm:$0xff]  }
 0x103   : > { %v5607_v0 = vpop.f32.mrf.mxu0  ;;  %v2336_v60 = vrot.slane %v2334_v53, 1 }
 0x104   : > { %v927_v63 = vpop.f32.mrf.mxu1  ;;  %5824 = vmatmul.mubr.msk.bf16.gmra.mxu1 %vm727_vm2, %v1861_v56 }
 0x105   : > { %5827 = vmatprep.mubr.msk.bf16.mxu1 %vm6497_vm1, %v6496_v45  ;;  %v796_v6 = vpop.f32.mrf.mxu0 }
 0x106   : > { %v5649_v5 = vpop.f32.mrf.mxu1  ;;  %v6959_v8 = vadd.f32 %v922_v55, %v796_v6  ;;  %v2338_v6 = vshrl.u32 %v6328_v41, 16 }
 0x107   : > { %v5608_v10 = vpop.f32.mrf.mxu0  ;;  %v2337_v5 = vsel %vm650_vm3, %v2332_v59, %v2336_v60  ;;  %v6333_v59 = vld [vmem:[%s6698_s21 + $0x80] sm:$0xff]  }
 0x108   : > { %v930_v9 = vpop.f32.mrf.mxu1  ;;  %v2340_v14 = vor.u32 %v2338_v6, %v2336_v60 }
 0x109   : > { %v801_v16 = vpop.f32.mrf.mxu0  ;;  %5786 = vmatmul.mubr.msk.bf16.gmra.mxu0 %vm727_vm2, %v6320_v7  ;;  %v2342_v7 = vshll.u32 %v6330_v61, 16 }
 0x10a   : > { %v5650_v15 = vpop.f32.mrf.mxu1  ;;  %v6963_v17 = vadd.f32 %v927_v63, %v801_v16  ;;  %5789 = vmatprep.mubr.msk.bf16.mxu0 %vm6497_vm1, %v6496_v45  ;;  %v6332_v16 = vld [vmem:[%s6698_s21 + $0x88] sm:$0xff]  }
 0x10b   : > { %v5611_v19 = vpop.f32.mrf.mxu0  ;;  %v2344_v15 = vrot.slane %v2342_v7, 1  ;;  %v2350_v26 = vshll.u32 %v6332_v16, 16 }
 0x10c   : > { %v935_v18 = vpop.f32.mrf.mxu1  ;;  %5828 = vmatmul.mubr.msk.bf16.gmra.mxu1 %vm727_vm2, %v1869_v11 }
 0x10d   : > { %5871 = vmatprep.mubr.msk.bf16.mxu1 %vm6497_vm1, %v6496_v45  ;;  %v804_v24 = vpop.f32.mrf.mxu0 }
 0x10e   : > { %v5653_v23 = vpop.f32.mrf.mxu1  ;;  %v6975_v27 = vadd.f32 %v930_v9, %v804_v24  ;;  %v2345_v24 = vsel %vm650_vm3, %v2340_v14, %v2344_v15 }
 0x10f   : > { %v5612_v29 = vpop.f32.mrf.mxu0 }
 0x110   : > { %v938_v28 = vpop.f32.mrf.mxu1 }
 0x111   : > { %v809_v35 = vpop.f32.mrf.mxu0  ;;  %5790 = vmatmul.mubr.msk.bf16.gmra.mxu0 %vm727_vm2, %v6322_v25  ;;  %v2346_v25 = vshrl.u32 %v6330_v61, 16 }
 0x112   : > { %v5654_v33 = vpop.f32.mrf.mxu1  ;;  %v6980_v36 = vadd.f32 %v935_v18, %v809_v35  ;;  %5833 = vmatprep.mubr.msk.bf16.mxu0 %vm6497_vm1, %v6496_v45  ;;  %v6334_v35 = vld [vmem:[%s6698_s21 + $0x90] sm:$0xff]  }
 0x113   : > { %v5615_v38 = vpop.f32.mrf.mxu0  ;;  %v2348_v33 = vor.u32 %v2346_v25, %v2344_v15 }
 0x114   : > { %v943_v37 = vpop.f32.mrf.mxu1  ;;  %5872 = vmatmul.mubr.msk.bf16.vlgmr.msra.gmra.mxu1 %vm727_vm2, %v2321_v30 }
 0x115   : > { %5946 = vmatpush3.bf16.msra.mxu1 %v2931_v34  ;;  %5875 = vmatprep.mubr.msk.bf16.mxu1 %vm6497_vm1, %v6496_v45  ;;  %v812_v44 = vpop.f32.mrf.mxu0  ;;  %v2352_v34 = vrot.slane %v2350_v26, 1 }
 0x116   : > { %v5657_v42 = vpop.f32.mrf.mxu1  ;;  %6021 = vmatprep.subr.bf16.mxu1 %v6496_v45  ;;  %v6993_v47 = vadd.f32 %v938_v28, %v812_v44  ;;  %v2354_v44 = vshrl.u32 %v6332_v16, 16  ;;  %v6335_v16 = vld [vmem:[%s6698_s21 + $0x88] sm:$0xff]  }
 0x117   : > { %v5616_v49 = vpop.f32.mrf.mxu0  ;;  %v2353_v43 = vsel %vm650_vm3, %v2348_v33, %v2352_v34 }
 0x118   : > { %v946_v48 = vpop.f32.mrf.mxu1  ;;  %v2356_v53 = vor.u32 %v2354_v44, %v2352_v34  ;;  %v6340_v34 = vld [vmem:[%s6698_s21 + $0xa8] ss:$0 sps:$4 sm:$0x11]  }
 0x119   : > { %v817_v55 = vpop.f32.mrf.mxu0  ;;  %5834 = vmatmul.mubr.msk.bf16.vlgmr.msra.gmra.mxu0 %vm727_vm2, %v6325_v46  ;;  %v2358_v46 = vshll.u32 %v6334_v35, 16 }
 0x11a   : > { %v5658_v54 = vpop.f32.mrf.mxu1  ;;  %v6998_v56 = vadd.f32 %v943_v37, %v817_v55  ;;  %5908 = vmatpush3.bf16.msra.mxu0 %v2633_v50  ;;  %5837 = vmatprep.mubr.msk.bf16.mxu0 %vm6497_vm1, %v6496_v45  ;;  %v6336_v55 = vld [vmem:[%s6698_s21 + $0x98] sm:$0xff]  }
 0x11b   : > { %v5619_v58 = vpop.f32.mrf.mxu0  ;;  %5983 = vmatprep.subr.bf16.mxu0 %v6496_v45  ;;  %v2360_v54 = vrot.slane %v2358_v46, 1  ;;  %v2382_v46 = vshll.u32 %v6340_v34, 16 }
 0x11c   : > { %v951_v57 = vpop.f32.mrf.mxu1  ;;  %5876 = vmatmul.mubr.msk.bf16.gmra.mxu1 %vm727_vm2, %v2329_v51 }
 0x11d   : > { %5879 = vmatprep.mubr.msk.bf16.mxu1 %vm6497_vm1, %v6496_v45  ;;  %v820_v0 = vpop.f32.mrf.mxu0 }
 0x11e   : > { %v5661_v63 = vpop.f32.mrf.mxu1  ;;  %v7008_v2 = vadd.f32 %v946_v48, %v820_v0  ;;  %v2361_v0 = vsel %vm650_vm3, %v2356_v53, %v2360_v54 }
 0x11f   : > { %v5620_v4 = vpop.f32.mrf.mxu0 }
 0x120   : > { %v954_v3 = vpop.f32.mrf.mxu1 }
 0x121   : > { %v825_v10 = vpop.f32.mrf.mxu0  ;;  %5838 = vmatmul.mubr.msk.bf16.gmra.mxu0 %vm727_vm2, %v6327_v1  ;;  %v2362_v1 = vshrl.u32 %v6334_v35, 16 }
 0x122   : > { %v5662_v9 = vpop.f32.mrf.mxu1  ;;  %v7012_v11 = vadd.f32 %v951_v57, %v825_v10  ;;  %5841 = vmatprep.mubr.msk.bf16.mxu0 %vm6497_vm1, %v6496_v45 }
 0x123   : > { %v5623_v13 = vpop.f32.mrf.mxu0  ;;  %v2364_v10 = vor.u32 %v2362_v1, %v2360_v54  ;;  %v6339_v1 = vld [vmem:[%s6698_s21 + $0x98] sm:$0xff]  }
 0x124   : > { %v959_v12 = vpop.f32.mrf.mxu1  ;;  %5880 = vmatmul.mubr.msk.bf16.gmra.mxu1 %vm727_vm2, %v2337_v5  ;;  %v6338_v13 = vld [vmem:[%s6698_s21 + $0xa0] sm:$0xff]  }
 0x125   : > { %5883 = vmatprep.mubr.msk.bf16.mxu1 %vm6497_vm1, %v6496_v45  ;;  %v828_v19 = vpop.f32.mrf.mxu0  ;;  %v2378_v44 = vshrl.u32 %v6338_v13, 16 }
 0x126   : > { %v5665_v18 = vpop.f32.mrf.mxu1  ;;  %v7021_v21 = vadd.f32 %v954_v3, %v828_v19  ;;  %v2366_v3 = vshll.u32 %v6336_v55, 16 }
 0x127   : > { %v5624_v23 = vpop.f32.mrf.mxu0 }
 0x128   : > { %v962_v22 = vpop.f32.mrf.mxu1  ;;  %v2370_v23 = vshrl.u32 %v6336_v55, 16 }
 0x129   : > { %v833_v29 = vpop.f32.mrf.mxu0  ;;  %5842 = vmatmul.mubr.msk.bf16.gmra.mxu0 %vm727_vm2, %v6329_v20 }
 0x12a   : > { %v5666_v28 = vpop.f32.mrf.mxu1  ;;  %v7025_v30 = vadd.f32 %v959_v12, %v833_v29  ;;  %5845 = vmatprep.mubr.msk.bf16.mxu0 %vm6497_vm1, %v6496_v45  ;;  %v2368_v12 = vrot.slane %v2366_v3, 1 }
 0x12b   : > { %v5627_v32 = vpop.f32.mrf.mxu0 }
 0x12c   : > { %v967_v31 = vpop.f32.mrf.mxu1  ;;  %5884 = vmatmul.mubr.msk.bf16.gmra.mxu1 %vm727_vm2, %v2345_v24  ;;  %v2374_v24 = vshll.u32 %v6338_v13, 16  ;;  %v2372_v32 = vor.u32 %v2370_v23, %v2368_v12 }
 0x12d   : > { %5887 = vmatprep.mubr.msk.bf16.mxu1 %vm6497_vm1, %v6496_v45  ;;  %v836_v38 = vpop.f32.mrf.mxu0 }
 0x12e   : > { %v5669_v37 = vpop.f32.mrf.mxu1  ;;  %v7034_v40 = vadd.f32 %v962_v22, %v836_v38  ;;  %v2369_v22 = vsel %vm650_vm3, %v2364_v10, %v2368_v12  ;;  %v2376_v33 = vrot.slane %v2374_v24, 1  ;;  %v6337_v38 = vld [vmem:[%s6698_s21 + $0x90] sm:$0xff]  }
 0x12f   : > { %v5628_v42 = vpop.f32.mrf.mxu0 }
 0x130   : > { %v970_v41 = vpop.f32.mrf.mxu1  ;;  %v2380_v55 = vor.u32 %v2378_v44, %v2376_v33 }
 0x131   : > { %v841_v49 = vpop.f32.mrf.mxu0  ;;  %5846 = vmatmul.mubr.msk.bf16.gmra.mxu0 %vm727_vm2, %v6331_v39 }
 0x132   : > { %v5670_v48 = vpop.f32.mrf.mxu1  ;;  %v7038_v50 = vadd.f32 %v967_v31, %v841_v49  ;;  %5849 = vmatprep.mubr.msk.bf16.mxu0 %vm6497_vm1, %v6496_v45 }
 0x133   : > { %v5631_v52 = vpop.f32.mrf.mxu0  ;;  %v6342_v48 = vld [vmem:[%s6698_s21 + $0xb0] sm:$0xff]  }
 0x134   : > { %v975_v51 = vpop.f32.mrf.mxu1  ;;  %5888 = vmatmul.mubr.msk.bf16.gmra.mxu1 %vm727_vm2, %v2353_v43  ;;  %v2377_v43 = vsel %vm650_vm3, %v2372_v32, %v2376_v33 }
 0x135   : > { %5891 = vmatprep.mubr.msk.bf16.mxu1 %vm6497_vm1, %v6496_v45  ;;  %v844_v58 = vpop.f32.mrf.mxu0 }
 0x136   : > { %v5673_v57 = vpop.f32.mrf.mxu1  ;;  %v7047_v60 = vadd.f32 %v970_v41, %v844_v58  ;;  %v6343_v58 = vld [vmem:[%s6698_s21 + $0xb8] sm:$0xff]  }
 0x137   : > { %v5632_v63 = vpop.f32.mrf.mxu0  ;;  %v2384_v57 = vrot.slane %v2382_v46, 1  ;;  %v2835_v10 = vshll.u32 %v6343_v58, 16  ;;  %v2839_v34 = vshrl.u32 %v6343_v58, 16 }
 0x138   : > { %v978_v61 = vpop.f32.mrf.mxu1 }
 0x139   : > { %v849_v5 = vpop.f32.mrf.mxu0  ;;  %5850 = vmatmul.mubr.msk.bf16.gmra.mxu0 %vm727_vm2, %v6333_v59  ;;  %v2830_v59 = vshll.u32 %v6342_v48, 16 }
 0x13a   : > { %v5674_v4 = vpop.f32.mrf.mxu1  ;;  %v7051_v6 = vadd.f32 %v975_v51, %v849_v5  ;;  %5853 = vmatprep.mubr.msk.bf16.mxu0 %vm6497_vm1, %v6496_v45  ;;  %v2385_v5 = vsel %vm650_vm3, %v2380_v55, %v2384_v57 }
 0x13b   : > { %v5635_v9 = vpop.f32.mrf.mxu0 }
 0x13c   : > { %v983_v7 = vpop.f32.mrf.mxu1  ;;  %5892 = vmatmul.mubr.msk.bf16.gmra.mxu1 %vm727_vm2, %v2361_v0  ;;  %v2832_v9 = vrot.slane %v2830_v59, 1 }
 0x13d   : > { %5895 = vmatprep.mubr.msk.bf16.mxu1 %vm6497_vm1, %v6496_v45  ;;  %v852_v15 = vpop.f32.mrf.mxu0 }
 0x13e   : > { %v5677_v14 = vpop.f32.mrf.mxu1  ;;  %v7060_v18 = vadd.f32 %v978_v61, %v852_v15 }
 0x13f   : > { %v5636_v20 = vpop.f32.mrf.mxu0 }
 0x140   : > { %v986_v19 = vpop.f32.mrf.mxu1  ;;  %v2837_v20 = vrot.slane %v2835_v10, 1 }
 0x141   : > { %v857_v26 = vpop.f32.mrf.mxu0  ;;  %5854 = vmatmul.mubr.msk.bf16.gmra.mxu0 %vm727_vm2, %v6335_v16 }
 0x142   : > { %v5678_v25 = vpop.f32.mrf.mxu1  ;;  %v7064_v28 = vadd.f32 %v983_v7, %v857_v26  ;;  %5857 = vmatprep.mubr.msk.bf16.mxu0 %vm6497_vm1, %v6496_v45  ;;  %v2828_v7 = vshrl.u32 %v6342_v48, 16  ;;  %v6341_v26 = vld [vmem:[%s6698_s21 + $0xa0] sm:$0xff]   ;;  %v2841_v46 = vor.u32 %v2839_v34, %v2837_v20 }
 0x143   : > { %v5639_v31 = vpop.f32.mrf.mxu0 }
 0x144   : > { %v1417_v29 = vpop.f32.mrf.mxu1  ;;  %5896 = vmatmul.mubr.msk.bf16.gmra.mxu1 %vm727_vm2, %v2369_v22  ;;  %v6345_v22 = vld [vmem:[%s6698_s21 + $0xc0] sm:$0xff]  }
 0x145   : > { %5899 = vmatprep.mubr.msk.bf16.mxu1 %vm6497_vm1, %v6496_v45  ;;  %v860_v37 = vpop.f32.mrf.mxu0 }
 0x146   : > { %v5721_v35 = vpop.f32.mrf.mxu1  ;;  %v7073_v39 = vadd.f32 %v986_v19, %v860_v37  ;;  %v2833_v19 = vor.u32 %v2832_v9, %v2828_v7 }
 0x147   : > { %v5640_v42 = vpop.f32.mrf.mxu0  ;;  %v2843_v35 = vshll.u32 %v6345_v22, 16 }
 0x148   : > { %v1420_v41 = vpop.f32.mrf.mxu1  ;;  %v2838_v33 = vsel %vm650_vm3, %v2833_v19, %v2837_v20 }
 0x149   : > { %v1119_v51 = vpop.f32.mrf.mxu0  ;;  %5858 = vmatmul.mubr.msk.bf16.gmra.mxu0 %vm727_vm2, %v6337_v38  ;;  %v2845_v48 = vrot.slane %v2843_v35, 1  ;;  %v6351_v35 = vld [vmem:[%s6698_s21 + $0xd8] sm:$0xff]  }
 0x14a   : > { %v5722_v49 = vpop.f32.mrf.mxu1  ;;  %v1190_v52 = vadd.f32 %v1119_v51, %v6950_v62  ;;  %5861 = vmatprep.mubr.msk.bf16.mxu0 %vm6497_vm1, %v6496_v45 }
 0x14b   : > { %v5683_v54 = vpop.f32.mrf.mxu0  ;;  %v6347_v49 = vld [vmem:[%s6698_s21 + $0xc8] sm:$0xff]  }
 0x14c   : > { %v1425_v53 = vpop.f32.mrf.mxu1  ;;  %5900 = vmatmul.mubr.msk.bf16.gmra.mxu1 %vm727_vm2, %v2377_v43  ;;  %v7085_v63 = vadd.f32 %v1417_v29, %v1190_v52  ;;  %v5193_v52 = vld [vmem:[%s7906_s1 + $0x14] sm:$0x3] }
 0x14d   : > { %5903 = vmatprep.mubr.msk.bf16.mxu1 %vm6497_vm1, %v6496_v45  ;;  %v1122_v0 = vpop.f32.mrf.mxu0  ;;  %v6344_v54 = vld [vmem:[%s6698_s21 + $0xb0] sm:$0xff]   ;;  %v3149_v59 = vsel %vm755_vm0, %v5193_v52, 0 }
 0x14e   : > { %v5725_v61 = vpop.f32.mrf.mxu1  ;;  %v1191_v62 = vadd.f32 %v1122_v0, %v6959_v8  ;;  %v2847_v0 = vshrl.u32 %v6345_v22, 16 }
 0x14f   : > { %v5684_v4 = vpop.f32.mrf.mxu0  ;;  %v2846_v61 = vsel %vm650_vm3, %v2841_v46, %v2845_v48 }
 0x150   : > { %v1428_v3 = vpop.f32.mrf.mxu1  ;;  %v7090_v13 = vadd.f32 %v1420_v41, %v1191_v62  ;;  %v2849_v9 = vor.u32 %v2847_v0, %v2845_v48 }
 0x151   : > { %v1127_v14 = vpop.f32.mrf.mxu0  ;;  %5862 = vmatmul.mubr.msk.bf16.gmra.mxu0 %vm727_vm2, %v6339_v1  ;;  %v2851_v1 = vshll.u32 %v6347_v49, 16 }
 0x152   : > { %v5726_v12 = vpop.f32.mrf.mxu1  ;;  %v1192_v15 = vadd.f32 %v1127_v14, %v6963_v17  ;;  %5865 = vmatprep.mubr.msk.bf16.mxu0 %vm6497_vm1, %v6496_v45  ;;  %v5231_v17 = vld [vmem:[%s7906_s1 + $0x16] sm:$0x3] }
 0x153   : > { %v5687_v8 = vpop.f32.mrf.mxu0  ;;  %v3447_v38 = vsel %vm755_vm0, %v5231_v17, 0  ;;  %v2853_v10 = vrot.slane %v2851_v1, 1  ;;  %v6349_v12 = vld [vmem:[%s6698_s21 + $0xd0] sm:$0xff]  }
 0x154   : > { %v1433_v16 = vpop.f32.mrf.mxu1  ;;  %5904 = vmatmul.mubr.msk.bf16.gmra.mxu1 %vm727_vm2, %v2385_v5  ;;  %v7100_v24 = vadd.f32 %v1425_v53, %v1192_v15  ;;  %v2863_v48 = vshrl.u32 %v6349_v12, 16 }
 0x155   : > { %5947 = vmatprep.mubr.msk.bf16.mxu1 %vm6497_vm1, %v6496_v45  ;;  %v1130_v25 = vpop.f32.mrf.mxu0  ;;  %v2854_v22 = vsel %vm650_vm3, %v2849_v9, %v2853_v10 }
 0x156   : > { %v5729_v23 = vpop.f32.mrf.mxu1  ;;  %v1193_v29 = vadd.f32 %v1130_v25, %v6975_v27  ;;  %v2859_v25 = vshll.u32 %v6349_v12, 16 }
 0x157   : > { %v5688_v32 = vpop.f32.mrf.mxu0  ;;  %v2855_v23 = vshrl.u32 %v6347_v49, 16  ;;  %v2867_v49 = vshll.u32 %v6351_v35, 16 }
 0x158   : > { %v1436_v31 = vpop.f32.mrf.mxu1  ;;  %v7109_v41 = vadd.f32 %v1428_v3, %v1193_v29  ;;  %v2861_v34 = vrot.slane %v2859_v25, 1 }
 0x159   : > { %v1135_v42 = vpop.f32.mrf.mxu0  ;;  %5866 = vmatmul.mubr.msk.bf16.gmra.mxu0 %vm727_vm2, %v6341_v26 }
 0x15a   : > { %v5730_v37 = vpop.f32.mrf.mxu1  ;;  %v1194_v43 = vadd.f32 %v1135_v42, %v6980_v36  ;;  %5909 = vmatprep.mubr.msk.bf16.mxu0 %vm6497_vm1, %v6496_v45 }
 0x15b   : > { %v5691_v27 = vpop.f32.mrf.mxu0 }
 0x15c   : > { %v1441_v44 = vpop.f32.mrf.mxu1  ;;  %5948 = vmatmul.mubr.msk.bf16.vlgmr.msra.gmra.mxu1 %vm727_vm2, %v2838_v33  ;;  %v7122_v36 = vadd.f32 %v1433_v16, %v1194_v43  ;;  %v6346_v16 = vld [vmem:[%s6698_s21 + $0xb8] sm:$0xff]   ;;  %v2857_v33 = vor.u32 %v2855_v23, %v2853_v10  ;;  %v6348_v43 = vld [vmem:[%s6698_s21 + $0xc0] sm:$0xff]  }
 0x15d   : > { %6022 = vmatpush3.bf16.msra.mxu1 %v3447_v38  ;;  %5951 = vmatprep.mubr.msk.bf16.mxu1 %vm6497_vm1, %v6496_v45  ;;  %v1138_v53 = vpop.f32.mrf.mxu0 }
 0x15e   : > { %v5733_v51 = vpop.f32.mrf.mxu1  ;;  %6097 = vmatprep.subr.bf16.mxu1 %v6496_v45  ;;  %v1195_v55 = vadd.f32 %v1138_v53, %v6993_v47  ;;  %v2862_v46 = vsel %vm650_vm3, %v2857_v33, %v2861_v34 }
 0x15f   : > { %v5692_v58 = vpop.f32.mrf.mxu0 }
 0x160   : > { %v1444_v57 = vpop.f32.mrf.mxu1  ;;  %v7129_v3 = vadd.f32 %v1436_v31, %v1195_v55  ;;  %v2869_v58 = vrot.slane %v2867_v49, 1 }
 0x161   : > { %v1143_v4 = vpop.f32.mrf.mxu0  ;;  %5910 = vmatmul.mubr.msk.bf16.vlgmr.msra.gmra.mxu0 %vm727_vm2, %v6344_v54 }
 0x162   : > { %v5734_v62 = vpop.f32.mrf.mxu1  ;;  %v1196_v5 = vadd.f32 %v1143_v4, %v6998_v56  ;;  %5984 = vmatpush3.bf16.msra.mxu0 %v3149_v59  ;;  %5913 = vmatprep.mubr.msk.bf16.mxu0 %vm6497_vm1, %v6496_v45  ;;  %v6353_v59 = vld [vmem:[%s6698_s21 + $0xe0] sm:$0xff]  }
 0x163   : > { %v5695_v7 = vpop.f32.mrf.mxu0  ;;  %6059 = vmatprep.subr.bf16.mxu0 %v6496_v45  ;;  %v6350_v62 = vld [vmem:[%s6698_s21 + $0xc8] sm:$0xff]   ;;  %v2875_v9 = vshll.u32 %v6353_v59, 16 }
 0x164   : > { %v1449_v47 = vpop.f32.mrf.mxu1  ;;  %5952 = vmatmul.mubr.msk.bf16.gmra.mxu1 %vm727_vm2, %v2846_v61  ;;  %v7140_v15 = vadd.f32 %v1441_v44, %v1196_v5  ;;  %v2871_v7 = vshrl.u32 %v6351_v35, 16 }
 0x165   : > { %5955 = vmatprep.mubr.msk.bf16.mxu1 %vm6497_vm1, %v6496_v45  ;;  %v1146_v56 = vpop.f32.mrf.mxu0 }
 0x166   : > { %v5737_v14 = vpop.f32.mrf.mxu1  ;;  %v1197_v8 = vadd.f32 %v1146_v56, %v7008_v2 }
 0x167   : > { %v5696_v20 = vpop.f32.mrf.mxu0 }
 0x168   : > { %v1452_v19 = vpop.f32.mrf.mxu1  ;;  %v7145_v17 = vadd.f32 %v1444_v57, %v1197_v8  ;;  %v2865_v57 = vor.u32 %v2863_v48, %v2861_v34  ;;  %v2873_v8 = vor.u32 %v2871_v7, %v2869_v58  ;;  %v6355_v20 = vld [vmem:[%s6698_s21 + $0xe8] sm:$0xff]  }
 0x169   : > { %v1151_v29 = vpop.f32.mrf.mxu0  ;;  %5914 = vmatmul.mubr.msk.bf16.gmra.mxu0 %vm727_vm2, %v6346_v16  ;;  %v2883_v33 = vshll.u32 %v6355_v20, 16 }
 0x16a   : > { %v5738_v26 = vpop.f32.mrf.mxu1  ;;  %v1198_v31 = vadd.f32 %v1151_v29, %v7012_v11  ;;  %5917 = vmatprep.mubr.msk.bf16.mxu0 %vm6497_vm1, %v6496_v45 }
 0x16b   : > { %v5699_v2 = vpop.f32.mrf.mxu0  ;;  %v6352_v26 = vld [vmem:[%s6698_s21 + $0xd0] sm:$0xff]  }
 0x16c   : > { %v1457_v32 = vpop.f32.mrf.mxu1  ;;  %5956 = vmatmul.mubr.msk.bf16.gmra.mxu1 %vm727_vm2, %v2854_v22  ;;  %v7155_v38 = vadd.f32 %v1449_v47, %v1198_v31  ;;  %v2870_v47 = vsel %vm650_vm3, %v2865_v57, %v2869_v58  ;;  %v2879_v2 = vshrl.u32 %v6353_v59, 16 }
 0x16d   : > { %5959 = vmatprep.mubr.msk.bf16.mxu1 %vm6497_vm1, %v6496_v45  ;;  %v1154_v42 = vpop.f32.mrf.mxu0 }
 0x16e   : > { %v5741_v37 = vpop.f32.mrf.mxu1  ;;  %v1199_v11 = vadd.f32 %v1154_v42, %v7021_v21 }
 0x16f   : > { %v5700_v27 = vpop.f32.mrf.mxu0 }
 0x170   : > { %v1460_v44 = vpop.f32.mrf.mxu1  ;;  %v7160_v52 = vadd.f32 %v1452_v19, %v1199_v11  ;;  %v2877_v19 = vrot.slane %v2875_v9, 1  ;;  %v6357_v27 = vld [vmem:[%s6698_s21 + $0xf0] sm:$0xff]  }
 0x171   : > { %v1159_v53 = vpop.f32.mrf.mxu0  ;;  %5918 = vmatmul.mubr.msk.bf16.gmra.mxu0 %vm727_vm2, %v6348_v43  ;;  %v2891_v57 = vshll.u32 %v6357_v27, 16 }
 0x172   : > { %v5742_v51 = vpop.f32.mrf.mxu1  ;;  %v1200_v54 = vadd.f32 %v1159_v53, %v7025_v30  ;;  %5921 = vmatprep.mubr.msk.bf16.mxu0 %vm6497_vm1, %v6496_v45  ;;  %v2881_v11 = vor.u32 %v2879_v2, %v2877_v19 }
 0x173   : > { %v5703_v21 = vpop.f32.mrf.mxu0  ;;  %v6354_v51 = vld [vmem:[%s6698_s21 + $0xd8] sm:$0xff]  }
 0x174   : > { %v1465_v55 = vpop.f32.mrf.mxu1  ;;  %5960 = vmatmul.mubr.msk.bf16.gmra.mxu1 %vm727_vm2, %v2862_v46  ;;  %v7170_v0 = vadd.f32 %v1457_v32, %v1200_v54  ;;  %v2878_v32 = vsel %vm650_vm3, %v2873_v8, %v2877_v19  ;;  %v2887_v21 = vshrl.u32 %v6355_v20, 16  ;;  %v6361_v19 = vld [vmem:[%s6698_s21 + $0xb8] sm:$0xff]  }
 0x175   : > { %5963 = vmatprep.mubr.msk.bf16.mxu1 %vm6497_vm1, %v6496_v45  ;;  %v1162_v1 = vpop.f32.mrf.mxu0  ;;  %v3346_v2 = vshll.u32 %v6361_v19, 16 }
 0x176   : > { %v5745_v61 = vpop.f32.mrf.mxu1  ;;  %v1201_v30 = vadd.f32 %v1162_v1, %v7034_v40 }
 0x177   : > { %v5704_v5 = vpop.f32.mrf.mxu0 }
 0x178   : > { %v1468_v4 = vpop.f32.mrf.mxu1  ;;  %v7175_v12 = vadd.f32 %v1460_v44, %v1201_v30  ;;  %v2885_v44 = vrot.slane %v2883_v33, 1  ;;  %v6359_v5 = vld [vmem:[%s6698_s21 + $0xf8] ss:$0 sps:$4 sm:$0x11]  }
 0x179   : > { %v1167_v14 = vpop.f32.mrf.mxu0  ;;  %5922 = vmatmul.mubr.msk.bf16.gmra.mxu0 %vm727_vm2, %v6350_v62  ;;  %v2899_v8 = vshll.u32 %v6359_v5, 16 }
 0x17a   : > { %v5746_v10 = vpop.f32.mrf.mxu1  ;;  %v1202_v56 = vadd.f32 %v1167_v14, %v7038_v50  ;;  %5925 = vmatprep.mubr.msk.bf16.mxu0 %vm6497_vm1, %v6496_v45  ;;  %v2889_v30 = vor.u32 %v2887_v21, %v2885_v44 }
 0x17b   : > { %v5707_v40 = vpop.f32.mrf.mxu0  ;;  %v6356_v10 = vld [vmem:[%s6698_s21 + $0xe0] sm:$0xff]  }
 0x17c   : > { %v1473_v16 = vpop.f32.mrf.mxu1  ;;  %5964 = vmatmul.mubr.msk.bf16.gmra.mxu1 %vm727_vm2, %v2870_v47  ;;  %v7185_v23 = vadd.f32 %v1465_v55, %v1202_v56  ;;  %v2886_v55 = vsel %vm650_vm3, %v2881_v11, %v2885_v44  ;;  %v2895_v40 = vshrl.u32 %v6357_v27, 16  ;;  %v3344_v44 = vshrl.u32 %v6361_v19, 16 }
 0x17d   : > { %5967 = vmatprep.mubr.msk.bf16.mxu1 %vm6497_vm1, %v6496_v45  ;;  %v1170_v25 = vpop.f32.mrf.mxu0  ;;  %v3348_v27 = vrot.slane %v3346_v2, 1 }
 0x17e   : > { %v5749_v22 = vpop.f32.mrf.mxu1  ;;  %v1203_v50 = vadd.f32 %v1170_v25, %v7047_v60 }
 0x17f   : > { %v5708_v31 = vpop.f32.mrf.mxu0 }
 0x180   : > { %v1476_v29 = vpop.f32.mrf.mxu1  ;;  %v7190_v35 = vadd.f32 %v1468_v4, %v1203_v50  ;;  %v2893_v4 = vrot.slane %v2891_v57, 1  ;;  %v2901_v31 = vrot.slane %v2899_v8, 1  ;;  %v6364_v57 = vld [vmem:[%s6698_s21 + $0xc8] sm:$0xff]  }
 0x181   : > { %v1175_v37 = vpop.f32.mrf.mxu0  ;;  %5926 = vmatmul.mubr.msk.bf16.gmra.mxu0 %vm727_vm2, %v6352_v26 }
 0x182   : > { %v5750_v34 = vpop.f32.mrf.mxu1  ;;  %v1204_v42 = vadd.f32 %v1175_v37, %v7051_v6  ;;  %5929 = vmatprep.mubr.msk.bf16.mxu0 %vm6497_vm1, %v6496_v45 }
 0x183   : > { %v5711_v60 = vpop.f32.mrf.mxu0 }
 0x184   : > { %v1481_v43 = vpop.f32.mrf.mxu1  ;;  %5968 = vmatmul.mubr.msk.bf16.gmra.mxu1 %vm727_vm2, %v2878_v32  ;;  %v7200_v48 = vadd.f32 %v1473_v16, %v1204_v42  ;;  %v2894_v16 = vsel %vm650_vm3, %v2889_v30, %v2893_v4  ;;  %v6362_v32 = vld [vmem:[%s6698_s21 + $0xc0] sm:$0xff]   ;;  %v6358_v42 = vld [vmem:[%s6698_s21 + $0xe8] sm:$0xff]  }
 0x185   : > { %5971 = vmatprep.mubr.msk.bf16.mxu1 %vm6497_vm1, %v6496_v45  ;;  %v1178_v49 = vpop.f32.mrf.mxu0 }
 0x186   : > { %v5753_v46 = vpop.f32.mrf.mxu1  ;;  %v1205_v6 = vadd.f32 %v1178_v49, %v7060_v18 }
 0x187   : > { %v5712_v54 = vpop.f32.mrf.mxu0  ;;  %v3351_v46 = vshll.u32 %v6362_v32, 16 }
 0x188   : > { %v1484_v53 = vpop.f32.mrf.mxu1  ;;  %v7205_v59 = vadd.f32 %v1476_v29, %v1205_v6  ;;  %v2897_v29 = vor.u32 %v2895_v40, %v2893_v4 }
 0x189   : > { %v1183_v61 = vpop.f32.mrf.mxu0  ;;  %5930 = vmatmul.mubr.msk.bf16.gmra.mxu0 %vm727_vm2, %v6354_v51  ;;  %v3353_v21 = vrot.slane %v3351_v46, 1 }
 0x18a   : > { %v5754_v58 = vpop.f32.mrf.mxu1  ;;  %v1206_v1 = vadd.f32 %v1183_v61, %v7064_v28  ;;  %5933 = vmatprep.mubr.msk.bf16.mxu0 %vm6497_vm1, %v6496_v45  ;;  %v2902_v11 = vsel %vm650_vm3, %v2897_v29, %v2901_v31 }
 0x18b   : > { %v5715_v18 = vpop.f32.mrf.mxu0 }
 0x18c   : > { %v1934_v62 = vpop.f32.mrf.mxu1  ;;  %5972 = vmatmul.mubr.msk.bf16.gmra.mxu1 %vm727_vm2, %v2886_v55  ;;  %v7215_v7 = vadd.f32 %v1481_v43, %v1206_v1  ;;  %v3349_v55 = vor.u32 %v3348_v27, %v3344_v44 }
 0x18d   : > { %5975 = vmatprep.mubr.msk.bf16.mxu1 %vm6497_vm1, %v6496_v45  ;;  %v1186_v9 = vpop.f32.mrf.mxu0 }
 0x18e   : > { %v5797_v47 = vpop.f32.mrf.mxu1  ;;  %v1207_v28 = vadd.f32 %v1186_v9, %v7073_v39  ;;  %v3354_v5 = vsel %vm650_vm3, %v3349_v55, %v3353_v21  ;;  %v3359_v9 = vshll.u32 %v6364_v57, 16 }
 0x18f   : > { %v5716_v56 = vpop.f32.mrf.mxu0  ;;  %v3355_v47 = vshrl.u32 %v6362_v32, 16 }
 0x190   : > { %v1937_v14 = vpop.f32.mrf.mxu1  ;;  %v7221_v22 = vadd.f32 %v1484_v53, %v1207_v28  ;;  %v3361_v19 = vrot.slane %v3359_v9, 1  ;;  %v6370_v9 = vld [vmem:[%s6698_s21 + $0xe0] sm:$0xff]  }
 0x191   : > { %v1636_v25 = vpop.f32.mrf.mxu0  ;;  %5934 = vmatmul.mubr.msk.bf16.gmra.mxu0 %vm727_vm2, %v6356_v10  ;;  %v3357_v8 = vor.u32 %v3355_v47, %v3353_v21 }
 0x192   : > { %v5798_v20 = vpop.f32.mrf.mxu1  ;;  %v1707_v26 = vadd.f32 %v1636_v25, %v7085_v63  ;;  %5937 = vmatprep.mubr.msk.bf16.mxu0 %vm6497_vm1, %v6496_v45 }
 0x193   : > { %v5759_v39 = vpop.f32.mrf.mxu0  ;;  %v6366_v20 = vld [vmem:[%s6698_s21 + $0xd0] sm:$0xff]  }
 0x194   : > { %v1942_v50 = vpop.f32.mrf.mxu1  ;;  %5976 = vmatmul.mubr.msk.bf16.gmra.mxu1 %vm727_vm2, %v2894_v16  ;;  %v7231_v34 = vadd.f32 %v1934_v62, %v1707_v26  ;;  %v6360_v62 = vld [vmem:[%s6698_s21 + $0xf0] sm:$0xff]   ;;  %v5269_v26 = vld [vmem:[%s7906_s1 + $0x18] sm:$0x3] }
 0x195   : > { %5979 = vmatprep.mubr.msk.bf16.mxu1 %vm6497_vm1, %v6496_v45  ;;  %v1639_v37 = vpop.f32.mrf.mxu0  ;;  %v6363_v39 = vld [vmem:[%s6698_s21 + $0xb8] sm:$0xff]   ;;  %v3666_v2 = vsel %vm755_vm0, %v5269_v26, 0 }
 0x196   : > { %v5801_v33 = vpop.f32.mrf.mxu1  ;;  %v1708_v63 = vadd.f32 %v1639_v37, %v7090_v13  ;;  %v3363_v37 = vshrl.u32 %v6364_v57, 16 }
 0x197   : > { %v5760_v60 = vpop.f32.mrf.mxu0  ;;  %v3362_v33 = vsel %vm650_vm3, %v3357_v8, %v3361_v19 }
 0x198   : > { %v1945_v43 = vpop.f32.mrf.mxu1  ;;  %v7236_v51 = vadd.f32 %v1937_v14, %v1708_v63  ;;  %v3365_v27 = vor.u32 %v3363_v37, %v3361_v19 }
 0x199   : > { %v1644_v6 = vpop.f32.mrf.mxu0  ;;  %5938 = vmatmul.mubr.msk.bf16.gmra.mxu0 %vm727_vm2, %v6358_v42  ;;  %v3367_v42 = vshll.u32 %v6366_v20, 16 }
 0x19a   : > { %v5802_v49 = vpop.f32.mrf.mxu1  ;;  %v1709_v53 = vadd.f32 %v1644_v6, %v7100_v24  ;;  %5941 = vmatprep.mubr.msk.bf16.mxu0 %vm6497_vm1, %v6496_v45  ;;  %v5307_v24 = vld [vmem:[%s7906_s1 + $0x1a] sm:$0x3] }
 0x19b   : > { %v5763_v13 = vpop.f32.mrf.mxu0  ;;  %v3964_v28 = vsel %vm755_vm0, %v5307_v24, 0  ;;  %v3369_v46 = vrot.slane %v3367_v42, 1  ;;  %v6368_v49 = vld [vmem:[%s6698_s21 + $0xd8] sm:$0xff]  }
 0x19c   : > { %v1950_v54 = vpop.f32.mrf.mxu1  ;;  %5980 = vmatmul.mubr.msk.bf16.gmra.mxu1 %vm727_vm2, %v2902_v11  ;;  %v7246_v61 = vadd.f32 %v1942_v50, %v1709_v53  ;;  %v3379_v19 = vshrl.u32 %v6368_v49, 16 }
 0x19d   : > { %6023 = vmatprep.mubr.msk.bf16.mxu1 %vm6497_vm1, %v6496_v45  ;;  %v1647_v1 = vpop.f32.mrf.mxu0  ;;  %v3370_v57 = vsel %vm650_vm3, %v3365_v27, %v3369_v46 }
 0x19e   : > { %v5805_v58 = vpop.f32.mrf.mxu1  ;;  %v1710_v18 = vadd.f32 %v1647_v1, %v7109_v41  ;;  %v3375_v1 = vshll.u32 %v6368_v49, 16 }
 0x19f   : > { %v5764_v4 = vpop.f32.mrf.mxu0  ;;  %v3371_v58 = vshrl.u32 %v6366_v20, 16  ;;  %v3383_v20 = vshll.u32 %v6370_v9, 16 }
 0x1a0   : > { %v1953_v30 = vpop.f32.mrf.mxu1  ;;  %v7255_v14 = vadd.f32 %v1945_v43, %v1710_v18  ;;  %v3377_v47 = vrot.slane %v3375_v1, 1 }
 0x1a1   : > { %v1652_v56 = vpop.f32.mrf.mxu0  ;;  %5942 = vmatmul.mubr.msk.bf16.gmra.mxu0 %vm727_vm2, %v6360_v62 }
 0x1a2   : > { %v5806_v10 = vpop.f32.mrf.mxu1  ;;  %v1711_v16 = vadd.f32 %v1652_v56, %v7122_v36  ;;  %5985 = vmatprep.mubr.msk.bf16.mxu0 %vm6497_vm1, %v6496_v45 }
 0x1a3   : > { %v5767_v41 = vpop.f32.mrf.mxu0 }
 0x1a4   : > { %v1958_v40 = vpop.f32.mrf.mxu1  ;;  %6024 = vmatmul.mubr.msk.bf16.vlgmr.msra.gmra.mxu1 %vm727_vm2, %v3354_v5  ;;  %v7268_v36 = vadd.f32 %v1950_v54, %v1711_v16  ;;  %v6365_v54 = vld [vmem:[%s6698_s21 + $0xc0] sm:$0xff]   ;;  %v3373_v5 = vor.u32 %v3371_v58, %v3369_v46  ;;  %v6367_v16 = vld [vmem:[%s6698_s21 + $0xc8] sm:$0xff]  }
 0x1a5   : > { %6098 = vmatpush3.bf16.msra.mxu1 %v3964_v28  ;;  %6027 = vmatprep.mubr.msk.bf16.mxu1 %vm6497_vm1, %v6496_v45  ;;  %v1655_v50 = vpop.f32.mrf.mxu0 }
 0x1a6   : > { %v5809_v25 = vpop.f32.mrf.mxu1  ;;  %6173 = vmatprep.subr.bf16.mxu1 %v6496_v45  ;;  %v1712_v29 = vadd.f32 %v1655_v50, %v7129_v3  ;;  %v3378_v8 = vsel %vm650_vm3, %v3373_v5, %v3377_v47 }
 0x1a7   : > { %v5768_v32 = vpop.f32.mrf.mxu0 }
 0x1a8   : > { %v1961_v31 = vpop.f32.mrf.mxu1  ;;  %v7275_v43 = vadd.f32 %v1953_v30, %v1712_v29  ;;  %v3385_v32 = vrot.slane %v3383_v20, 1 }
 0x1a9   : > { %v1660_v60 = vpop.f32.mrf.mxu0  ;;  %5986 = vmatmul.mubr.msk.bf16.vlgmr.msra.gmra.mxu0 %vm727_vm2, %v6363_v39 }
 0x1aa   : > { %v5810_v63 = vpop.f32.mrf.mxu1  ;;  %v1713_v11 = vadd.f32 %v1660_v60, %v7140_v15  ;;  %6060 = vmatpush3.bf16.msra.mxu0 %v3666_v2  ;;  %5989 = vmatprep.mubr.msk.bf16.mxu0 %vm6497_vm1, %v6496_v45  ;;  %v6372_v2 = vld [vmem:[%s6698_s21 + $0xe8] sm:$0xff]  }
 0x1ab   : > { %v5771_v44 = vpop.f32.mrf.mxu0  ;;  %6135 = vmatprep.subr.bf16.mxu0 %v6496_v45  ;;  %v6369_v63 = vld [vmem:[%s6698_s21 + $0xd0] sm:$0xff]   ;;  %v3391_v27 = vshll.u32 %v6372_v2, 16 }
 0x1ac   : > { %v1966_v3 = vpop.f32.mrf.mxu1  ;;  %6028 = vmatmul.mubr.msk.bf16.gmra.mxu1 %vm727_vm2, %v3362_v33  ;;  %v7286_v53 = vadd.f32 %v1958_v40, %v1713_v11  ;;  %v3387_v44 = vshrl.u32 %v6370_v9, 16 }
 0x1ad   : > { %6031 = vmatprep.mubr.msk.bf16.mxu1 %vm6497_vm1, %v6496_v45  ;;  %v1663_v15 = vpop.f32.mrf.mxu0 }
 0x1ae   : > { %v5813_v6 = vpop.f32.mrf.mxu1  ;;  %v1714_v13 = vadd.f32 %v1663_v15, %v7145_v17 }
 0x1af   : > { %v5772_v21 = vpop.f32.mrf.mxu0 }
 0x1b0   : > { %v1969_v55 = vpop.f32.mrf.mxu1  ;;  %v7291_v24 = vadd.f32 %v1961_v31, %v1714_v13  ;;  %v3381_v31 = vor.u32 %v3379_v19, %v3377_v47  ;;  %v3389_v13 = vor.u32 %v3387_v44, %v3385_v32  ;;  %v6374_v21 = vld [vmem:[%s6698_s21 + $0xf0] sm:$0xff]  }
 0x1b1   : > { %v1668_v18 = vpop.f32.mrf.mxu0  ;;  %5990 = vmatmul.mubr.msk.bf16.gmra.mxu0 %vm727_vm2, %v6365_v54  ;;  %v3399_v5 = vshll.u32 %v6374_v21, 16 }
 0x1b2   : > { %v5814_v62 = vpop.f32.mrf.mxu1  ;;  %v1715_v30 = vadd.f32 %v1668_v18, %v7155_v38  ;;  %5993 = vmatprep.mubr.msk.bf16.mxu0 %vm6497_vm1, %v6496_v45 }
 0x1b3   : > { %v5775_v17 = vpop.f32.mrf.mxu0  ;;  %v6371_v62 = vld [vmem:[%s6698_s21 + $0xd8] sm:$0xff]  }
 0x1b4   : > { %v1974_v4 = vpop.f32.mrf.mxu1  ;;  %6032 = vmatmul.mubr.msk.bf16.gmra.mxu1 %vm727_vm2, %v3370_v57  ;;  %v7301_v28 = vadd.f32 %v1966_v3, %v1715_v30  ;;  %v3386_v3 = vsel %vm650_vm3, %v3381_v31, %v3385_v32  ;;  %v3395_v17 = vshrl.u32 %v6372_v2, 16 }
 0x1b5   : > { %6035 = vmatprep.mubr.msk.bf16.mxu1 %vm6497_vm1, %v6496_v45  ;;  %v1671_v56 = vpop.f32.mrf.mxu0 }
 0x1b6   : > { %v5817_v10 = vpop.f32.mrf.mxu1  ;;  %v1716_v38 = vadd.f32 %v1671_v56, %v7160_v52 }
 0x1b7   : > { %v5776_v41 = vpop.f32.mrf.mxu0 }
 0x1b8   : > { %v1977_v40 = vpop.f32.mrf.mxu1  ;;  %v7306_v26 = vadd.f32 %v1969_v55, %v1716_v38  ;;  %v3393_v55 = vrot.slane %v3391_v27, 1  ;;  %v6376_v41 = vld [vmem:[%s6698_s21 + $0xf8] sm:$0xff]  }
 0x1b9   : > { %v1676_v50 = vpop.f32.mrf.mxu0  ;;  %5994 = vmatmul.mubr.msk.bf16.gmra.mxu0 %vm727_vm2, %v6367_v16  ;;  %v3407_v31 = vshll.u32 %v6376_v41, 16 }
 0x1ba   : > { %v5818_v25 = vpop.f32.mrf.mxu1  ;;  %v1717_v39 = vadd.f32 %v1676_v50, %v7170_v0  ;;  %5997 = vmatprep.mubr.msk.bf16.mxu0 %vm6497_vm1, %v6496_v45  ;;  %v3397_v38 = vor.u32 %v3395_v17, %v3393_v55 }
 0x1bb   : > { %v5779_v52 = vpop.f32.mrf.mxu0  ;;  %v6373_v25 = vld [vmem:[%s6698_s21 + $0xe0] sm:$0xff]  }
 0x1bc   : > { %v1982_v29 = vpop.f32.mrf.mxu1  ;;  %6036 = vmatmul.mubr.msk.bf16.gmra.mxu1 %vm727_vm2, %v3378_v8  ;;  %v7316_v37 = vadd.f32 %v1974_v4, %v1717_v39  ;;  %v3394_v4 = vsel %vm650_vm3, %v3389_v13, %v3393_v55  ;;  %v3403_v52 = vshrl.u32 %v6374_v21, 16  ;;  %v6380_v55 = vld [vmem:[%s6698_s21 + $0x108] sm:$0xff]  }
 0x1bd   : > { %6039 = vmatprep.mubr.msk.bf16.mxu1 %vm6497_vm1, %v6496_v45  ;;  %v1679_v42 = vpop.f32.mrf.mxu0  ;;  %v3863_v17 = vshll.u32 %v6380_v55, 16 }
 0x1be   : > { %v5821_v33 = vpop.f32.mrf.mxu1  ;;  %v1718_v0 = vadd.f32 %v1679_v42, %v7175_v12 }
 0x1bf   : > { %v5780_v11 = vpop.f32.mrf.mxu0 }
 0x1c0   : > { %v1985_v60 = vpop.f32.mrf.mxu1  ;;  %v7321_v49 = vadd.f32 %v1977_v40, %v1718_v0  ;;  %v3401_v40 = vrot.slane %v3399_v5, 1  ;;  %v6378_v11 = vld [vmem:[%s6698_s21 + $0x100] ss:$0 sps:$4 sm:$0x11]  }
 0x1c1   : > { %v1684_v6 = vpop.f32.mrf.mxu0  ;;  %5998 = vmatmul.mubr.msk.bf16.gmra.mxu0 %vm727_vm2, %v6369_v63  ;;  %v3415_v13 = vshll.u32 %v6378_v11, 16 }
 0x1c2   : > { %v5822_v46 = vpop.f32.mrf.mxu1  ;;  %v1719_v15 = vadd.f32 %v1684_v6, %v7185_v23  ;;  %6001 = vmatprep.mubr.msk.bf16.mxu0 %vm6497_vm1, %v6496_v45  ;;  %v3405_v0 = vor.u32 %v3403_v52, %v3401_v40 }
 0x1c3   : > { %v5783_v12 = vpop.f32.mrf.mxu0  ;;  %v6375_v46 = vld [vmem:[%s6698_s21 + $0xe8] sm:$0xff]  }
 0x1c4   : > { %v1990_v54 = vpop.f32.mrf.mxu1  ;;  %6040 = vmatmul.mubr.msk.bf16.gmra.mxu1 %vm727_vm2, %v3386_v3  ;;  %v7331_v58 = vadd.f32 %v1982_v29, %v1719_v15  ;;  %v3402_v29 = vsel %vm650_vm3, %v3397_v38, %v3401_v40  ;;  %v3411_v12 = vshrl.u32 %v6376_v41, 16  ;;  %v3861_v40 = vshrl.u32 %v6380_v55, 16 }
 0x1c5   : > { %6043 = vmatprep.mubr.msk.bf16.mxu1 %vm6497_vm1, %v6496_v45  ;;  %v1687_v1 = vpop.f32.mrf.mxu0  ;;  %v3865_v41 = vrot.slane %v3863_v17, 1 }
 0x1c6   : > { %v5825_v57 = vpop.f32.mrf.mxu1  ;;  %v1720_v23 = vadd.f32 %v1687_v1, %v7190_v35 }
 0x1c7   : > { %v5784_v30 = vpop.f32.mrf.mxu0 }
 0x1c8   : > { %v1993_v18 = vpop.f32.mrf.mxu1  ;;  %v7336_v9 = vadd.f32 %v1985_v60, %v1720_v23  ;;  %v3409_v60 = vrot.slane %v3407_v31, 1  ;;  %v3417_v30 = vrot.slane %v3415_v13, 1  ;;  %v6383_v31 = vld [vmem:[%s6698_s21 + $0x118] sm:$0xff]  }
 0x1c9   : > { %v1692_v10 = vpop.f32.mrf.mxu0  ;;  %6002 = vmatmul.mubr.msk.bf16.gmra.mxu0 %vm727_vm2, %v6371_v62 }
 0x1ca   : > { %v5826_v47 = vpop.f32.mrf.mxu1  ;;  %v1721_v56 = vadd.f32 %v1692_v10, %v7200_v48  ;;  %6005 = vmatprep.mubr.msk.bf16.mxu0 %vm6497_vm1, %v6496_v45 }
 0x1cb   : > { %v5787_v35 = vpop.f32.mrf.mxu0 }
 0x1cc   : > { %v1998_v16 = vpop.f32.mrf.mxu1  ;;  %6044 = vmatmul.mubr.msk.bf16.gmra.mxu1 %vm727_vm2, %v3394_v4  ;;  %v7346_v19 = vadd.f32 %v1990_v54, %v1721_v56  ;;  %v3410_v54 = vsel %vm650_vm3, %v3405_v0, %v3409_v60  ;;  %v6381_v4 = vld [vmem:[%s6698_s21 + $0x110] sm:$0xff]  }
 0x1cd   : > { %6047 = vmatprep.mubr.msk.bf16.mxu1 %vm6497_vm1, %v6496_v45  ;;  %v1695_v20 = vpop.f32.mrf.mxu0  ;;  %v6377_v56 = vld [vmem:[%s6698_s21 + $0xf0] sm:$0xff]  }
 0x1ce   : > { %v5829_v8 = vpop.f32.mrf.mxu1  ;;  %v1722_v48 = vadd.f32 %v1695_v20, %v7205_v59 }
 0x1cf   : > { %v5788_v39 = vpop.f32.mrf.mxu0  ;;  %v3868_v8 = vshll.u32 %v6381_v4, 16 }
 0x1d0   : > { %v2001_v50 = vpop.f32.mrf.mxu1  ;;  %v7351_v2 = vadd.f32 %v1993_v18, %v1722_v48  ;;  %v3413_v18 = vor.u32 %v3411_v12, %v3409_v60 }
 0x1d1   : > { %v1700_v33 = vpop.f32.mrf.mxu0  ;;  %6006 = vmatmul.mubr.msk.bf16.gmra.mxu0 %vm727_vm2, %v6373_v25  ;;  %v3870_v52 = vrot.slane %v3868_v8, 1 }
 0x1d2   : > { %v5830_v32 = vpop.f32.mrf.mxu1  ;;  %v1723_v42 = vadd.f32 %v1700_v33, %v7215_v7  ;;  %6009 = vmatprep.mubr.msk.bf16.mxu0 %vm6497_vm1, %v6496_v45  ;;  %v3418_v38 = vsel %vm650_vm3, %v3413_v18, %v3417_v30 }
 0x1d3   : > { %v5791_v59 = vpop.f32.mrf.mxu0 }
 0x1d4   : > { %v2450_v63 = vpop.f32.mrf.mxu1  ;;  %6048 = vmatmul.mubr.msk.bf16.gmra.mxu1 %vm727_vm2, %v3402_v29  ;;  %v7361_v44 = vadd.f32 %v1998_v16, %v1723_v42  ;;  %v3866_v29 = vor.u32 %v3865_v41, %v3861_v40 }
 0x1d5   : > { %6051 = vmatprep.mubr.msk.bf16.mxu1 %vm6497_vm1, %v6496_v45  ;;  %v1703_v27 = vpop.f32.mrf.mxu0 }
 0x1d6   : > { %v5873_v3 = vpop.f32.mrf.mxu1  ;;  %v1724_v7 = vadd.f32 %v1703_v27, %v7221_v22  ;;  %v3871_v11 = vsel %vm650_vm3, %v3866_v29, %v3870_v52  ;;  %v3876_v27 = vshll.u32 %v6383_v31, 16 }
 0x1d7   : > { %v5792_v15 = vpop.f32.mrf.mxu0  ;;  %v3872_v3 = vshrl.u32 %v6381_v4, 16 }
 0x1d8   : > { %v2453_v6 = vpop.f32.mrf.mxu1  ;;  %v7367_v57 = vadd.f32 %v2001_v50, %v1724_v7  ;;  %v3878_v55 = vrot.slane %v3876_v27, 1  ;;  %v6389_v27 = vld [vmem:[%s6698_s21 + $0x130] sm:$0xff]  }
 0x1d9   : > { %v2152_v1 = vpop.f32.mrf.mxu0  ;;  %6010 = vmatmul.mubr.msk.bf16.gmra.mxu0 %vm727_vm2, %v6375_v46  ;;  %v3874_v13 = vor.u32 %v3872_v3, %v3870_v52 }
 0x1da   : > { %v5874_v21 = vpop.f32.mrf.mxu1  ;;  %v2223_v62 = vadd.f32 %v2152_v1, %v7231_v34  ;;  %6013 = vmatprep.mubr.msk.bf16.mxu0 %vm6497_vm1, %v6496_v45 }
 0x1db   : > { %v5835_v22 = vpop.f32.mrf.mxu0  ;;  %v6385_v21 = vld [vmem:[%s6698_s21 + $0x120] sm:$0xff]  }
 0x1dc   : > { %v2458_v23 = vpop.f32.mrf.mxu1  ;;  %6052 = vmatmul.mubr.msk.bf16.gmra.mxu1 %vm727_vm2, %v3410_v54  ;;  %v7377_v47 = vadd.f32 %v2450_v63, %v2223_v62  ;;  %v6379_v63 = vld [vmem:[%s6698_s21 + $0xf8] sm:$0xff]   ;;  %v6382_v22 = vld [vmem:[%s6698_s21 + $0x108] sm:$0xff]  }
 0x1dd   : > { %6055 = vmatprep.mubr.msk.bf16.mxu1 %vm6497_vm1, %v6496_v45  ;;  %v2155_v10 = vpop.f32.mrf.mxu0  ;;  %v5345_v62 = vld [vmem:[%s7906_s1 + $0x1c] sm:$0x3] }
 0x1de   : > { %v5877_v5 = vpop.f32.mrf.mxu1  ;;  %v2224_v34 = vadd.f32 %v2155_v10, %v7236_v51  ;;  %v4182_v17 = vsel %vm755_vm0, %v5345_v62, 0  ;;  %v3880_v10 = vshrl.u32 %v6383_v31, 16 }
 0x1df   : > { %v5836_v35 = vpop.f32.mrf.mxu0  ;;  %v3879_v5 = vsel %vm650_vm3, %v3874_v13, %v3878_v55 }
 0x1e0   : > { %v2461_v16 = vpop.f32.mrf.mxu1  ;;  %v7382_v25 = vadd.f32 %v2453_v6, %v2224_v34  ;;  %v3882_v41 = vor.u32 %v3880_v10, %v3878_v55 }
 0x1e1   : > { %v2160_v48 = vpop.f32.mrf.mxu0  ;;  %6014 = vmatmul.mubr.msk.bf16.gmra.mxu0 %vm727_vm2, %v6377_v56  ;;  %v3884_v56 = vshll.u32 %v6385_v21, 16 }
 0x1e2   : > { %v5878_v20 = vpop.f32.mrf.mxu1  ;;  %v2225_v50 = vadd.f32 %v2160_v48, %v7246_v61  ;;  %6017 = vmatprep.mubr.msk.bf16.mxu0 %vm6497_vm1, %v6496_v45  ;;  %v5383_v61 = vld [vmem:[%s7906_s1 + $0x1e] sm:$0x3] }
 0x1e3   : > { %v5839_v51 = vpop.f32.mrf.mxu0  ;;  %v4480_v7 = vsel %vm755_vm0, %v5383_v61, 0  ;;  %v3886_v8 = vrot.slane %v3884_v56, 1  ;;  %v6387_v20 = vld [vmem:[%s6698_s21 + $0x128] sm:$0xff]  }
 0x1e4   : > { %v2466_v39 = vpop.f32.mrf.mxu1  ;;  %6056 = vmatmul.mubr.msk.bf16.gmra.mxu1 %vm727_vm2, %v3418_v38  ;;  %v7392_v33 = vadd.f32 %v2458_v23, %v2225_v50  ;;  %v6384_v51 = vld [vmem:[%s6698_s21 + $0x110] sm:$0xff]   ;;  %v3896_v55 = vshrl.u32 %v6387_v20, 16 }
 0x1e5   : > { %6099 = vmatprep.mubr.msk.bf16.mxu1 %vm6497_vm1, %v6496_v45  ;;  %v2163_v42 = vpop.f32.mrf.mxu0  ;;  %v3887_v31 = vsel %vm650_vm3, %v3882_v41, %v3886_v8 }
 0x1e6   : > { %v5881_v32 = vpop.f32.mrf.mxu1  ;;  %v2226_v59 = vadd.f32 %v2163_v42, %v7255_v14  ;;  %v3892_v42 = vshll.u32 %v6387_v20, 16 }
 0x1e7   : > { %v5840_v60 = vpop.f32.mrf.mxu0  ;;  %v3888_v32 = vshrl.u32 %v6385_v21, 16  ;;  %v3900_v21 = vshll.u32 %v6389_v27, 16 }
 0x1e8   : > { %v2469_v0 = vpop.f32.mrf.mxu1  ;;  %v7401_v6 = vadd.f32 %v2461_v16, %v2226_v59  ;;  %v3894_v3 = vrot.slane %v3892_v42, 1 }
 0x1e9   : > { %v2168_v15 = vpop.f32.mrf.mxu0  ;;  %6018 = vmatmul.mubr.msk.bf16.gmra.mxu0 %vm727_vm2, %v6379_v63 }
 0x1ea   : > { %v5882_v46 = vpop.f32.mrf.mxu1  ;;  %v2227_v54 = vadd.f32 %v2168_v15, %v7268_v36  ;;  %6061 = vmatprep.mubr.msk.bf16.mxu0 %vm6497_vm1, %v6496_v45 }
 0x1eb   : > { %v5843_v14 = vpop.f32.mrf.mxu0 }
 0x1ec   : > { %v2474_v12 = vpop.f32.mrf.mxu1  ;;  %6100 = vmatmul.mubr.msk.bf16.vlgmr.msra.gmra.mxu1 %vm727_vm2, %v3871_v11  ;;  %v7414_v36 = vadd.f32 %v2466_v39, %v2227_v54  ;;  %v3890_v11 = vor.u32 %v3888_v32, %v3886_v8  ;;  %v6386_v54 = vld [vmem:[%s6698_s21 + $0x118] sm:$0xff]  }
 0x1ed   : > { %6174 = vmatpush3.bf16.msra.mxu1 %v4480_v7  ;;  %6103 = vmatprep.mubr.msk.bf16.mxu1 %vm6497_vm1, %v6496_v45  ;;  %v2171_v23 = vpop.f32.mrf.mxu0 }
 0x1ee   : > { %v5885_v1 = vpop.f32.mrf.mxu1  ;;  %v2228_v18 = vadd.f32 %v2171_v23, %v7275_v43  ;;  %v3895_v13 = vsel %vm650_vm3, %v3890_v11, %v3894_v3 }
 0x1ef   : > { %v5844_v4 = vpop.f32.mrf.mxu0 }
 0x1f0   : > { %v2477_v30 = vpop.f32.mrf.mxu1  ;;  %v7420_v16 = vadd.f32 %v2469_v0, %v2228_v18  ;;  %v3902_v4 = vrot.slane %v3900_v21, 1 }
 0x1f1   : > { %v2176_v35 = vpop.f32.mrf.mxu0  ;;  %6062 = vmatmul.mubr.msk.bf16.vlgmr.msra.gmra.mxu0 %vm727_vm2, %v6382_v22 }
 0x1f2   : > { %v5886_v34 = vpop.f32.mrf.mxu1  ;;  %v2229_v38 = vadd.f32 %v2176_v35, %v7286_v53  ;;  %6136 = vmatpush3.bf16.msra.mxu0 %v4182_v17  ;;  %6065 = vmatprep.mubr.msk.bf16.mxu0 %vm6497_vm1, %v6496_v45  ;;  %v6391_v17 = vld [vmem:[%s6698_s21 + $0x138] sm:$0xff]  }
 0x1f3   : > { %v5847_v40 = vpop.f32.mrf.mxu0  ;;  %v6388_v34 = vld [vmem:[%s6698_s21 + $0x120] sm:$0xff]   ;;  %v3908_v41 = vshll.u32 %v6391_v17, 16 }
 0x1f4   : > { %v2482_v43 = vpop.f32.mrf.mxu1  ;;  %6104 = vmatmul.mubr.msk.bf16.gmra.mxu1 %vm727_vm2, %v3879_v5  ;;  %v7430_v50 = vadd.f32 %v2474_v12, %v2229_v38  ;;  %v3904_v40 = vshrl.u32 %v6389_v27, 16 }
 0x1f5   : > { %6107 = vmatprep.mubr.msk.bf16.mxu1 %vm6497_vm1, %v6496_v45  ;;  %v2179_v39 = vpop.f32.mrf.mxu0 }
 0x1f6   : > { %v5889_v48 = vpop.f32.mrf.mxu1  ;;  %v2230_v53 = vadd.f32 %v2179_v39, %v7291_v24 }
 0x1f7   : > { %v5848_v52 = vpop.f32.mrf.mxu0 }
 0x1f8   : > { %v2485_v29 = vpop.f32.mrf.mxu1  ;;  %v7435_v61 = vadd.f32 %v2477_v30, %v2230_v53  ;;  %v3898_v30 = vor.u32 %v3896_v55, %v3894_v3  ;;  %v3906_v53 = vor.u32 %v3904_v40, %v3902_v4  ;;  %v6393_v52 = vld [vmem:[%s6698_s21 + $0x140] sm:$0xff]  }
 0x1f9   : > { %v2184_v59 = vpop.f32.mrf.mxu0  ;;  %6066 = vmatmul.mubr.msk.bf16.gmra.mxu0 %vm727_vm2, %v6384_v51  ;;  %v3916_v11 = vshll.u32 %v6393_v52, 16 }
 0x1fa   : > { %v5890_v63 = vpop.f32.mrf.mxu1  ;;  %v2231_v0 = vadd.f32 %v2184_v59, %v7301_v28  ;;  %6069 = vmatprep.mubr.msk.bf16.mxu0 %vm6497_vm1, %v6496_v45 }
 0x1fb   : > { %v5851_v24 = vpop.f32.mrf.mxu0  ;;  %v6390_v63 = vld [vmem:[%s6698_s21 + $0x128] sm:$0xff]  }
 0x1fc   : > { %v2490_v60 = vpop.f32.mrf.mxu1  ;;  %6108 = vmatmul.mubr.msk.bf16.gmra.mxu1 %vm727_vm2, %v3887_v31  ;;  %v7445_v7 = vadd.f32 %v2482_v43, %v2231_v0  ;;  %v3903_v43 = vsel %vm650_vm3, %v3898_v30, %v3902_v4  ;;  %v3912_v24 = vshrl.u32 %v6391_v17, 16 }
 0x1fd   : > { %6111 = vmatprep.mubr.msk.bf16.mxu1 %vm6497_vm1, %v6496_v45  ;;  %v2187_v15 = vpop.f32.mrf.mxu0 }
 0x1fe   : > { %v5893_v46 = vpop.f32.mrf.mxu1  ;;  %v2232_v28 = vadd.f32 %v2187_v15, %v7306_v26 }
 0x1ff   : > { %v5852_v14 = vpop.f32.mrf.mxu0 }
 0x200   : > { %v2493_v12 = vpop.f32.mrf.mxu1  ;;  %v7450_v62 = vadd.f32 %v2485_v29, %v2232_v28  ;;  %v3910_v29 = vrot.slane %v3908_v41, 1  ;;  %v6395_v14 = vld [vmem:[%s6698_s21 + $0x148] sm:$0xff]  }
 0x201   : > { %v2192_v23 = vpop.f32.mrf.mxu0  ;;  %6070 = vmatmul.mubr.msk.bf16.gmra.mxu0 %vm727_vm2, %v6386_v54  ;;  %v3924_v30 = vshll.u32 %v6395_v14, 16 }
 0x202   : > { %v5894_v1 = vpop.f32.mrf.mxu1  ;;  %v2233_v22 = vadd.f32 %v2192_v23, %v7316_v37  ;;  %6073 = vmatprep.mubr.msk.bf16.mxu0 %vm6497_vm1, %v6496_v45  ;;  %v3914_v28 = vor.u32 %v3912_v24, %v3910_v29 }
 0x203   : > { %v5855_v26 = vpop.f32.mrf.mxu0  ;;  %v6392_v1 = vld [vmem:[%s6698_s21 + $0x130] sm:$0xff]  }
 0x204   : > { %v2498_v18 = vpop.f32.mrf.mxu1  ;;  %6112 = vmatmul.mubr.msk.bf16.gmra.mxu1 %vm727_vm2, %v3895_v13  ;;  %v7460_v10 = vadd.f32 %v2490_v60, %v2233_v22  ;;  %v3911_v60 = vsel %vm650_vm3, %v3906_v53, %v3910_v29  ;;  %v3920_v26 = vshrl.u32 %v6393_v52, 16  ;;  %v6399_v29 = vld [vmem:[%s6698_s21 + $0x110] sm:$0xff]  }
 0x205   : > { %6115 = vmatprep.mubr.msk.bf16.mxu1 %vm6497_vm1, %v6496_v45  ;;  %v2195_v56 = vpop.f32.mrf.mxu0  ;;  %v4379_v24 = vshll.u32 %v6399_v29, 16 }
 0x206   : > { %v5897_v5 = vpop.f32.mrf.mxu1  ;;  %v2234_v37 = vadd.f32 %v2195_v56, %v7321_v49 }
 0x207   : > { %v5856_v38 = vpop.f32.mrf.mxu0 }
 0x208   : > { %v2501_v35 = vpop.f32.mrf.mxu1  ;;  %v7465_v20 = vadd.f32 %v2493_v12, %v2234_v37  ;;  %v3918_v12 = vrot.slane %v3916_v11, 1  ;;  %v6397_v38 = vld [vmem:[%s6698_s21 + $0x150] ss:$0 sps:$4 sm:$0x11]  }
 0x209   : > { %v2200_v48 = vpop.f32.mrf.mxu0  ;;  %6074 = vmatmul.mubr.msk.bf16.gmra.mxu0 %vm727_vm2, %v6388_v34  ;;  %v3932_v53 = vshll.u32 %v6397_v38, 16 }
 0x20a   : > { %v5898_v8 = vpop.f32.mrf.mxu1  ;;  %v2235_v39 = vadd.f32 %v2200_v48, %v7331_v58  ;;  %6077 = vmatprep.mubr.msk.bf16.mxu0 %vm6497_vm1, %v6496_v45  ;;  %v3922_v37 = vor.u32 %v3920_v26, %v3918_v12 }
 0x20b   : > { %v5859_v49 = vpop.f32.mrf.mxu0  ;;  %v6394_v8 = vld [vmem:[%s6698_s21 + $0x138] sm:$0xff]  }
 0x20c   : > { %v2506_v51 = vpop.f32.mrf.mxu1  ;;  %6116 = vmatmul.mubr.msk.bf16.gmra.mxu1 %vm727_vm2, %v3903_v43  ;;  %v7475_v32 = vadd.f32 %v2498_v18, %v2235_v39  ;;  %v3919_v18 = vsel %vm650_vm3, %v3914_v28, %v3918_v12  ;;  %v3928_v49 = vshrl.u32 %v6395_v14, 16  ;;  %v4377_v12 = vshrl.u32 %v6399_v29, 16 }
 0x20d   : > { %6119 = vmatprep.mubr.msk.bf16.mxu1 %vm6497_vm1, %v6496_v45  ;;  %v2203_v42 = vpop.f32.mrf.mxu0  ;;  %v4381_v14 = vrot.slane %v4379_v24, 1 }
 0x20e   : > { %v5901_v31 = vpop.f32.mrf.mxu1  ;;  %v2236_v58 = vadd.f32 %v2203_v42, %v7336_v9 }
 0x20f   : > { %v5860_v0 = vpop.f32.mrf.mxu0 }
 0x210   : > { %v2509_v59 = vpop.f32.mrf.mxu1  ;;  %v7480_v27 = vadd.f32 %v2501_v35, %v2236_v58  ;;  %v3926_v35 = vrot.slane %v3924_v30, 1  ;;  %v3934_v0 = vrot.slane %v3932_v53, 1  ;;  %v6402_v30 = vld [vmem:[%s6698_s21 + $0x120] sm:$0xff]   ;;  %v6404_v53 = vld [vmem:[%s6698_s21 + $0x128] sm:$0xff]  }
 0x211   : > { %v2208_v46 = vpop.f32.mrf.mxu0  ;;  %6078 = vmatmul.mubr.msk.bf16.gmra.mxu0 %vm727_vm2, %v6390_v63 }
 0x212   : > { %v5902_v3 = vpop.f32.mrf.mxu1  ;;  %v2237_v15 = vadd.f32 %v2208_v46, %v7346_v19  ;;  %6081 = vmatprep.mubr.msk.bf16.mxu0 %vm6497_vm1, %v6496_v45 }
 0x213   : > { %v5863_v9 = vpop.f32.mrf.mxu0 }
 0x214   : > { %v2514_v54 = vpop.f32.mrf.mxu1  ;;  %6120 = vmatmul.mubr.msk.bf16.gmra.mxu1 %vm727_vm2, %v3911_v60  ;;  %v7490_v55 = vadd.f32 %v2506_v51, %v2237_v15  ;;  %v3927_v51 = vsel %vm650_vm3, %v3922_v37, %v3926_v35  ;;  %v6400_v60 = vld [vmem:[%s6698_s21 + $0x118] sm:$0xff]   ;;  %v6396_v15 = vld [vmem:[%s6698_s21 + $0x140] sm:$0xff]  }
 0x215   : > { %6123 = vmatprep.mubr.msk.bf16.mxu1 %vm6497_vm1, %v6496_v45  ;;  %v2211_v21 = vpop.f32.mrf.mxu0  ;;  %v4388_v38 = vshrl.u32 %v6400_v60, 16 }
 0x216   : > { %v5905_v13 = vpop.f32.mrf.mxu1  ;;  %v2238_v19 = vadd.f32 %v2211_v21, %v7351_v2 }
 0x217   : > { %v5864_v22 = vpop.f32.mrf.mxu0  ;;  %v4384_v13 = vshll.u32 %v6400_v60, 16  ;;  %v4400_v60 = vshll.u32 %v6404_v53, 16 }
 0x218   : > { %v2517_v23 = vpop.f32.mrf.mxu1  ;;  %v7495_v17 = vadd.f32 %v2509_v59, %v2238_v19  ;;  %v3930_v59 = vor.u32 %v3928_v49, %v3926_v35 }
 0x219   : > { %v2216_v5 = vpop.f32.mrf.mxu0  ;;  %6082 = vmatmul.mubr.msk.bf16.gmra.mxu0 %vm727_vm2, %v6392_v1  ;;  %v4386_v26 = vrot.slane %v4384_v13, 1 }
 0x21a   : > { %v5906_v4 = vpop.f32.mrf.mxu1  ;;  %v2239_v56 = vadd.f32 %v2216_v5, %v7361_v44  ;;  %6085 = vmatprep.mubr.msk.bf16.mxu0 %vm6497_vm1, %v6496_v45  ;;  %v3935_v28 = vsel %vm650_vm3, %v3930_v59, %v3934_v0  ;;  %v4396_v0 = vshrl.u32 %v6402_v30, 16 }
 0x21b   : > { %v5867_v2 = vpop.f32.mrf.mxu0 }
 0x21c   : > { %v2967_v34 = vpop.f32.mrf.mxu1  ;;  %6124 = vmatmul.mubr.msk.bf16.gmra.mxu1 %vm727_vm2, %v3919_v18  ;;  %v7505_v40 = vadd.f32 %v2514_v54, %v2239_v56  ;;  %v4382_v18 = vor.u32 %v4381_v14, %v4377_v12 }
 0x21d   : > { %6127 = vmatprep.mubr.msk.bf16.mxu1 %vm6497_vm1, %v6496_v45  ;;  %v2219_v41 = vpop.f32.mrf.mxu0 }
 0x21e   : > { %v5949_v43 = vpop.f32.mrf.mxu1  ;;  %v2240_v44 = vadd.f32 %v2219_v41, %v7367_v57  ;;  %v4387_v35 = vsel %vm650_vm3, %v4382_v18, %v4386_v26 }
 0x21f   : > { %v5868_v39 = vpop.f32.mrf.mxu0  ;;  %v4392_v43 = vshll.u32 %v6402_v30, 16 }
 0x220   : > { %v2970_v48 = vpop.f32.mrf.mxu1  ;;  %v7511_v31 = vadd.f32 %v2517_v23, %v2240_v44 }
 0x221   : > { %v2669_v42 = vpop.f32.mrf.mxu0  ;;  %6086 = vmatmul.mubr.msk.bf16.gmra.mxu0 %vm727_vm2, %v6394_v8  ;;  %v4394_v49 = vrot.slane %v4392_v43, 1 }
 0x222   : > { %v5950_v52 = vpop.f32.mrf.mxu1  ;;  %v2740_v63 = vadd.f32 %v2669_v42, %v7377_v47  ;;  %6089 = vmatprep.mubr.msk.bf16.mxu0 %vm6497_vm1, %v6496_v45 }
 0x223   : > { %v5911_v57 = vpop.f32.mrf.mxu0 }
 0x224   : > { %v2975_v58 = vpop.f32.mrf.mxu1  ;;  %6128 = vmatmul.mubr.msk.bf16.gmra.mxu1 %vm727_vm2, %v3927_v51  ;;  %v7521_v3 = vadd.f32 %v2967_v34, %v2740_v63  ;;  %v6398_v34 = vld [vmem:[%s6698_s21 + $0x148] sm:$0xff]   ;;  %v4390_v51 = vor.u32 %v4388_v38, %v4386_v26  ;;  %v6401_v63 = vld [vmem:[%s6698_s21 + $0x110] sm:$0xff]  }
 0x225   : > { %6131 = vmatprep.mubr.msk.bf16.mxu1 %vm6497_vm1, %v6496_v45  ;;  %v2672_v46 = vpop.f32.mrf.mxu0 }
 0x226   : > { %v5953_v11 = vpop.f32.mrf.mxu1  ;;  %v2741_v47 = vadd.f32 %v2672_v46, %v7382_v25  ;;  %v4395_v59 = vsel %vm650_vm3, %v4390_v51, %v4394_v49 }
 0x227   : > { %v5912_v9 = vpop.f32.mrf.mxu0 }
 0x228   : > { %v2978_v54 = vpop.f32.mrf.mxu1  ;;  %v7526_v1 = vadd.f32 %v2970_v48, %v2741_v47  ;;  %v4402_v9 = vrot.slane %v4400_v60, 1 }
 0x229   : > { %v2677_v19 = vpop.f32.mrf.mxu0  ;;  %6090 = vmatmul.mubr.msk.bf16.gmra.mxu0 %vm727_vm2, %v6396_v15 }
 0x22a   : > { %v5954_v21 = vpop.f32.mrf.mxu1  ;;  %v2742_v23 = vadd.f32 %v2677_v19, %v7392_v33  ;;  %6093 = vmatprep.mubr.msk.bf16.mxu0 %vm6497_vm1, %v6496_v45 }
 0x22b   : > { %v5915_v25 = vpop.f32.mrf.mxu0  ;;  %v6403_v21 = vld [vmem:[%s6698_s21 + $0x118] sm:$0xff]  }
 0x22c   : > { %v2983_v22 = vpop.f32.mrf.mxu1  ;;  %6132 = vmatmul.mubr.msk.bf16.gmra.mxu1 %vm727_vm2, %v3935_v28  ;;  %v7536_v5 = vadd.f32 %v2975_v58, %v2742_v23  ;;  %v6406_v28 = vld [vmem:[%s6698_s21 + $0x130] sm:$0xff]   ;;  %v4404_v25 = vshrl.u32 %v6404_v53, 16 }
 0x22d   : > { %6175 = vmatprep.mubr.msk.bf16.mxu1 %vm6497_vm1, %v6496_v45  ;;  %v2680_v56 = vpop.f32.mrf.mxu0  ;;  %v4408_v18 = vshll.u32 %v6406_v28, 16 }
 0x22e   : > { %v5957_v4 = vpop.f32.mrf.mxu1  ;;  %v2743_v33 = vadd.f32 %v2680_v56, %v7401_v6 }
 0x22f   : > { %v5916_v37 = vpop.f32.mrf.mxu0 }
 0x230   : > { %v2986_v2 = vpop.f32.mrf.mxu1  ;;  %v7541_v8 = vadd.f32 %v2978_v54, %v2743_v33  ;;  %v4398_v54 = vor.u32 %v4396_v0, %v4394_v49  ;;  %v4406_v33 = vor.u32 %v4404_v25, %v4402_v9  ;;  %v6408_v37 = vld [vmem:[%s6698_s21 + $0x138] sm:$0xff]  }
 0x231   : > { %v2685_v44 = vpop.f32.mrf.mxu0  ;;  %6094 = vmatmul.mubr.msk.bf16.gmra.mxu0 %vm727_vm2, %v6398_v34  ;;  %v4416_v51 = vshll.u32 %v6408_v37, 16 }
 0x232   : > { %v5958_v41 = vpop.f32.mrf.mxu1  ;;  %v2744_v48 = vadd.f32 %v2685_v44, %v7414_v36  ;;  %6137 = vmatprep.mubr.msk.bf16.mxu0 %vm6497_vm1, %v6496_v45 }
 0x233   : > { %v5919_v6 = vpop.f32.mrf.mxu0  ;;  %v6405_v41 = vld [vmem:[%s6698_s21 + $0x120] sm:$0xff]  }
 0x234   : > { %v2991_v39 = vpop.f32.mrf.mxu1  ;;  %6176 = vmatmul.mubr.msk.bf16.vlgmr.msra.gmra.mxu1 %vm727_vm2, %v4387_v35  ;;  %v7551_v52 = vadd.f32 %v2983_v22, %v2744_v48  ;;  %v4403_v22 = vsel %vm650_vm3, %v4398_v54, %v4402_v9  ;;  %v4412_v6 = vshrl.u32 %v6406_v28, 16 }
 0x235   : > { %6179 = vmatprep.mubr.msk.bf16.mxu1 %vm6497_vm1, %v6496_v45  ;;  %v2688_v42 = vpop.f32.mrf.mxu0 }
 0x236   : > { %v5961_v29 = vpop.f32.mrf.mxu1  ;;  %v2745_v36 = vadd.f32 %v2688_v42, %v7420_v16 }
 0x237   : > { %v5920_v57 = vpop.f32.mrf.mxu0 }
 0x238   : > { %v2994_v58 = vpop.f32.mrf.mxu1  ;;  %v7556_v11 = vadd.f32 %v2986_v2, %v2745_v36  ;;  %v4410_v2 = vrot.slane %v4408_v18, 1  ;;  %v6410_v57 = vld [vmem:[%s6698_s21 + $0x140] sm:$0xff]  }
 0x239   : > { %v2693_v46 = vpop.f32.mrf.mxu0  ;;  %6138 = vmatmul.mubr.msk.bf16.vlgmr.msra.gmra.mxu0 %vm727_vm2, %v6401_v63  ;;  %v4424_v54 = vshll.u32 %v6410_v57, 16 }
 0x23a   : > { %v5962_v24 = vpop.f32.mrf.mxu1  ;;  %v2746_v15 = vadd.f32 %v2693_v46, %v7430_v50  ;;  %6141 = vmatprep.mubr.msk.bf16.mxu0 %vm6497_vm1, %v6496_v45  ;;  %v4414_v36 = vor.u32 %v4412_v6, %v4410_v2 }
 0x23b   : > { %v5923_v16 = vpop.f32.mrf.mxu0  ;;  %v6407_v24 = vld [vmem:[%s6698_s21 + $0x128] sm:$0xff]  }
 0x23c   : > { %v2999_v47 = vpop.f32.mrf.mxu1  ;;  %6180 = vmatmul.mubr.msk.bf16.gmra.mxu1 %vm727_vm2, %v4395_v59  ;;  %v7566_v14 = vadd.f32 %v2991_v39, %v2746_v15  ;;  %v4411_v39 = vsel %vm650_vm3, %v4406_v33, %v4410_v2  ;;  %v4420_v16 = vshrl.u32 %v6408_v37, 16 }
 0x23d   : > { %6183 = vmatprep.mubr.msk.bf16.mxu1 %vm6497_vm1, %v6496_v45  ;;  %v2696_v13 = vpop.f32.mrf.mxu0 }
 0x23e   : > { %v5965_v12 = vpop.f32.mrf.mxu1  ;;  %v2747_v50 = vadd.f32 %v2696_v13, %v7435_v61 }
 0x23f   : > { %v5924_v23 = vpop.f32.mrf.mxu0 }
 0x240   : > { %v3002_v19 = vpop.f32.mrf.mxu1  ;;  %v7571_v30 = vadd.f32 %v2994_v58, %v2747_v50  ;;  %v4418_v58 = vrot.slane %v4416_v51, 1  ;;  %v6412_v23 = vld [vmem:[%s6698_s21 + $0x148] sm:$0xff]  }
 0x241   : > { %v2701_v4 = vpop.f32.mrf.mxu0  ;;  %6142 = vmatmul.mubr.msk.bf16.gmra.mxu0 %vm727_vm2, %v6403_v21  ;;  %v4432_v33 = vshll.u32 %v6412_v23, 16 }
 0x242   : > { %v5966_v26 = vpop.f32.mrf.mxu1  ;;  %v2748_v56 = vadd.f32 %v2701_v4, %v7445_v7  ;;  %6145 = vmatprep.mubr.msk.bf16.mxu0 %vm6497_vm1, %v6496_v45  ;;  %v4422_v50 = vor.u32 %v4420_v16, %v4418_v58 }
 0x243   : > { %v5927_v61 = vpop.f32.mrf.mxu0  ;;  %v6409_v26 = vld [vmem:[%s6698_s21 + $0x130] sm:$0xff]  }
 0x244   : > { %v3007_v34 = vpop.f32.mrf.mxu1  ;;  %6184 = vmatmul.mubr.msk.bf16.gmra.mxu1 %vm727_vm2, %v4403_v22  ;;  %v7581_v38 = vadd.f32 %v2999_v47, %v2748_v56  ;;  %v4419_v47 = vsel %vm650_vm3, %v4414_v36, %v4418_v58  ;;  %v4428_v61 = vshrl.u32 %v6410_v57, 16 }
 0x245   : > { %6187 = vmatprep.mubr.msk.bf16.mxu1 %vm6497_vm1, %v6496_v45  ;;  %v2704_v43 = vpop.f32.mrf.mxu0 }
 0x246   : > { %v5969_v35 = vpop.f32.mrf.mxu1  ;;  %v2749_v7 = vadd.f32 %v2704_v43, %v7450_v62 }
 0x247   : > { %v5928_v48 = vpop.f32.mrf.mxu0 }
 0x248   : > { %v3010_v44 = vpop.f32.mrf.mxu1  ;;  %v7586_v53 = vadd.f32 %v3002_v19, %v2749_v7  ;;  %v4426_v19 = vrot.slane %v4424_v54, 1  ;;  %v6414_v48 = vld [vmem:[%s6698_s21 + $0x150] sm:$0xff]  }
 0x249   : > { %v2709_v29 = vpop.f32.mrf.mxu0  ;;  %6146 = vmatmul.mubr.msk.bf16.gmra.mxu0 %vm727_vm2, %v6405_v41  ;;  %v4440_v36 = vshll.u32 %v6414_v48, 16 }
 0x24a   : > { %v5970_v49 = vpop.f32.mrf.mxu1  ;;  %v2750_v42 = vadd.f32 %v2709_v29, %v7460_v10  ;;  %6149 = vmatprep.mubr.msk.bf16.mxu0 %vm6497_vm1, %v6496_v45  ;;  %v4430_v7 = vor.u32 %v4428_v61, %v4426_v19 }
 0x24b   : > { %v5931_v62 = vpop.f32.mrf.mxu0  ;;  %v6411_v49 = vld [vmem:[%s6698_s21 + $0x138] sm:$0xff]  }
 0x24c   : > { %v3015_v63 = vpop.f32.mrf.mxu1  ;;  %6188 = vmatmul.mubr.msk.bf16.gmra.mxu1 %vm727_vm2, %v4411_v39  ;;  %v7596_v0 = vadd.f32 %v3007_v34, %v2750_v42  ;;  %v4427_v34 = vsel %vm650_vm3, %v4422_v50, %v4426_v19  ;;  %v4436_v62 = vshrl.u32 %v6412_v23, 16 }
 0x24d   : > { %6191 = vmatprep.mubr.msk.bf16.mxu1 %vm6497_vm1, %v6496_v45  ;;  %v2712_v60 = vpop.f32.mrf.mxu0 }
 0x24e   : > { %v5973_v59 = vpop.f32.mrf.mxu1  ;;  %v2751_v10 = vadd.f32 %v2712_v60, %v7465_v20 }
 0x24f   : > { %v5932_v15 = vpop.f32.mrf.mxu0 }
 0x250   : > { %v3018_v46 = vpop.f32.mrf.mxu1  ;;  %v7601_v28 = vadd.f32 %v3010_v44, %v2751_v10  ;;  %v4434_v44 = vrot.slane %v4432_v33, 1  ;;  %v6416_v15 = vld [vmem:[%s6698_s21 + $0x158] ss:$0 sps:$4 sm:$0x11]   ;;  %v6415_v33 = vld [vmem:[%s6698_s21 + $0x148] sm:$0xff]  }
 0x251   : > { %v2717_v12 = vpop.f32.mrf.mxu0  ;;  %6150 = vmatmul.mubr.msk.bf16.gmra.mxu0 %vm727_vm2, %v6407_v24  ;;  %v4448_v50 = vshll.u32 %v6416_v15, 16 }
 0x252   : > { %v5974_v9 = vpop.f32.mrf.mxu1  ;;  %v2752_v13 = vadd.f32 %v2717_v12, %v7475_v32  ;;  %6153 = vmatprep.mubr.msk.bf16.mxu0 %vm6497_vm1, %v6496_v45  ;;  %v4438_v10 = vor.u32 %v4436_v62, %v4434_v44 }
 0x253   : > { %v5935_v20 = vpop.f32.mrf.mxu0  ;;  %v6413_v9 = vld [vmem:[%s6698_s21 + $0x140] sm:$0xff]  }
 0x254   : > { %v3023_v21 = vpop.f32.mrf.mxu1  ;;  %6192 = vmatmul.mubr.msk.bf16.gmra.mxu1 %vm727_vm2, %v4419_v47  ;;  %v7611_v25 = vadd.f32 %v3015_v63, %v2752_v13  ;;  %v4435_v63 = vsel %vm650_vm3, %v4430_v7, %v4434_v44  ;;  %v4444_v20 = vshrl.u32 %v6414_v48, 16 }
 0x255   : > { %6195 = vmatprep.mubr.msk.bf16.mxu1 %vm6497_vm1, %v6496_v45  ;;  %v2720_v18 = vpop.f32.mrf.mxu0 }
 0x256   : > { %v5977_v22 = vpop.f32.mrf.mxu1  ;;  %v2753_v32 = vadd.f32 %v2720_v18, %v7480_v27 }
 0x257   : > { %v5936_v56 = vpop.f32.mrf.mxu0 }
 0x258   : > { %v3026_v4 = vpop.f32.mrf.mxu1  ;;  %v7616_v37 = vadd.f32 %v3018_v46, %v2753_v32  ;;  %v4442_v46 = vrot.slane %v4440_v36, 1 }
 0x259   : > { %v2725_v35 = vpop.f32.mrf.mxu0  ;;  %6154 = vmatmul.mubr.msk.bf16.gmra.mxu0 %vm727_vm2, %v6409_v26 }
 0x25a   : > { %v5978_v2 = vpop.f32.mrf.mxu1  ;;  %v2754_v43 = vadd.f32 %v2725_v35, %v7490_v55  ;;  %6157 = vmatprep.mubr.msk.bf16.mxu0 %vm6497_vm1, %v6496_v45  ;;  %v4446_v32 = vor.u32 %v4444_v20, %v4442_v46 }
 0x25b   : > { %v5939_v27 = vpop.f32.mrf.mxu0 }
 0x25c   : > { %v3031_v41 = vpop.f32.mrf.mxu1  ;;  %6196 = vmatmul.mubr.msk.bf16.gmra.mxu1 %vm727_vm2, %v4427_v34  ;;  %v7626_v6 = vadd.f32 %v3023_v21, %v2754_v43  ;;  %v4443_v21 = vsel %vm650_vm3, %v4438_v10, %v4442_v46 }
 0x25d   : > { %6199 = vmatprep.mubr.msk.bf16.mxu1 %vm6497_vm1, %v6496_v45  ;;  %v2728_v51 = vpop.f32.mrf.mxu0 }
 0x25e   : > { %v5981_v39 = vpop.f32.mrf.mxu1  ;;  %v2755_v55 = vadd.f32 %v2728_v51, %v7495_v17 }
 0x25f   : > { %v5940_v42 = vpop.f32.mrf.mxu0 }
 0x260   : > { %v3034_v29 = vpop.f32.mrf.mxu1  ;;  %v7631_v57 = vadd.f32 %v3026_v4, %v2755_v55  ;;  %v4450_v4 = vrot.slane %v4448_v50, 1  ;;  %v6417_v55 = vld [vmem:[%s6698_s21 + $0x150] sm:$0xff]  }
 0x261   : > { %v2733_v59 = vpop.f32.mrf.mxu0  ;;  %6158 = vmatmul.mubr.msk.bf16.gmra.mxu0 %vm727_vm2, %v6411_v49 }
 0x262   : > { %v5982_v58 = vpop.f32.mrf.mxu1  ;;  %v2756_v60 = vadd.f32 %v2733_v59, %v7505_v40  ;;  %6161 = vmatprep.mubr.msk.bf16.mxu0 %vm6497_vm1, %v6496_v45  ;;  %v4451_v43 = vsel %vm650_vm3, %v4446_v32, %v4450_v4 }
 0x263   : > { %v5943_v17 = vpop.f32.mrf.mxu0 }
 0x264   : > { %v3483_v24 = vpop.f32.mrf.mxu1  ;;  %6200 = vmatmul.mubr.msk.bf16.gmra.mxu1 %vm727_vm2, %v4435_v63  ;;  %v7641_v16 = vadd.f32 %v3031_v41, %v2756_v60 }
 0x265   : > { %6203 = vmatprep.mubr.msk.bf16.mxu1 %vm6497_vm1, %v6496_v45  ;;  %v2736_v54 = vpop.f32.mrf.mxu0 }
 0x266   : > { %v6025_v47 = vpop.f32.mrf.mxu1  ;;  %v2757_v40 = vadd.f32 %v2736_v54, %v7511_v31 }
 0x267   : > { %v5944_v13 = vpop.f32.mrf.mxu0 }
 0x268   : > { %v3486_v12 = vpop.f32.mrf.mxu1  ;;  %v7646_v23 = vadd.f32 %v3034_v29, %v2757_v40 }
 0x269   : > { %v3185_v22 = vpop.f32.mrf.mxu0  ;;  %6162 = vmatmul.mubr.msk.bf16.gmra.mxu0 %vm727_vm2, %v6413_v9 }
 0x26a   : > { %v6026_v19 = vpop.f32.mrf.mxu1  ;;  %v3256_v18 = vadd.f32 %v3185_v22, %v7521_v3  ;;  %6165 = vmatprep.mubr.msk.bf16.mxu0 %vm6497_vm1, %v6496_v45 }
 0x26b   : > { %v5987_v31 = vpop.f32.mrf.mxu0 }
 0x26c   : > { %v3491_v26 = vpop.f32.mrf.mxu1  ;;  %6204 = vmatmul.mubr.msk.bf16.gmra.mxu1 %vm727_vm2, %v4443_v21  ;;  %v7655_v34 = vadd.f32 %v3483_v24, %v3256_v18 }
 0x26d   : > { %6207 = vmatprep.mubr.msk.bf16.mxu1 %vm6497_vm1, %v6496_v45  ;;  %v3188_v61 = vpop.f32.mrf.mxu0 }
 0x26e   : > { %v6029_v56 = vpop.f32.mrf.mxu1  ;;  %v3257_v2 = vadd.f32 %v3188_v61, %v7526_v1 }
 0x26f   : > { %v5988_v35 = vpop.f32.mrf.mxu0 }
 0x270   : > { %v3494_v3 = vpop.f32.mrf.mxu1  ;;  %v7660_v27 = vadd.f32 %v3486_v12, %v3257_v2 }
 0x271   : > { %v3193_v7 = vpop.f32.mrf.mxu0  ;;  %6166 = vmatmul.mubr.msk.bf16.gmra.mxu0 %vm727_vm2, %v6415_v33 }
 0x272   : > { %v6030_v41 = vpop.f32.mrf.mxu1  ;;  %v3258_v44 = vadd.f32 %v3193_v7, %v7536_v5  ;;  %6169 = vmatprep.mubr.msk.bf16.mxu0 %vm6497_vm1, %v6496_v45 }
 0x273   : > { %v5991_v1 = vpop.f32.mrf.mxu0 }
 0x274   : > { %v3499_v48 = vpop.f32.mrf.mxu1  ;;  %6208 = vmatmul.mubr.msk.bf16.gmra.mxu1 %vm727_vm2, %v4451_v43  ;;  %v7667_v51 = vadd.f32 %v3491_v26, %v3258_v44 }
 0x275   : > { %v3196_v49 = vpop.f32.mrf.mxu0 }
 0x276   : > { %v6033_v39 = vpop.f32.mrf.mxu1  ;;  %v3259_v29 = vadd.f32 %v3196_v49, %v7541_v8 }
 0x277   : > { %v5992_v63 = vpop.f32.mrf.mxu0 }
 0x278   : > { %v3502_v42 = vpop.f32.mrf.mxu1  ;;  %v7671_v36 = vadd.f32 %v3494_v3, %v3259_v29 }
 0x279   : > { %v3201_v5 = vpop.f32.mrf.mxu0  ;;  %6170 = vmatmul.mubr.msk.bf16.gmra.mxu0 %vm727_vm2, %v6417_v55 }
 0x27a   : > { %v6034_v62 = vpop.f32.mrf.mxu1  ;;  %v3260_v58 = vadd.f32 %v3201_v5, %v7551_v52 }
 0x27b   : > { %v5995_v45 = vpop.f32.mrf.mxu0 }
 0x27c   : > { %v3507_v59 = vpop.f32.mrf.mxu1  ;;  %v7675_v24 = vadd.f32 %v3499_v48, %v3260_v58 }
 0x27d   : > { %v3204_v17 = vpop.f32.mrf.mxu0 }
 0x27e   : > { %v6037_v60 = vpop.f32.mrf.mxu1  ;;  %v3261_v10 = vadd.f32 %v3204_v17, %v7556_v11 }
 0x27f   : > { %v5996_v8 = vpop.f32.mrf.mxu0 }
 0x280   : > { %v3510_v46 = vpop.f32.mrf.mxu1  ;;  %v7678_v47 = vadd.f32 %v3502_v42, %v3261_v10 }
 0x281   : > { %v3209_v54 = vpop.f32.mrf.mxu0 }
 0x282   : > { %v6038_v15 = vpop.f32.mrf.mxu1  ;;  %v3262_v9 = vadd.f32 %v3209_v54, %v7566_v14 }
 0x283   : > { %v5999_v12 = vpop.f32.mrf.mxu0 }
 0x284   : > { %v3515_v40 = vpop.f32.mrf.mxu1  ;;  %v7681_v52 = vadd.f32 %v3507_v59, %v3262_v9 }
 0x285   : > { %v3212_v21 = vpop.f32.mrf.mxu0 }
 0x286   : > { %v6041_v13 = vpop.f32.mrf.mxu1  ;;  %v3263_v20 = vadd.f32 %v3212_v21, %v7571_v30 }
 0x287   : > { %v6000_v19 = vpop.f32.mrf.mxu0 }
 0x288   : > { %v3518_v50 = vpop.f32.mrf.mxu1  ;;  %v7684_v11 = vadd.f32 %v3510_v46, %v3263_v20 }
 0x289   : > { %v3217_v18 = vpop.f32.mrf.mxu0 }
 0x28a   : > { %v6042_v22 = vpop.f32.mrf.mxu1  ;;  %v3264_v26 = vadd.f32 %v3217_v18, %v7581_v38 }
 0x28b   : > { %v6003_v32 = vpop.f32.mrf.mxu0 }
 0x28c   : > { %v3523_v31 = vpop.f32.mrf.mxu1  ;;  %v7687_v14 = vadd.f32 %v3515_v40, %v3264_v26 }
 0x28d   : > { %v3220_v56 = vpop.f32.mrf.mxu0 }
 0x28e   : > { %v6045_v4 = vpop.f32.mrf.mxu1  ;;  %v3265_v61 = vadd.f32 %v3220_v56, %v7586_v53 }
 0x28f   : > { %v6004_v2 = vpop.f32.mrf.mxu0 }
 0x290   : > { %v3526_v33 = vpop.f32.mrf.mxu1  ;;  %v7690_v30 = vadd.f32 %v3518_v50, %v3265_v61 }
 0x291   : > { %v3225_v35 = vpop.f32.mrf.mxu0 }
 0x292   : > { %v6046_v3 = vpop.f32.mrf.mxu1  ;;  %v3266_v43 = vadd.f32 %v3225_v35, %v7596_v0 }
 0x293   : > { %v6007_v7 = vpop.f32.mrf.mxu0 }
 0x294   : > { %v3531_v41 = vpop.f32.mrf.mxu1  ;;  %v7693_v38 = vadd.f32 %v3523_v31, %v3266_v43 }
 0x295   : > { %v3228_v48 = vpop.f32.mrf.mxu0 }
 0x296   : > { %v6049_v44 = vpop.f32.mrf.mxu1  ;;  %v3267_v1 = vadd.f32 %v3228_v48, %v7601_v28 }
 0x297   : > { %v6008_v49 = vpop.f32.mrf.mxu0 }
 0x298   : > { %v3534_v39 = vpop.f32.mrf.mxu1  ;;  %v7696_v53 = vadd.f32 %v3526_v33, %v3267_v1 }
 0x299   : > { %v3233_v29 = vpop.f32.mrf.mxu0 }
 0x29a   : > { %v6050_v55 = vpop.f32.mrf.mxu1  ;;  %v3268_v42 = vadd.f32 %v3233_v29, %v7611_v25 }
 0x29b   : > { %v6011_v62 = vpop.f32.mrf.mxu0 }
 0x29c   : > { %v3539_v63 = vpop.f32.mrf.mxu1  ;;  %v7699_v0 = vadd.f32 %v3531_v41, %v3268_v42 }
 0x29d   : > { %v3236_v58 = vpop.f32.mrf.mxu0 }
 0x29e   : > { %v6053_v5 = vpop.f32.mrf.mxu1  ;;  %v3269_v59 = vadd.f32 %v3236_v58, %v7616_v37 }
 0x29f   : > { %v6012_v60 = vpop.f32.mrf.mxu0 }
 0x2a0   : > { %v3542_v45 = vpop.f32.mrf.mxu1  ;;  %v7702_v28 = vadd.f32 %v3534_v39, %v3269_v59 }
 0x2a1   : > { %v3241_v10 = vpop.f32.mrf.mxu0 }
 0x2a2   : > { %v6054_v17 = vpop.f32.mrf.mxu1  ;;  %v3270_v46 = vadd.f32 %v3241_v10, %v7626_v6 }
 0x2a3   : > { %v6015_v15 = vpop.f32.mrf.mxu0 }
 0x2a4   : > { %v3547_v8 = vpop.f32.mrf.mxu1  ;;  %v7705_v25 = vadd.f32 %v3539_v63, %v3270_v46 }
 0x2a5   : > { %v3244_v9 = vpop.f32.mrf.mxu0 }
 0x2a6   : > { %v6057_v54 = vpop.f32.mrf.mxu1  ;;  %v3271_v40 = vadd.f32 %v3244_v9, %v7631_v57 }
 0x2a7   : > { %v6016_v13 = vpop.f32.mrf.mxu0 }
 0x2a8   : > { %v3550_v12 = vpop.f32.mrf.mxu1  ;;  %v7708_v37 = vadd.f32 %v3542_v45, %v3271_v40 }
 0x2a9   : > { %v3249_v20 = vpop.f32.mrf.mxu0 }
 0x2aa   : > { %v6058_v21 = vpop.f32.mrf.mxu1  ;;  %v3272_v50 = vadd.f32 %v3249_v20, %v7641_v16 }
 0x2ab   : > { %v6019_v22 = vpop.f32.mrf.mxu0 }
 0x2ac   : > { %v4000_v19 = vpop.f32.mrf.mxu1  ;;  %v7711_v6 = vadd.f32 %v3547_v8, %v3272_v50 }
 0x2ad   : > { %v3252_v26 = vpop.f32.mrf.mxu0 }
 0x2ae   : > { %v6101_v18 = vpop.f32.mrf.mxu1  ;;  %v3273_v31 = vadd.f32 %v3252_v26, %v7646_v23 }
 0x2af   : > { %v6020_v4 = vpop.f32.mrf.mxu0 }
 0x2b0   : > { %v4003_v32 = vpop.f32.mrf.mxu1  ;;  %v7714_v57 = vadd.f32 %v3550_v12, %v3273_v31 }
 0x2b1   : > { %v3702_v61 = vpop.f32.mrf.mxu0 }
 0x2b2   : > { %v6102_v56 = vpop.f32.mrf.mxu1  ;;  %v3773_v33 = vadd.f32 %v3702_v61, %v7655_v34 }
 0x2b3   : > { %v6063_v3 = vpop.f32.mrf.mxu0 }
 0x2b4   : > { %v4008_v2 = vpop.f32.mrf.mxu1  ;;  %v7717_v16 = vadd.f32 %v4000_v19, %v3773_v33 }
 0x2b5   : > { %v3705_v43 = vpop.f32.mrf.mxu0 }
 0x2b6   : > { %v6105_v35 = vpop.f32.mrf.mxu1  ;;  %v3774_v41 = vadd.f32 %v3705_v43, %v7660_v27 }
 0x2b7   : > { %v6064_v44 = vpop.f32.mrf.mxu0 }
 0x2b8   : > { %v4011_v7 = vpop.f32.mrf.mxu1  ;;  %v7720_v23 = vadd.f32 %v4003_v32, %v3774_v41 }
 0x2b9   : > { %v3710_v1 = vpop.f32.mrf.mxu0 }
 0x2ba   : > { %v6106_v48 = vpop.f32.mrf.mxu1  ;;  %v3775_v39 = vadd.f32 %v3710_v1, %v7667_v51 }
 0x2bb   : > { %v6067_v55 = vpop.f32.mrf.mxu0 }
 0x2bc   : > { %v4016_v49 = vpop.f32.mrf.mxu1  ;;  %v7723_v34 = vadd.f32 %v4008_v2, %v3775_v39 }
 0x2bd   : > { %v3713_v42 = vpop.f32.mrf.mxu0 }
 0x2be   : > { %v6109_v29 = vpop.f32.mrf.mxu1  ;;  %v3776_v63 = vadd.f32 %v3713_v42, %v7671_v36 }
 0x2bf   : > { %v6068_v5 = vpop.f32.mrf.mxu0 }
 0x2c0   : > { %v4019_v62 = vpop.f32.mrf.mxu1  ;;  %v7726_v27 = vadd.f32 %v4011_v7, %v3776_v63 }
 0x2c1   : > { %v3718_v59 = vpop.f32.mrf.mxu0 }
 0x2c2   : > { %v6110_v58 = vpop.f32.mrf.mxu1  ;;  %v3777_v45 = vadd.f32 %v3718_v59, %v7675_v24 }
 0x2c3   : > { %v6071_v17 = vpop.f32.mrf.mxu0 }
 0x2c4   : > { %v4024_v60 = vpop.f32.mrf.mxu1  ;;  %v7729_v51 = vadd.f32 %v4016_v49, %v3777_v45 }
 0x2c5   : > { %v3721_v46 = vpop.f32.mrf.mxu0 }
 0x2c6   : > { %v6113_v10 = vpop.f32.mrf.mxu1  ;;  %v3778_v8 = vadd.f32 %v3721_v46, %v7678_v47 }
 0x2c7   : > { %v6072_v54 = vpop.f32.mrf.mxu0 }
 0x2c8   : > { %v4027_v15 = vpop.f32.mrf.mxu1  ;;  %v7732_v36 = vadd.f32 %v4019_v62, %v3778_v8 }
 0x2c9   : > { %v3726_v40 = vpop.f32.mrf.mxu0 }
 0x2ca   : > { %v6114_v9 = vpop.f32.mrf.mxu1  ;;  %v3779_v12 = vadd.f32 %v3726_v40, %v7681_v52 }
 0x2cb   : > { %v6075_v21 = vpop.f32.mrf.mxu0 }
 0x2cc   : > { %v4032_v13 = vpop.f32.mrf.mxu1  ;;  %v7735_v24 = vadd.f32 %v4024_v60, %v3779_v12 }
 0x2cd   : > { %v3729_v50 = vpop.f32.mrf.mxu0 }
 0x2ce   : > { %v6117_v20 = vpop.f32.mrf.mxu1  ;;  %v3780_v19 = vadd.f32 %v3729_v50, %v7684_v11 }
 0x2cf   : > { %v6076_v18 = vpop.f32.mrf.mxu0 }
 0x2d0   : > { %v4035_v22 = vpop.f32.mrf.mxu1  ;;  %v7738_v47 = vadd.f32 %v4027_v15, %v3780_v19 }
 0x2d1   : > { %v3734_v31 = vpop.f32.mrf.mxu0 }
 0x2d2   : > { %v6118_v26 = vpop.f32.mrf.mxu1  ;;  %v3781_v32 = vadd.f32 %v3734_v31, %v7687_v14 }
 0x2d3   : > { %v6079_v56 = vpop.f32.mrf.mxu0 }
 0x2d4   : > { %v4040_v4 = vpop.f32.mrf.mxu1  ;;  %v7741_v52 = vadd.f32 %v4032_v13, %v3781_v32 }
 0x2d5   : > { %v3737_v33 = vpop.f32.mrf.mxu0 }
 0x2d6   : > { %v6121_v61 = vpop.f32.mrf.mxu1  ;;  %v3782_v2 = vadd.f32 %v3737_v33, %v7690_v30 }
 0x2d7   : > { %v6080_v35 = vpop.f32.mrf.mxu0 }
 0x2d8   : > { %v4043_v3 = vpop.f32.mrf.mxu1  ;;  %v7744_v11 = vadd.f32 %v4035_v22, %v3782_v2 }
 0x2d9   : > { %v3742_v41 = vpop.f32.mrf.mxu0 }
 0x2da   : > { %v6122_v43 = vpop.f32.mrf.mxu1  ;;  %v3783_v7 = vadd.f32 %v3742_v41, %v7693_v38 }
 0x2db   : > { %v6083_v48 = vpop.f32.mrf.mxu0 }
 0x2dc   : > { %v4048_v44 = vpop.f32.mrf.mxu1  ;;  %v7747_v14 = vadd.f32 %v4040_v4, %v3783_v7 }
 0x2dd   : > { %v3745_v39 = vpop.f32.mrf.mxu0 }
 0x2de   : > { %v6125_v1 = vpop.f32.mrf.mxu1  ;;  %v3784_v49 = vadd.f32 %v3745_v39, %v7696_v53 }
 0x2df   : > { %v6084_v29 = vpop.f32.mrf.mxu0 }
 0x2e0   : > { %v4051_v55 = vpop.f32.mrf.mxu1  ;;  %v7750_v30 = vadd.f32 %v4043_v3, %v3784_v49 }
 0x2e1   : > { %v3750_v63 = vpop.f32.mrf.mxu0 }
 0x2e2   : > { %v6126_v42 = vpop.f32.mrf.mxu1  ;;  %v3785_v62 = vadd.f32 %v3750_v63, %v7699_v0 }
 0x2e3   : > { %v6087_v58 = vpop.f32.mrf.mxu0 }
 0x2e4   : > { %v4056_v5 = vpop.f32.mrf.mxu1  ;;  %v7753_v38 = vadd.f32 %v4048_v44, %v3785_v62 }
 0x2e5   : > { %v3753_v45 = vpop.f32.mrf.mxu0 }
 0x2e6   : > { %v6129_v59 = vpop.f32.mrf.mxu1  ;;  %v3786_v60 = vadd.f32 %v3753_v45, %v7702_v28 }
 0x2e7   : > { %v6088_v10 = vpop.f32.mrf.mxu0 }
 0x2e8   : > { %v4059_v17 = vpop.f32.mrf.mxu1  ;;  %v7756_v53 = vadd.f32 %v4051_v55, %v3786_v60 }
 0x2e9   : > { %v3758_v8 = vpop.f32.mrf.mxu0 }
 0x2ea   : > { %v6130_v46 = vpop.f32.mrf.mxu1  ;;  %v3787_v15 = vadd.f32 %v3758_v8, %v7705_v25 }
 0x2eb   : > { %v6091_v9 = vpop.f32.mrf.mxu0 }
 0x2ec   : > { %v4064_v54 = vpop.f32.mrf.mxu1  ;;  %v7759_v0 = vadd.f32 %v4056_v5, %v3787_v15 }
 0x2ed   : > { %v3761_v12 = vpop.f32.mrf.mxu0 }
 0x2ee   : > { %v6133_v40 = vpop.f32.mrf.mxu1  ;;  %v3788_v13 = vadd.f32 %v3761_v12, %v7708_v37 }
 0x2ef   : > { %v6092_v20 = vpop.f32.mrf.mxu0 }
 0x2f0   : > { %v4067_v21 = vpop.f32.mrf.mxu1  ;;  %v7762_v28 = vadd.f32 %v4059_v17, %v3788_v13 }
 0x2f1   : > { %v3766_v19 = vpop.f32.mrf.mxu0 }
 0x2f2   : > { %v6134_v50 = vpop.f32.mrf.mxu1  ;;  %v3789_v22 = vadd.f32 %v3766_v19, %v7711_v6  ;;  %v7774_v6 = vld [vmem:[%s7907_s2] ss:$0 sm:$0xff] }
 0x2f3   : > { %v6095_v26 = vpop.f32.mrf.mxu0 }
 0x2f4   : > { %v4516_v18 = vpop.f32.mrf.mxu1  ;;  %v7765_v25 = vadd.f32 %v4064_v54, %v3789_v22 }
 0x2f5   : > { %v3769_v32 = vpop.f32.mrf.mxu0 }
 0x2f6   : > { %v6177_v31 = vpop.f32.mrf.mxu1  ;;  %v3790_v4 = vadd.f32 %v3769_v32, %v7714_v57 }
 0x2f7   : > { %v6096_v61 = vpop.f32.mrf.mxu0 }
 0x2f8   : > { %v4519_v56 = vpop.f32.mrf.mxu1  ;;  %v7768_v33 = vadd.f32 %v4067_v21, %v3790_v4 }
 0x2f9   : > { %v4218_v2 = vpop.f32.mrf.mxu0 }
 0x2fa   : > { %v6178_v37 = vpop.f32.mrf.mxu1  ;;  %v4289_v3 = vadd.f32 %v4218_v2, %v7717_v16 }
 0x2fb   : > { %v6139_v43 = vpop.f32.mrf.mxu0 }
 0x2fc   : > { %v4524_v35 = vpop.f32.mrf.mxu1  ;;  %v4587_v41 = vadd.f32 %v4516_v18, %v4289_v3 }
 0x2fd   : > { %v4221_v44 = vpop.f32.mrf.mxu0 }
 0x2fe   : > { %v6181_v7 = vpop.f32.mrf.mxu1  ;;  %v4612_v57 = vadd.f32 %v7774_v6, %v4587_v41  ;;  %v4290_v48 = vadd.f32 %v4221_v44, %v7720_v23 }
 0x2ff   : > { %v6140_v39 = vpop.f32.mrf.mxu0 }
 0x300   : > { %v4527_v1 = vpop.f32.mrf.mxu1  ;;  %vm4630_vm4 = vcmp.ge.f32.partialorder %v4612_v57, 0.0  ;;  %v4648_v49 = vmul.f32 0.2, %v4612_v57  ;;  %v4588_v16 = vadd.f32 %v4519_v56, %v4290_v48 }
 0x301   : > { %v4226_v29 = vpop.f32.mrf.mxu0 }
 0x302   : > { %v6182_v55 = vpop.f32.mrf.mxu1  ;;  %v4666_v42 = vsel %vm4630_vm4, %v4612_v57, %v4648_v49  ;;  %v4613_v63 = vadd.f32 %v7774_v6, %v4588_v16  ;;  %v4291_v62 = vadd.f32 %v4226_v29, %v7723_v34 }
 0x303   : > { %v5425_v58 = vpack.c.bf16 %v4666_v42, %v4666_v42  ;;  %v6143_v59 = vpop.f32.mrf.mxu0 }
 0x304   : > { %v4532_v5 = vpop.f32.mrf.mxu1  ;;  %vm4631_vm6 = vcmp.ge.f32.partialorder %v4613_v63, 0.0  ;;  %v4649_v45 = vmul.f32 0.2, %v4613_v63  ;;  %v4589_v60 = vadd.f32 %v4524_v35, %v4291_v62 }
 0x305   : > { %4757 = vst.msk [vmem:[%s7781_s18] sm:$0xf] %vm4756_vm5, %v5425_v58  ;;  %v4229_v17 = vpop.f32.mrf.mxu0 }
 0x306   : > { %v6185_v23 = vpop.f32.mrf.mxu1  ;;  %v4667_v10 = vsel %vm4631_vm6, %v4613_v63, %v4649_v45  ;;  %v4614_v46 = vadd.f32 %v7774_v6, %v4589_v60  ;;  %v4292_v8 = vadd.f32 %v4229_v17, %v7726_v27 }
 0x307   : > { %v5426_v15 = vpack.c.bf16 %v4667_v10, %v4667_v10  ;;  %v6144_v54 = vpop.f32.mrf.mxu0 }
 0x308   : > { %v4535_v34 = vpop.f32.mrf.mxu1  ;;  %vm4632_vm7 = vcmp.ge.f32.partialorder %v4614_v46, 0.0  ;;  %v4650_v9 = vmul.f32 0.2, %v4614_v46  ;;  %v4590_v40 = vadd.f32 %v4527_v1, %v4292_v8 }
 0x309   : > { %4758 = vst.msk [vmem:[%s7781_s18 + $0x4] sm:$0xf] %vm4756_vm5, %v5426_v15  ;;  %v4234_v13 = vpop.f32.mrf.mxu0 }
 0x30a   : > { %v6186_v12 = vpop.f32.mrf.mxu1  ;;  %v4668_v21 = vsel %vm4632_vm7, %v4614_v46, %v4650_v9  ;;  %v4615_v20 = vadd.f32 %v7774_v6, %v4590_v40  ;;  %v4293_v50 = vadd.f32 %v4234_v13, %v7729_v51 }
 0x30b   : > { %v5427_v22 = vpack.c.bf16 %v4668_v21, %v4668_v21  ;;  %v6147_v18 = vpop.f32.mrf.mxu0 }
 0x30c   : > { %v4540_v19 = vpop.f32.mrf.mxu1  ;;  %vm4633_vm8 = vcmp.ge.f32.partialorder %v4615_v20, 0.0  ;;  %v4651_v27 = vmul.f32 0.2, %v4615_v20  ;;  %v4591_v26 = vadd.f32 %v4532_v5, %v4293_v50 }
 0x30d   : > { %4759 = vst.msk [vmem:[%s7781_s18 + $0x8] sm:$0xf] %vm4756_vm5, %v5427_v22  ;;  %v4237_v32 = vpop.f32.mrf.mxu0 }
 0x30e   : > { %v6189_v31 = vpop.f32.mrf.mxu1  ;;  %v4669_v4 = vsel %vm4633_vm8, %v4615_v20, %v4651_v27  ;;  %v4616_v56 = vadd.f32 %v7774_v6, %v4591_v26  ;;  %v4294_v61 = vadd.f32 %v4237_v32, %v7732_v36 }
 0x30f   : > { %v5428_v2 = vpack.c.bf16 %v4669_v4, %v4669_v4  ;;  %v6148_v3 = vpop.f32.mrf.mxu0 }
 0x310   : > { %v4543_v37 = vpop.f32.mrf.mxu1  ;;  %vm4634_vm9 = vcmp.ge.f32.partialorder %v4616_v56, 0.0  ;;  %v4652_v51 = vmul.f32 0.2, %v4616_v56  ;;  %v4592_v35 = vadd.f32 %v4535_v34, %v4294_v61 }
 0x311   : > { %4760 = vst.msk [vmem:[%s7781_s18 + $0xc] sm:$0xf] %vm4756_vm5, %v5428_v2  ;;  %v4242_v41 = vpop.f32.mrf.mxu0 }
 0x312   : > { %v6190_v43 = vpop.f32.mrf.mxu1  ;;  %v4670_v7 = vsel %vm4634_vm9, %v4616_v56, %v4652_v51  ;;  %v4617_v44 = vadd.f32 %v7774_v6, %v4592_v35  ;;  %v4295_v57 = vadd.f32 %v4242_v41, %v7735_v24 }
 0x313   : > { %v5429_v1 = vpack.c.bf16 %v4670_v7, %v4670_v7  ;;  %v6151_v39 = vpop.f32.mrf.mxu0 }
 0x314   : > { %v4548_v48 = vpop.f32.mrf.mxu1  ;;  %vm4635_vm10 = vcmp.ge.f32.partialorder %v4617_v44, 0.0  ;;  %v4653_v36 = vmul.f32 0.2, %v4617_v44  ;;  %v4593_v49 = vadd.f32 %v4540_v19, %v4295_v57 }
 0x315   : > { %4761 = vst.msk [vmem:[%s7781_s18 + $0x10] sm:$0xf] %vm4756_vm5, %v5429_v1  ;;  %v4245_v55 = vpop.f32.mrf.mxu0 }
 0x316   : > { %v6193_v16 = vpop.f32.mrf.mxu1  ;;  %v4671_v29 = vsel %vm4635_vm10, %v4617_v44, %v4653_v36  ;;  %v4618_v42 = vadd.f32 %v7774_v6, %v4593_v49  ;;  %v4296_v63 = vadd.f32 %v4245_v55, %v7738_v47 }
 0x317   : > { %v5430_v5 = vpack.c.bf16 %v4671_v29, %v4671_v29  ;;  %v6152_v58 = vpop.f32.mrf.mxu0 }
 0x318   : > { %v4551_v62 = vpop.f32.mrf.mxu1  ;;  %vm4636_vm11 = vcmp.ge.f32.partialorder %v4618_v42, 0.0  ;;  %v4654_v24 = vmul.f32 0.2, %v4618_v42  ;;  %v4594_v59 = vadd.f32 %v4543_v37, %v4296_v63 }
 0x319   : > { %4762 = vst.msk [vmem:[%s7781_s18 + $0x14] sm:$0xf] %vm4756_vm5, %v5430_v5  ;;  %v4250_v60 = vpop.f32.mrf.mxu0 }
 0x31a   : > { %v6194_v45 = vpop.f32.mrf.mxu1  ;;  %v4672_v23 = vsel %vm4636_vm11, %v4618_v42, %v4654_v24  ;;  %v4619_v17 = vadd.f32 %v7774_v6, %v4594_v59  ;;  %v4297_v10 = vadd.f32 %v4250_v60, %v7741_v52 }
 0x31b   : > { %v5431_v8 = vpack.c.bf16 %v4672_v23, %v4672_v23  ;;  %v6155_v34 = vpop.f32.mrf.mxu0 }
 0x31c   : > { %v4556_v46 = vpop.f32.mrf.mxu1  ;;  %vm4637_vm12 = vcmp.ge.f32.partialorder %v4619_v17, 0.0  ;;  %v4655_v47 = vmul.f32 0.2, %v4619_v17  ;;  %v4595_v15 = vadd.f32 %v4548_v48, %v4297_v10 }
 0x31d   : > { %4763 = vst.msk [vmem:[%s7781_s18 + $0x18] sm:$0xf] %vm4756_vm5, %v5431_v8  ;;  %v4253_v9 = vpop.f32.mrf.mxu0 }
 0x31e   : > { %v6197_v54 = vpop.f32.mrf.mxu1  ;;  %v4673_v40 = vsel %vm4637_vm12, %v4619_v17, %v4655_v47  ;;  %v4620_v12 = vadd.f32 %v7774_v6, %v4595_v15  ;;  %v4298_v13 = vadd.f32 %v4253_v9, %v7744_v11 }
 0x31f   : > { %v5432_v20 = vpack.c.bf16 %v4673_v40, %v4673_v40  ;;  %v6156_v50 = vpop.f32.mrf.mxu0 }
 0x320   : > { %v4559_v21 = vpop.f32.mrf.mxu1  ;;  %vm4638_vm13 = vcmp.ge.f32.partialorder %v4620_v12, 0.0  ;;  %v4656_v52 = vmul.f32 0.2, %v4620_v12  ;;  %v4596_v19 = vadd.f32 %v4551_v62, %v4298_v13 }
 0x321   : > { %4764 = vst.msk [vmem:[%s7781_s18 + $0x1c] sm:$0xf] %vm4756_vm5, %v5432_v20  ;;  %v4258_v18 = vpop.f32.mrf.mxu0 }
 0x322   : > { %v6198_v22 = vpop.f32.mrf.mxu1  ;;  %v4674_v27 = vsel %vm4638_vm13, %v4620_v12, %v4656_v52  ;;  %v4621_v26 = vadd.f32 %v7774_v6, %v4596_v19  ;;  %v4299_v31 = vadd.f32 %v4258_v18, %v7747_v14 }
 0x323   : > { %v5433_v4 = vpack.c.bf16 %v4674_v27, %v4674_v27  ;;  %v6159_v56 = vpop.f32.mrf.mxu0 }
 0x324   : > { %v4564_v32 = vpop.f32.mrf.mxu1  ;;  %vm4639_vm14 = vcmp.ge.f32.partialorder %v4621_v26, 0.0  ;;  %v4657_v11 = vmul.f32 0.2, %v4621_v26  ;;  %v4597_v61 = vadd.f32 %v4556_v46, %v4299_v31 }
 0x325   : > { %4765 = vst.msk [vmem:[%s7781_s18 + $0x20] sm:$0xf] %vm4756_vm5, %v5433_v4  ;;  %v4261_v2 = vpop.f32.mrf.mxu0 }
 0x326   : > { %v6201_v37 = vpop.f32.mrf.mxu1  ;;  %v4675_v3 = vsel %vm4639_vm14, %v4621_v26, %v4657_v11  ;;  %v4622_v51 = vadd.f32 %v7774_v6, %v4597_v61  ;;  %v4300_v35 = vadd.f32 %v4261_v2, %v7750_v30 }
 0x327   : > { %v5434_v41 = vpack.c.bf16 %v4675_v3, %v4675_v3  ;;  %v6160_v7 = vpop.f32.mrf.mxu0 }
 0x328   : > { %v4567_v43 = vpop.f32.mrf.mxu1  ;;  %vm4640_vm15 = vcmp.ge.f32.partialorder %v4622_v51, 0.0  ;;  %v4658_v14 = vmul.f32 0.2, %v4622_v51  ;;  %v4598_v44 = vadd.f32 %v4559_v21, %v4300_v35 }
 0x329   : > { %4766 = vst.msk [vmem:[%s7781_s18 + $0x24] sm:$0xf] %vm4756_vm5, %v5434_v41  ;;  %v4266_v48 = vpop.f32.mrf.mxu0 }
 0x32a   : > { %v6202_v57 = vpop.f32.mrf.mxu1  ;;  %v4676_v1 = vsel %vm4640_vm15, %v4622_v51, %v4658_v14  ;;  %v4623_v39 = vadd.f32 %v7774_v6, %v4598_v44  ;;  %v4301_v36 = vadd.f32 %v4266_v48, %v7753_v38 }
 0x32b   : > { %v5435_v16 = vpack.c.bf16 %v4676_v1, %v4676_v1  ;;  %v6163_v55 = vpop.f32.mrf.mxu0 }
 0x32c   : > { %v4572_v49 = vpop.f32.mrf.mxu1  ;;  %vm4641_vm0 = vcmp.ge.f32.partialorder %v4623_v39, 0.0  ;;  %v4659_v30 = vmul.f32 0.2, %v4623_v39  ;;  %v4599_v29 = vadd.f32 %v4564_v32, %v4301_v36 }
 0x32d   : > { %4767 = vst.msk [vmem:[%s7781_s18 + $0x28] sm:$0xf] %vm4756_vm5, %v5435_v16  ;;  %v4269_v63 = vpop.f32.mrf.mxu0 }
 0x32e   : > { %v6205_v42 = vpop.f32.mrf.mxu1  ;;  %v4677_v62 = vsel %vm4641_vm0, %v4623_v39, %v4659_v30  ;;  %v4624_v5 = vadd.f32 %v7774_v6, %v4599_v29  ;;  %v4302_v58 = vadd.f32 %v4269_v63, %v7756_v53 }
 0x32f   : > { %v5436_v59 = vpack.c.bf16 %v4677_v62, %v4677_v62  ;;  %v6164_v45 = vpop.f32.mrf.mxu0 }
 0x330   : > { %v4575_v24 = vpop.f32.mrf.mxu1  ;;  %vm4642_vm1 = vcmp.ge.f32.partialorder %v4624_v5, 0.0  ;;  %v4660_v38 = vmul.f32 0.2, %v4624_v5  ;;  %v4600_v60 = vadd.f32 %v4567_v43, %v4302_v58 }
 0x331   : > { %4768 = vst.msk [vmem:[%s7781_s18 + $0x2c] sm:$0xf] %vm4756_vm5, %v5436_v59  ;;  %v4274_v17 = vpop.f32.mrf.mxu0 }
 0x332   : > { %v6206_v23 = vpop.f32.mrf.mxu1  ;;  %v4678_v10 = vsel %vm4642_vm1, %v4624_v5, %v4660_v38  ;;  %v4625_v46 = vadd.f32 %v7774_v6, %v4600_v60  ;;  %v4303_v8 = vadd.f32 %v4274_v17, %v7759_v0 }
 0x333   : > { %v5437_v47 = vpack.c.bf16 %v4678_v10, %v4678_v10  ;;  %v6167_v15 = vpop.f32.mrf.mxu0 }
 0x334   : > { %v4580_v34 = vpop.f32.mrf.mxu1  ;;  %vm4643_vm2 = vcmp.ge.f32.partialorder %v4625_v46, 0.0  ;;  %v4661_v53 = vmul.f32 0.2, %v4625_v46  ;;  %v4601_v54 = vadd.f32 %v4572_v49, %v4303_v8 }
 0x335   : > { %4769 = vst.msk [vmem:[%s7781_s18 + $0x30] sm:$0xf] %vm4756_vm5, %v5437_v47  ;;  %v4277_v40 = vpop.f32.mrf.mxu0 }
 0x336   : > { %v6209_v9 = vpop.f32.mrf.mxu1  ;;  %v4679_v12 = vsel %vm4643_vm2, %v4625_v46, %v4661_v53  ;;  %v4626_v13 = vadd.f32 %v7774_v6, %v4601_v54  ;;  %v4304_v21 = vadd.f32 %v4277_v40, %v7762_v28 }
 0x337   : > { %v5438_v50 = vpack.c.bf16 %v4679_v12, %v4679_v12  ;;  %v6168_v0 = vpop.f32.mrf.mxu0 }
 0x338   : > { %v4583_v20 = vpop.f32.mrf.mxu1  ;;  %vm4644_vm3 = vcmp.ge.f32.partialorder %v4626_v13, 0.0  ;;  %v4662_v52 = vmul.f32 0.2, %v4626_v13  ;;  %v4602_v19 = vadd.f32 %v4575_v24, %v4304_v21 }
 0x339   : > { %4770 = vst.msk [vmem:[%s7781_s18 + $0x34] sm:$0xf] %vm4756_vm5, %v5438_v50  ;;  %v4282_v18 = vpop.f32.mrf.mxu0 }
 0x33a   : > { %v6210_v22 = vpop.f32.mrf.mxu1  ;;  %v4680_v27 = vsel %vm4644_vm3, %v4626_v13, %v4662_v52  ;;  %v4627_v26 = vadd.f32 %v7774_v6, %v4602_v19  ;;  %v4305_v31 = vadd.f32 %v4282_v18, %v7765_v25 }
 0x33b   : > { %v5439_v32 = vpack.c.bf16 %v4680_v27, %v4680_v27  ;;  %v6171_v4 = vpop.f32.mrf.mxu0 }
 0x33c   : > { %vm4645_vm4 = vcmp.ge.f32.partialorder %v4627_v26, 0.0  ;;  %v4663_v28 = vmul.f32 0.2, %v4627_v26  ;;  %v4603_v56 = vadd.f32 %v4580_v34, %v4305_v31 }
 0x33d   : > { %4771 = vst.msk [vmem:[%s7781_s18 + $0x38] sm:$0xf] %vm4756_vm5, %v5439_v32  ;;  %v4285_v11 = vpop.f32.mrf.mxu0 }
 0x33e   : > { %v4681_v61 = vsel %vm4645_vm4, %v4627_v26, %v4663_v28  ;;  %v4628_v37 = vadd.f32 %v7774_v6, %v4603_v56  ;;  %v4306_v2 = vadd.f32 %v4285_v11, %v7768_v33 }
 0x33f   : > { %v5440_v3 = vpack.c.bf16 %v4681_v61, %v4681_v61  ;;  %v6172_v51 = vpop.f32.mrf.mxu0 }
 0x340   : > { %vm4646_vm6 = vcmp.ge.f32.partialorder %v4628_v37, 0.0  ;;  %v4664_v25 = vmul.f32 0.2, %v4628_v37  ;;  %v4604_v35 = vadd.f32 %v4583_v20, %v4306_v2 }
 0x341   : > { %4772 = vst.msk [vmem:[%s7781_s18 + $0x3c] sm:$0xf] %vm4756_vm5, %v5440_v3 }
 0x342   : > { %v4682_v43 = vsel %vm4646_vm6, %v4628_v37, %v4664_v25  ;;  %v4629_v41 = vadd.f32 %v7774_v6, %v4604_v35 }
 0x343   : > { %v5441_v7 = vpack.c.bf16 %v4682_v43, %v4682_v43 }
 0x344   : > { %vm4647_vm7 = vcmp.ge.f32.partialorder %v4629_v41, 0.0  ;;  %v4665_v14 = vmul.f32 0.2, %v4629_v41 }
 0x345   : > { %4773 = vst.msk [vmem:[%s7781_s18 + $0x40] sm:$0xf] %vm4756_vm5, %v5441_v7 }
 0x346   : > { %v4683_v33 = vsel %vm4647_vm7, %v4629_v41, %v4665_v14 }
 0x347   : > { %v5442_v44 = vpack.c.bf16 %v4683_v33, %v4683_v33 }
 0x349   : > { %4774 = vst.msk [vmem:[%s7781_s18 + $0x44] sm:$0xf] %vm4756_vm5, %v5442_v44 }
 0x34a   : > { %6431 = shalt.err (!%p6428_p7)
}
 0x34b   : > { %s6432_s6 = scalar_lea.hbm %s7853_s28, 1152  ;;  %s6436_s21 = scalar_lea.hbm %s7908_s3, 2304 }
 0x34c   : > { %p6433_p8 = scmp.ne.s32.totalorder %s7853_s28, %s6432_s6  ;;  %p6437_p13 = scmp.lt.s32.totalorder %s7853_s28, %s7908_s3 }
 0x34d   : > { %p6438_p0 = scmp.lt.s32.totalorder %s6436_s21, %s6432_s6 }
 0x34e   : > { %p6434_p11 = pnand %p6433_p8, %p6560_p5 }
 0x34f   : > { %p6439_p1 = por %p6438_p0, %p6437_p13 }
 0x350   : > { %p6435_p12 = pneg %p6434_p11 }
 0x352   : > { %p6440_p2 = pnand %p6439_p1, %p6435_p12 }
 0x354   : > { %6443 = shalt.err (!%p6440_p2)
}
 0x355   : > { %s6499_s18 = smov 64   ;;  %s6500_s19 = smov 4  }
 0x356   : > { %6216 = dma.vmem_to_hbm [thread:$0]  (%p6560_p5), %s7855_s23, 1152, %s7853_s28, %s4776_s15, %s6499_s18, %s6499_s18, %s6500_s19  }
 0x357 PF: > { %s4806_s26 = sand.u32 1, %s6474_s12   ;;  %p6219_p3 = pnand %p4876_p10, %p6571_p9 }
 0x358   : > { %s4807_s27 = scalar_lea.sflag [#allocation4], %s4806_s26 }
 0x359   : > { %p6220_p4 = pneg %p6219_p3 }
 0x35b   : > { %6469 = dma.done.wait (%p6220_p4), %s4807_s27, 1152  }
 0x35c   : > { %6471 = vsyncadd (%p6220_p4), %s4807_s27, 4294966144  ;;  %s16_s17 = sadd.s32 1, %s6494_s17   ;;  %s7911_s12 = smov %s6478_s13 }
 0x35d   : > { %p13_p6 = scmp.ge.s32.totalorder %s16_s17, 4   ;;  %s7912_s13 = smov %s6482_s14 }
 0x35e   : > { %s7913_s14 = smov %s6569_s24  ;;  %s7914_s15 = smov %s6490_s16 }
 0x35f   : > { %s7915_s16 = smov %s7917_s20  ;;  %15 = sbr.rel (!%p13_p6) target bundleno = 4 (0x4), region = 131 }
 0x364   :  { %4812 = vsyncpa [#allocation4], 1 }
 0x365   :  { %4814 = vsyncpa [#allocation4 + $0x1], 1 }

</bundles_post_ra>
